<compile_context>
chip_gen: v5e
topology: v5e:2x2
jax: 0.10.0
libtpu: 0.0.40
codegen_flags: <defaults>
</compile_context>

<pallas_src>
import jax
import jax.numpy as jnp
from jax.experimental import pallas as pl
from jax.experimental.pallas import tpu as pltpu

IN_EPS = 1e-5


# ------------------------------- Pallas kernel -------------------------------

def _residual_block_kernel(x_ref, w1_ref, g1_ref, b1_ref, w2_ref, g2_ref, b2_ref,
                           o_ref, pad_ref):
    """Fused ResidualBlock forward for one batch element.

    x_ref  : (1, H, W, C) f32   input activation, channel-last
    w*_ref : (9, C, C)    bf16  conv weights, tap-major: w[kh*3+kw] = W_torch[:, :, kh, kw].T
    g*/b*  : (1, C)       f32   InstanceNorm affine weight / bias
    o_ref  : (1, H, W, C) f32   output = x + main(x)
    pad_ref: (H+2, W+2, C) f32  VMEM scratch — zero-halo padded activation buffer
    """
    _, H, W, C = x_ref.shape

    x = x_ref[0]                                     # (H, W, C) f32
    x_mat = x.reshape(H * W, C)

    # Zero the whole padded buffer every grid step (halo stays zero; interior is overwritten).
    pad_ref[...] = jnp.zeros(pad_ref.shape, pad_ref.dtype)

    def conv3x3(w_ref):
        # 3x3 / stride 1 / pad 1 conv as 9 shifted matmuls on the zero-halo padded buffer.
        acc = jnp.zeros((H * W, C), jnp.float32)
        for kh in range(3):
            for kw in range(3):
                win = pad_ref[kh:kh + H, kw:kw + W, :]              # (H, W, C) f32
                win = win.reshape(H * W, C).astype(jnp.bfloat16)    # bf16 MXU operand
                acc = acc + jnp.dot(win, w_ref[kh * 3 + kw],
                                    preferred_element_type=jnp.float32)
        return acc                                                  # (H*W, C) f32

    def instance_norm(y, g_ref, b_ref):
        # Per-sample, per-channel stats over spatial; biased variance (torch InstanceNorm2d).
        mean = jnp.mean(y, axis=0, keepdims=True)
        var = jnp.mean(jnp.square(y - mean), axis=0, keepdims=True)
        return (y - mean) * jax.lax.rsqrt(var + IN_EPS) * g_ref[...] + b_ref[...]

    # conv1 -> InstanceNorm -> ReLU
    pad_ref[1:H + 1, 1:W + 1, :] = x
    h = conv3x3(w1_ref)
    h = instance_norm(h, g1_ref, b1_ref)
    h = jnp.maximum(h, 0.0)

    # conv2 -> InstanceNorm
    pad_ref[1:H + 1, 1:W + 1, :] = h.reshape(H, W, C)
    h = conv3x3(w2_ref)
    h = instance_norm(h, g2_ref, b2_ref)

    # residual add + lane-dense store
    o_ref[0] = (x_mat + h).reshape(H, W, C).astype(o_ref.dtype)


# ----------------------------- pallas_call wrapper -----------------------------

def residual_block_pallas(x_nhwc, w1_taps, g1, b1, w2_taps, g2, b2):
    n, h, w, c = x_nhwc.shape
    return pl.pallas_call(
        _residual_block_kernel,
        out_shape=jax.ShapeDtypeStruct((n, h, w, c), jnp.float32),
        grid_spec=pltpu.PrefetchScalarGridSpec(
            num_scalar_prefetch=0,
            grid=(n,),
            in_specs=[
                pl.BlockSpec((1, h, w, c), lambda i: (i, 0, 0, 0)),
                pl.BlockSpec((9, c, c), lambda i: (0, 0, 0)),   # weights stay VMEM-resident
                pl.BlockSpec((1, c), lambda i: (0, 0)),
                pl.BlockSpec((1, c), lambda i: (0, 0)),
                pl.BlockSpec((9, c, c), lambda i: (0, 0, 0)),
                pl.BlockSpec((1, c), lambda i: (0, 0)),
                pl.BlockSpec((1, c), lambda i: (0, 0)),
            ],
            out_specs=pl.BlockSpec((1, h, w, c), lambda i: (i, 0, 0, 0)),
            scratch_shapes=[pltpu.VMEM((h + 2, w + 2, c), jnp.float32)],
        ),
        compiler_params=pltpu.CompilerParams(dimension_semantics=("parallel",)),
    )(x_nhwc, w1_taps, g1, b1, w2_taps, g2, b2)


# --------------------------------- JAX glue ---------------------------------

@jax.jit
def residual_block_forward(x_nchw, params):
    """x_nchw: (N, C, H, W) f32 -> (N, C, H, W) f32, matching torch ResidualBlock.forward."""
    c = x_nchw.shape[1]
    x_nhwc = jnp.transpose(x_nchw, (0, 2, 3, 1))

    def taps(w):  # (C_out, C_in, 3, 3) -> (9, C_in, C_out), tap-major matmul operands
        return jnp.transpose(w, (2, 3, 1, 0)).reshape(9, c, c).astype(jnp.bfloat16)

    y = residual_block_pallas(
        x_nhwc,
        taps(params["w1"]), params["g1"].reshape(1, c), params["b1"].reshape(1, c),
        taps(params["w2"]), params["g2"].reshape(1, c), params["b2"].reshape(1, c))
    return jnp.transpose(y, (0, 3, 1, 2))


def init_residual_block_params(key, dim_in, dim_out):
    assert dim_in == dim_out, "residual add requires dim_in == dim_out"
    k1, k2, k3, k4, k5, k6 = jax.random.split(key, 6)
    fan_in = dim_in * 9
    bound = 1.0 / float(fan_in) ** 0.5
    w1 = jax.random.uniform(k1, (dim_out, dim_in, 3, 3), jnp.float32, -bound, bound)
    w2 = jax.random.uniform(k2, (dim_out, dim_out, 3, 3), jnp.float32, -bound, bound)
    # torch default affine init is weight=1, bias=0; perturb so the affine path is exercised.
    g1 = 1.0 + 0.1 * jax.random.normal(k3, (dim_out,), jnp.float32)
    b1 = 0.1 * jax.random.normal(k4, (dim_out,), jnp.float32)
    g2 = 1.0 + 0.1 * jax.random.normal(k5, (dim_out,), jnp.float32)
    b2 = 0.1 * jax.random.normal(k6, (dim_out,), jnp.float32)
    return {"w1": w1, "g1": g1, "b1": b1, "w2": w2, "g2": g2, "b2": b2}


# ---------------------------- pure-JAX reference ----------------------------

def _conv3x3_ref(x, w):
    return jax.lax.conv_general_dilated(
        x.astype(jnp.bfloat16), w.astype(jnp.bfloat16),
        window_strides=(1, 1), padding=((1, 1), (1, 1)),
        dimension_numbers=("NCHW", "OIHW", "NCHW"),
        preferred_element_type=jnp.float32)


def _instance_norm_ref(x, g, b):
    mean = jnp.mean(x, axis=(2, 3), keepdims=True)
    var = jnp.mean(jnp.square(x - mean), axis=(2, 3), keepdims=True)
    xn = (x - mean) * jax.lax.rsqrt(var + IN_EPS)
    return xn * g.reshape(1, -1, 1, 1) + b.reshape(1, -1, 1, 1)


@jax.jit
def residual_block_ref(x, params):
    h = _conv3x3_ref(x, params["w1"])
    h = _instance_norm_ref(h, params["g1"], params["b1"])
    h = jax.nn.relu(h)
    h = _conv3x3_ref(h, params["w2"])
    h = _instance_norm_ref(h, params["g2"], params["b2"])
    return x + h


# ----------------------------------- main -----------------------------------

if __name__ == "__main__":
    batch, dim, height, width = 2, 128, 16, 16   # dim multiple of 128 -> lane-dense stores

    root = jax.random.PRNGKey(0)
    k_x, k_p = jax.random.split(root)
    x = jax.random.normal(k_x, (batch, dim, height, width), jnp.float32)
    params = init_residual_block_params(k_p, dim, dim)

    out = jax.block_until_ready(residual_block_forward(x, params))
    ref = jax.block_until_ready(residual_block_ref(x, params))

    assert out.shape == (batch, dim, height, width)
    assert bool(jnp.all(jnp.isfinite(out)))
    max_err = float(jnp.max(jnp.abs(out - ref)))
    assert max_err < 2e-2, f"max abs error vs reference: {max_err}"
    print("KERNEL_OK")
</pallas_src>

<mosaic_0001>
module attributes {stable_mosaic.version = 11 : i64} {
  func.func @_residual_block_kernel(%arg0: i32, %arg1: memref<1x16x16x128xf32, #tpu.memory_space<vmem>>, %arg2: memref<9x128x128xbf16, #tpu.memory_space<vmem>>, %arg3: memref<1x128xf32, #tpu.memory_space<vmem>>, %arg4: memref<1x128xf32, #tpu.memory_space<vmem>>, %arg5: memref<9x128x128xbf16, #tpu.memory_space<vmem>>, %arg6: memref<1x128xf32, #tpu.memory_space<vmem>>, %arg7: memref<1x128xf32, #tpu.memory_space<vmem>>, %arg8: memref<1x16x16x128xf32, #tpu.memory_space<vmem>>, %arg9: memref<18x18x128xf32, #tpu.memory_space<vmem>>) attributes {dimension_semantics = [#tpu.dimension_semantics<parallel>], iteration_bounds = array<i64: 2>, scalar_prefetch = 0 : i64, scratch_operands = 1 : i64, tpu.core_type = #tpu.core_type<tc>, window_params = [{transform_indices = @transform_0, window_bounds = array<i64: 1, 16, 16, 128>}, {pipeline_mode = #tpu.pipeline_mode<synchronous>, transform_indices = @transform_1, window_bounds = array<i64: 9, 128, 128>}, {pipeline_mode = #tpu.pipeline_mode<synchronous>, transform_indices = @transform_2, window_bounds = array<i64: 1, 128>}, {pipeline_mode = #tpu.pipeline_mode<synchronous>, transform_indices = @transform_3, window_bounds = array<i64: 1, 128>}, {pipeline_mode = #tpu.pipeline_mode<synchronous>, transform_indices = @transform_4, window_bounds = array<i64: 9, 128, 128>}, {pipeline_mode = #tpu.pipeline_mode<synchronous>, transform_indices = @transform_5, window_bounds = array<i64: 1, 128>}, {pipeline_mode = #tpu.pipeline_mode<synchronous>, transform_indices = @transform_6, window_bounds = array<i64: 1, 128>}, {transform_indices = @transform_7, window_bounds = array<i64: 1, 16, 16, 128>}]} {
    %c0 = arith.constant 0 : index
    %c0_0 = arith.constant 0 : index
    %c0_1 = arith.constant 0 : index
    %c0_2 = arith.constant 0 : index
    %0 = vector.load %arg1[%c0, %c0_0, %c0_1, %c0_2] : memref<1x16x16x128xf32, #tpu.memory_space<vmem>>, vector<1x16x16x128xf32>
    %1 = vector.shape_cast %0 : vector<1x16x16x128xf32> to vector<16x16x128xf32>
    %2 = vector.shape_cast %1 : vector<16x16x128xf32> to vector<256x128xf32>
    %cst = arith.constant 0.000000e+00 : f32
    %3 = vector.broadcast %cst : f32 to vector<18x18x128xf32>
    %c0_3 = arith.constant 0 : index
    %c0_4 = arith.constant 0 : index
    %c0_5 = arith.constant 0 : index
    %4 = vector.load %arg9[%c0_3, %c0_4, %c0_5] : memref<18x18x128xf32, #tpu.memory_space<vmem>>, vector<18x18x128xf32>
    tpu.vector_store %arg9[%c0_3, %c0_4, %c0_5], %3 {strides = array<i32>} : memref<18x18x128xf32, #tpu.memory_space<vmem>>, vector<18x18x128xf32>,
    %c1 = arith.constant 1 : index
    %c1_6 = arith.constant 1 : index
    %c0_7 = arith.constant 0 : index
    %5 = vector.load %arg9[%c1, %c1_6, %c0_7] : memref<18x18x128xf32, #tpu.memory_space<vmem>>, vector<16x16x128xf32>
    tpu.vector_store %arg9[%c1, %c1_6, %c0_7], %1 {strides = array<i32>} : memref<18x18x128xf32, #tpu.memory_space<vmem>>, vector<16x16x128xf32>,
    %cst_8 = arith.constant 0.000000e+00 : f32
    %6 = vector.broadcast %cst_8 : f32 to vector<256x128xf32>
    %c0_9 = arith.constant 0 : index
    %c0_10 = arith.constant 0 : index
    %c0_11 = arith.constant 0 : index
    %7 = vector.load %arg9[%c0_9, %c0_10, %c0_11] : memref<18x18x128xf32, #tpu.memory_space<vmem>>, vector<16x16x128xf32>
    %8 = vector.shape_cast %7 : vector<16x16x128xf32> to vector<256x128xf32>
    %9 = arith.truncf %8 : vector<256x128xf32> to vector<256x128xbf16>
    %c0_12 = arith.constant 0 : index
    %c0_13 = arith.constant 0 : index
    %c0_14 = arith.constant 0 : index
    %10 = vector.load %arg2[%c0_12, %c0_13, %c0_14] : memref<9x128x128xbf16, #tpu.memory_space<vmem>>, vector<1x128x128xbf16>
    %11 = vector.shape_cast %10 : vector<1x128x128xbf16> to vector<128x128xbf16>
    %cst_15 = arith.constant dense<0.000000e+00> : vector<256x128xf32>
    %12 = tpu.matmul %9, %11, %cst_15 {dimension_numbers = #tpu.dot_dimension_numbers<[1], [0], [0], [1], [0, 0, 1, 1], [], []>} : vector<256x128xbf16>, vector<128x128xbf16>, vector<256x128xf32> -> vector<256x128xf32>
    %13 = arith.addf %6, %12 : vector<256x128xf32>
    %c0_16 = arith.constant 0 : index
    %c1_17 = arith.constant 1 : index
    %c0_18 = arith.constant 0 : index
    %14 = vector.load %arg9[%c0_16, %c1_17, %c0_18] : memref<18x18x128xf32, #tpu.memory_space<vmem>>, vector<16x16x128xf32>
    %15 = vector.shape_cast %14 : vector<16x16x128xf32> to vector<256x128xf32>
    %16 = arith.truncf %15 : vector<256x128xf32> to vector<256x128xbf16>
    %c1_19 = arith.constant 1 : index
    %c0_20 = arith.constant 0 : index
    %c0_21 = arith.constant 0 : index
    %17 = vector.load %arg2[%c1_19, %c0_20, %c0_21] : memref<9x128x128xbf16, #tpu.memory_space<vmem>>, vector<1x128x128xbf16>
    %18 = vector.shape_cast %17 : vector<1x128x128xbf16> to vector<128x128xbf16>
    %cst_22 = arith.constant dense<0.000000e+00> : vector<256x128xf32>
    %19 = tpu.matmul %16, %18, %cst_22 {dimension_numbers = #tpu.dot_dimension_numbers<[1], [0], [0], [1], [0, 0, 1, 1], [], []>} : vector<256x128xbf16>, vector<128x128xbf16>, vector<256x128xf32> -> vector<256x128xf32>
    %20 = arith.addf %13, %19 : vector<256x128xf32>
    %c0_23 = arith.constant 0 : index
    %c2 = arith.constant 2 : index
    %c0_24 = arith.constant 0 : index
    %21 = vector.load %arg9[%c0_23, %c2, %c0_24] : memref<18x18x128xf32, #tpu.memory_space<vmem>>, vector<16x16x128xf32>
    %22 = vector.shape_cast %21 : vector<16x16x128xf32> to vector<256x128xf32>
    %23 = arith.truncf %22 : vector<256x128xf32> to vector<256x128xbf16>
    %c2_25 = arith.constant 2 : index
    %c0_26 = arith.constant 0 : index
    %c0_27 = arith.constant 0 : index
    %24 = vector.load %arg2[%c2_25, %c0_26, %c0_27] : memref<9x128x128xbf16, #tpu.memory_space<vmem>>, vector<1x128x128xbf16>
    %25 = vector.shape_cast %24 : vector<1x128x128xbf16> to vector<128x128xbf16>
    %cst_28 = arith.constant dense<0.000000e+00> : vector<256x128xf32>
    %26 = tpu.matmul %23, %25, %cst_28 {dimension_numbers = #tpu.dot_dimension_numbers<[1], [0], [0], [1], [0, 0, 1, 1], [], []>} : vector<256x128xbf16>, vector<128x128xbf16>, vector<256x128xf32> -> vector<256x128xf32>
    %27 = arith.addf %20, %26 : vector<256x128xf32>
    %c1_29 = arith.constant 1 : index
    %c0_30 = arith.constant 0 : index
    %c0_31 = arith.constant 0 : index
    %28 = vector.load %arg9[%c1_29, %c0_30, %c0_31] : memref<18x18x128xf32, #tpu.memory_space<vmem>>, vector<16x16x128xf32>
    %29 = vector.shape_cast %28 : vector<16x16x128xf32> to vector<256x128xf32>
    %30 = arith.truncf %29 : vector<256x128xf32> to vector<256x128xbf16>
    %c3 = arith.constant 3 : index
    %c0_32 = arith.constant 0 : index
    %c0_33 = arith.constant 0 : index
    %31 = vector.load %arg2[%c3, %c0_32, %c0_33] : memref<9x128x128xbf16, #tpu.memory_space<vmem>>, vector<1x128x128xbf16>
    %32 = vector.shape_cast %31 : vector<1x128x128xbf16> to vector<128x128xbf16>
    %cst_34 = arith.constant dense<0.000000e+00> : vector<256x128xf32>
    %33 = tpu.matmul %30, %32, %cst_34 {dimension_numbers = #tpu.dot_dimension_numbers<[1], [0], [0], [1], [0, 0, 1, 1], [], []>} : vector<256x128xbf16>, vector<128x128xbf16>, vector<256x128xf32> -> vector<256x128xf32>
    %34 = arith.addf %27, %33 : vector<256x128xf32>
    %c1_35 = arith.constant 1 : index
    %c1_36 = arith.constant 1 : index
    %c0_37 = arith.constant 0 : index
    %35 = vector.load %arg9[%c1_35, %c1_36, %c0_37] : memref<18x18x128xf32, #tpu.memory_space<vmem>>, vector<16x16x128xf32>
    %36 = vector.shape_cast %35 : vector<16x16x128xf32> to vector<256x128xf32>
    %37 = arith.truncf %36 : vector<256x128xf32> to vector<256x128xbf16>
    %c4 = arith.constant 4 : index
    %c0_38 = arith.constant 0 : index
    %c0_39 = arith.constant 0 : index
    %38 = vector.load %arg2[%c4, %c0_38, %c0_39] : memref<9x128x128xbf16, #tpu.memory_space<vmem>>, vector<1x128x128xbf16>
    %39 = vector.shape_cast %38 : vector<1x128x128xbf16> to vector<128x128xbf16>
    %cst_40 = arith.constant dense<0.000000e+00> : vector<256x128xf32>
    %40 = tpu.matmul %37, %39, %cst_40 {dimension_numbers = #tpu.dot_dimension_numbers<[1], [0], [0], [1], [0, 0, 1, 1], [], []>} : vector<256x128xbf16>, vector<128x128xbf16>, vector<256x128xf32> -> vector<256x128xf32>
    %41 = arith.addf %34, %40 : vector<256x128xf32>
    %c1_41 = arith.constant 1 : index
    %c2_42 = arith.constant 2 : index
    %c0_43 = arith.constant 0 : index
    %42 = vector.load %arg9[%c1_41, %c2_42, %c0_43] : memref<18x18x128xf32, #tpu.memory_space<vmem>>, vector<16x16x128xf32>
    %43 = vector.shape_cast %42 : vector<16x16x128xf32> to vector<256x128xf32>
    %44 = arith.truncf %43 : vector<256x128xf32> to vector<256x128xbf16>
    %c5 = arith.constant 5 : index
    %c0_44 = arith.constant 0 : index
    %c0_45 = arith.constant 0 : index
    %45 = vector.load %arg2[%c5, %c0_44, %c0_45] : memref<9x128x128xbf16, #tpu.memory_space<vmem>>, vector<1x128x128xbf16>
    %46 = vector.shape_cast %45 : vector<1x128x128xbf16> to vector<128x128xbf16>
    %cst_46 = arith.constant dense<0.000000e+00> : vector<256x128xf32>
    %47 = tpu.matmul %44, %46, %cst_46 {dimension_numbers = #tpu.dot_dimension_numbers<[1], [0], [0], [1], [0, 0, 1, 1], [], []>} : vector<256x128xbf16>, vector<128x128xbf16>, vector<256x128xf32> -> vector<256x128xf32>
    %48 = arith.addf %41, %47 : vector<256x128xf32>
    %c2_47 = arith.constant 2 : index
    %c0_48 = arith.constant 0 : index
    %c0_49 = arith.constant 0 : index
    %49 = vector.load %arg9[%c2_47, %c0_48, %c0_49] : memref<18x18x128xf32, #tpu.memory_space<vmem>>, vector<16x16x128xf32>
    %50 = vector.shape_cast %49 : vector<16x16x128xf32> to vector<256x128xf32>
    %51 = arith.truncf %50 : vector<256x128xf32> to vector<256x128xbf16>
    %c6 = arith.constant 6 : index
    %c0_50 = arith.constant 0 : index
    %c0_51 = arith.constant 0 : index
    %52 = vector.load %arg2[%c6, %c0_50, %c0_51] : memref<9x128x128xbf16, #tpu.memory_space<vmem>>, vector<1x128x128xbf16>
    %53 = vector.shape_cast %52 : vector<1x128x128xbf16> to vector<128x128xbf16>
    %cst_52 = arith.constant dense<0.000000e+00> : vector<256x128xf32>
    %54 = tpu.matmul %51, %53, %cst_52 {dimension_numbers = #tpu.dot_dimension_numbers<[1], [0], [0], [1], [0, 0, 1, 1], [], []>} : vector<256x128xbf16>, vector<128x128xbf16>, vector<256x128xf32> -> vector<256x128xf32>
    %55 = arith.addf %48, %54 : vector<256x128xf32>
    %c2_53 = arith.constant 2 : index
    %c1_54 = arith.constant 1 : index
    %c0_55 = arith.constant 0 : index
    %56 = vector.load %arg9[%c2_53, %c1_54, %c0_55] : memref<18x18x128xf32, #tpu.memory_space<vmem>>, vector<16x16x128xf32>
    %57 = vector.shape_cast %56 : vector<16x16x128xf32> to vector<256x128xf32>
    %58 = arith.truncf %57 : vector<256x128xf32> to vector<256x128xbf16>
    %c7 = arith.constant 7 : index
    %c0_56 = arith.constant 0 : index
    %c0_57 = arith.constant 0 : index
    %59 = vector.load %arg2[%c7, %c0_56, %c0_57] : memref<9x128x128xbf16, #tpu.memory_space<vmem>>, vector<1x128x128xbf16>
    %60 = vector.shape_cast %59 : vector<1x128x128xbf16> to vector<128x128xbf16>
    %cst_58 = arith.constant dense<0.000000e+00> : vector<256x128xf32>
    %61 = tpu.matmul %58, %60, %cst_58 {dimension_numbers = #tpu.dot_dimension_numbers<[1], [0], [0], [1], [0, 0, 1, 1], [], []>} : vector<256x128xbf16>, vector<128x128xbf16>, vector<256x128xf32> -> vector<256x128xf32>
    %62 = arith.addf %55, %61 : vector<256x128xf32>
    %c2_59 = arith.constant 2 : index
    %c2_60 = arith.constant 2 : index
    %c0_61 = arith.constant 0 : index
    %63 = vector.load %arg9[%c2_59, %c2_60, %c0_61] : memref<18x18x128xf32, #tpu.memory_space<vmem>>, vector<16x16x128xf32>
    %64 = vector.shape_cast %63 : vector<16x16x128xf32> to vector<256x128xf32>
    %65 = arith.truncf %64 : vector<256x128xf32> to vector<256x128xbf16>
    %c8 = arith.constant 8 : index
    %c0_62 = arith.constant 0 : index
    %c0_63 = arith.constant 0 : index
    %66 = vector.load %arg2[%c8, %c0_62, %c0_63] : memref<9x128x128xbf16, #tpu.memory_space<vmem>>, vector<1x128x128xbf16>
    %67 = vector.shape_cast %66 : vector<1x128x128xbf16> to vector<128x128xbf16>
    %cst_64 = arith.constant dense<0.000000e+00> : vector<256x128xf32>
    %68 = tpu.matmul %65, %67, %cst_64 {dimension_numbers = #tpu.dot_dimension_numbers<[1], [0], [0], [1], [0, 0, 1, 1], [], []>} : vector<256x128xbf16>, vector<128x128xbf16>, vector<256x128xf32> -> vector<256x128xf32>
    %69 = arith.addf %62, %68 : vector<256x128xf32>
    %cst_65 = arith.constant dense<0.000000e+00> : vector<128xf32>
    %70 = vector.multi_reduction <add>, %69, %cst_65 [0] : vector<256x128xf32> to vector<128xf32>
    %71 = vector.shape_cast %70 : vector<128xf32> to vector<1x128xf32>
    %cst_66 = arith.constant 2.560000e+02 : f32
    %72 = vector.broadcast %cst_66 : f32 to vector<1x128xf32>
    %73 = arith.divf %71, %72 : vector<1x128xf32>
    %74 = vector.broadcast %73 : vector<1x128xf32> to vector<256x128xf32>
    %75 = arith.subf %69, %74 : vector<256x128xf32>
    %76 = arith.mulf %75, %75 : vector<256x128xf32>
    %cst_67 = arith.constant dense<0.000000e+00> : vector<128xf32>
    %77 = vector.multi_reduction <add>, %76, %cst_67 [0] : vector<256x128xf32> to vector<128xf32>
    %78 = vector.shape_cast %77 : vector<128xf32> to vector<1x128xf32>
    %cst_68 = arith.constant 2.560000e+02 : f32
    %79 = vector.broadcast %cst_68 : f32 to vector<1x128xf32>
    %80 = arith.divf %78, %79 : vector<1x128xf32>
    %81 = vector.broadcast %73 : vector<1x128xf32> to vector<256x128xf32>
    %82 = arith.subf %69, %81 : vector<256x128xf32>
    %cst_69 = arith.constant 9.99999974E-6 : f32
    %83 = vector.broadcast %cst_69 : f32 to vector<1x128xf32>
    %84 = arith.addf %80, %83 : vector<1x128xf32>
    %85 = math.rsqrt %84 : vector<1x128xf32>
    %86 = vector.broadcast %85 : vector<1x128xf32> to vector<256x128xf32>
    %87 = arith.mulf %82, %86 : vector<256x128xf32>
    %c0_70 = arith.constant 0 : index
    %c0_71 = arith.constant 0 : index
    %88 = vector.load %arg3[%c0_70, %c0_71] : memref<1x128xf32, #tpu.memory_space<vmem>>, vector<1x128xf32>
    %89 = vector.broadcast %88 : vector<1x128xf32> to vector<256x128xf32>
    %90 = arith.mulf %87, %89 : vector<256x128xf32>
    %c0_72 = arith.constant 0 : index
    %c0_73 = arith.constant 0 : index
    %91 = vector.load %arg4[%c0_72, %c0_73] : memref<1x128xf32, #tpu.memory_space<vmem>>, vector<1x128xf32>
    %92 = vector.broadcast %91 : vector<1x128xf32> to vector<256x128xf32>
    %93 = arith.addf %90, %92 : vector<256x128xf32>
    %cst_74 = arith.constant 0.000000e+00 : f32
    %94 = vector.broadcast %cst_74 : f32 to vector<256x128xf32>
    %95 = arith.maximumf %93, %94 : vector<256x128xf32>
    %96 = vector.shape_cast %95 : vector<256x128xf32> to vector<16x16x128xf32>
    %c1_75 = arith.constant 1 : index
    %c1_76 = arith.constant 1 : index
    %c0_77 = arith.constant 0 : index
    %97 = vector.load %arg9[%c1_75, %c1_76, %c0_77] : memref<18x18x128xf32, #tpu.memory_space<vmem>>, vector<16x16x128xf32>
    tpu.vector_store %arg9[%c1_75, %c1_76, %c0_77], %96 {strides = array<i32>} : memref<18x18x128xf32, #tpu.memory_space<vmem>>, vector<16x16x128xf32>,
    %cst_78 = arith.constant 0.000000e+00 : f32
    %98 = vector.broadcast %cst_78 : f32 to vector<256x128xf32>
    %c0_79 = arith.constant 0 : index
    %c0_80 = arith.constant 0 : index
    %c0_81 = arith.constant 0 : index
    %99 = vector.load %arg9[%c0_79, %c0_80, %c0_81] : memref<18x18x128xf32, #tpu.memory_space<vmem>>, vector<16x16x128xf32>
    %100 = vector.shape_cast %99 : vector<16x16x128xf32> to vector<256x128xf32>
    %101 = arith.truncf %100 : vector<256x128xf32> to vector<256x128xbf16>
    %c0_82 = arith.constant 0 : index
    %c0_83 = arith.constant 0 : index
    %c0_84 = arith.constant 0 : index
    %102 = vector.load %arg5[%c0_82, %c0_83, %c0_84] : memref<9x128x128xbf16, #tpu.memory_space<vmem>>, vector<1x128x128xbf16>
    %103 = vector.shape_cast %102 : vector<1x128x128xbf16> to vector<128x128xbf16>
    %cst_85 = arith.constant dense<0.000000e+00> : vector<256x128xf32>
    %104 = tpu.matmul %101, %103, %cst_85 {dimension_numbers = #tpu.dot_dimension_numbers<[1], [0], [0], [1], [0, 0, 1, 1], [], []>} : vector<256x128xbf16>, vector<128x128xbf16>, vector<256x128xf32> -> vector<256x128xf32>
    %105 = arith.addf %98, %104 : vector<256x128xf32>
    %c0_86 = arith.constant 0 : index
    %c1_87 = arith.constant 1 : index
    %c0_88 = arith.constant 0 : index
    %106 = vector.load %arg9[%c0_86, %c1_87, %c0_88] : memref<18x18x128xf32, #tpu.memory_space<vmem>>, vector<16x16x128xf32>
    %107 = vector.shape_cast %106 : vector<16x16x128xf32> to vector<256x128xf32>
    %108 = arith.truncf %107 : vector<256x128xf32> to vector<256x128xbf16>
    %c1_89 = arith.constant 1 : index
    %c0_90 = arith.constant 0 : index
    %c0_91 = arith.constant 0 : index
    %109 = vector.load %arg5[%c1_89, %c0_90, %c0_91] : memref<9x128x128xbf16, #tpu.memory_space<vmem>>, vector<1x128x128xbf16>
    %110 = vector.shape_cast %109 : vector<1x128x128xbf16> to vector<128x128xbf16>
    %cst_92 = arith.constant dense<0.000000e+00> : vector<256x128xf32>
    %111 = tpu.matmul %108, %110, %cst_92 {dimension_numbers = #tpu.dot_dimension_numbers<[1], [0], [0], [1], [0, 0, 1, 1], [], []>} : vector<256x128xbf16>, vector<128x128xbf16>, vector<256x128xf32> -> vector<256x128xf32>
    %112 = arith.addf %105, %111 : vector<256x128xf32>
    %c0_93 = arith.constant 0 : index
    %c2_94 = arith.constant 2 : index
    %c0_95 = arith.constant 0 : index
    %113 = vector.load %arg9[%c0_93, %c2_94, %c0_95] : memref<18x18x128xf32, #tpu.memory_space<vmem>>, vector<16x16x128xf32>
    %114 = vector.shape_cast %113 : vector<16x16x128xf32> to vector<256x128xf32>
    %115 = arith.truncf %114 : vector<256x128xf32> to vector<256x128xbf16>
    %c2_96 = arith.constant 2 : index
    %c0_97 = arith.constant 0 : index
    %c0_98 = arith.constant 0 : index
    %116 = vector.load %arg5[%c2_96, %c0_97, %c0_98] : memref<9x128x128xbf16, #tpu.memory_space<vmem>>, vector<1x128x128xbf16>
    %117 = vector.shape_cast %116 : vector<1x128x128xbf16> to vector<128x128xbf16>
    %cst_99 = arith.constant dense<0.000000e+00> : vector<256x128xf32>
    %118 = tpu.matmul %115, %117, %cst_99 {dimension_numbers = #tpu.dot_dimension_numbers<[1], [0], [0], [1], [0, 0, 1, 1], [], []>} : vector<256x128xbf16>, vector<128x128xbf16>, vector<256x128xf32> -> vector<256x128xf32>
    %119 = arith.addf %112, %118 : vector<256x128xf32>
    %c1_100 = arith.constant 1 : index
    %c0_101 = arith.constant 0 : index
    %c0_102 = arith.constant 0 : index
    %120 = vector.load %arg9[%c1_100, %c0_101, %c0_102] : memref<18x18x128xf32, #tpu.memory_space<vmem>>, vector<16x16x128xf32>
    %121 = vector.shape_cast %120 : vector<16x16x128xf32> to vector<256x128xf32>
    %122 = arith.truncf %121 : vector<256x128xf32> to vector<256x128xbf16>
    %c3_103 = arith.constant 3 : index
    %c0_104 = arith.constant 0 : index
    %c0_105 = arith.constant 0 : index
    %123 = vector.load %arg5[%c3_103, %c0_104, %c0_105] : memref<9x128x128xbf16, #tpu.memory_space<vmem>>, vector<1x128x128xbf16>
    %124 = vector.shape_cast %123 : vector<1x128x128xbf16> to vector<128x128xbf16>
    %cst_106 = arith.constant dense<0.000000e+00> : vector<256x128xf32>
    %125 = tpu.matmul %122, %124, %cst_106 {dimension_numbers = #tpu.dot_dimension_numbers<[1], [0], [0], [1], [0, 0, 1, 1], [], []>} : vector<256x128xbf16>, vector<128x128xbf16>, vector<256x128xf32> -> vector<256x128xf32>
    %126 = arith.addf %119, %125 : vector<256x128xf32>
    %c1_107 = arith.constant 1 : index
    %c1_108 = arith.constant 1 : index
    %c0_109 = arith.constant 0 : index
    %127 = vector.load %arg9[%c1_107, %c1_108, %c0_109] : memref<18x18x128xf32, #tpu.memory_space<vmem>>, vector<16x16x128xf32>
    %128 = vector.shape_cast %127 : vector<16x16x128xf32> to vector<256x128xf32>
    %129 = arith.truncf %128 : vector<256x128xf32> to vector<256x128xbf16>
    %c4_110 = arith.constant 4 : index
    %c0_111 = arith.constant 0 : index
    %c0_112 = arith.constant 0 : index
    %130 = vector.load %arg5[%c4_110, %c0_111, %c0_112] : memref<9x128x128xbf16, #tpu.memory_space<vmem>>, vector<1x128x128xbf16>
    %131 = vector.shape_cast %130 : vector<1x128x128xbf16> to vector<128x128xbf16>
    %cst_113 = arith.constant dense<0.000000e+00> : vector<256x128xf32>
    %132 = tpu.matmul %129, %131, %cst_113 {dimension_numbers = #tpu.dot_dimension_numbers<[1], [0], [0], [1], [0, 0, 1, 1], [], []>} : vector<256x128xbf16>, vector<128x128xbf16>, vector<256x128xf32> -> vector<256x128xf32>
    %133 = arith.addf %126, %132 : vector<256x128xf32>
    %c1_114 = arith.constant 1 : index
    %c2_115 = arith.constant 2 : index
    %c0_116 = arith.constant 0 : index
    %134 = vector.load %arg9[%c1_114, %c2_115, %c0_116] : memref<18x18x128xf32, #tpu.memory_space<vmem>>, vector<16x16x128xf32>
    %135 = vector.shape_cast %134 : vector<16x16x128xf32> to vector<256x128xf32>
    %136 = arith.truncf %135 : vector<256x128xf32> to vector<256x128xbf16>
    %c5_117 = arith.constant 5 : index
    %c0_118 = arith.constant 0 : index
    %c0_119 = arith.constant 0 : index
    %137 = vector.load %arg5[%c5_117, %c0_118, %c0_119] : memref<9x128x128xbf16, #tpu.memory_space<vmem>>, vector<1x128x128xbf16>
    %138 = vector.shape_cast %137 : vector<1x128x128xbf16> to vector<128x128xbf16>
    %cst_120 = arith.constant dense<0.000000e+00> : vector<256x128xf32>
    %139 = tpu.matmul %136, %138, %cst_120 {dimension_numbers = #tpu.dot_dimension_numbers<[1], [0], [0], [1], [0, 0, 1, 1], [], []>} : vector<256x128xbf16>, vector<128x128xbf16>, vector<256x128xf32> -> vector<256x128xf32>
    %140 = arith.addf %133, %139 : vector<256x128xf32>
    %c2_121 = arith.constant 2 : index
    %c0_122 = arith.constant 0 : index
    %c0_123 = arith.constant 0 : index
    %141 = vector.load %arg9[%c2_121, %c0_122, %c0_123] : memref<18x18x128xf32, #tpu.memory_space<vmem>>, vector<16x16x128xf32>
    %142 = vector.shape_cast %141 : vector<16x16x128xf32> to vector<256x128xf32>
    %143 = arith.truncf %142 : vector<256x128xf32> to vector<256x128xbf16>
    %c6_124 = arith.constant 6 : index
    %c0_125 = arith.constant 0 : index
    %c0_126 = arith.constant 0 : index
    %144 = vector.load %arg5[%c6_124, %c0_125, %c0_126] : memref<9x128x128xbf16, #tpu.memory_space<vmem>>, vector<1x128x128xbf16>
    %145 = vector.shape_cast %144 : vector<1x128x128xbf16> to vector<128x128xbf16>
    %cst_127 = arith.constant dense<0.000000e+00> : vector<256x128xf32>
    %146 = tpu.matmul %143, %145, %cst_127 {dimension_numbers = #tpu.dot_dimension_numbers<[1], [0], [0], [1], [0, 0, 1, 1], [], []>} : vector<256x128xbf16>, vector<128x128xbf16>, vector<256x128xf32> -> vector<256x128xf32>
    %147 = arith.addf %140, %146 : vector<256x128xf32>
    %c2_128 = arith.constant 2 : index
    %c1_129 = arith.constant 1 : index
    %c0_130 = arith.constant 0 : index
    %148 = vector.load %arg9[%c2_128, %c1_129, %c0_130] : memref<18x18x128xf32, #tpu.memory_space<vmem>>, vector<16x16x128xf32>
    %149 = vector.shape_cast %148 : vector<16x16x128xf32> to vector<256x128xf32>
    %150 = arith.truncf %149 : vector<256x128xf32> to vector<256x128xbf16>
    %c7_131 = arith.constant 7 : index
    %c0_132 = arith.constant 0 : index
    %c0_133 = arith.constant 0 : index
    %151 = vector.load %arg5[%c7_131, %c0_132, %c0_133] : memref<9x128x128xbf16, #tpu.memory_space<vmem>>, vector<1x128x128xbf16>
    %152 = vector.shape_cast %151 : vector<1x128x128xbf16> to vector<128x128xbf16>
    %cst_134 = arith.constant dense<0.000000e+00> : vector<256x128xf32>
    %153 = tpu.matmul %150, %152, %cst_134 {dimension_numbers = #tpu.dot_dimension_numbers<[1], [0], [0], [1], [0, 0, 1, 1], [], []>} : vector<256x128xbf16>, vector<128x128xbf16>, vector<256x128xf32> -> vector<256x128xf32>
    %154 = arith.addf %147, %153 : vector<256x128xf32>
    %c2_135 = arith.constant 2 : index
    %c2_136 = arith.constant 2 : index
    %c0_137 = arith.constant 0 : index
    %155 = vector.load %arg9[%c2_135, %c2_136, %c0_137] : memref<18x18x128xf32, #tpu.memory_space<vmem>>, vector<16x16x128xf32>
    %156 = vector.shape_cast %155 : vector<16x16x128xf32> to vector<256x128xf32>
    %157 = arith.truncf %156 : vector<256x128xf32> to vector<256x128xbf16>
    %c8_138 = arith.constant 8 : index
    %c0_139 = arith.constant 0 : index
    %c0_140 = arith.constant 0 : index
    %158 = vector.load %arg5[%c8_138, %c0_139, %c0_140] : memref<9x128x128xbf16, #tpu.memory_space<vmem>>, vector<1x128x128xbf16>
    %159 = vector.shape_cast %158 : vector<1x128x128xbf16> to vector<128x128xbf16>
    %cst_141 = arith.constant dense<0.000000e+00> : vector<256x128xf32>
    %160 = tpu.matmul %157, %159, %cst_141 {dimension_numbers = #tpu.dot_dimension_numbers<[1], [0], [0], [1], [0, 0, 1, 1], [], []>} : vector<256x128xbf16>, vector<128x128xbf16>, vector<256x128xf32> -> vector<256x128xf32>
    %161 = arith.addf %154, %160 : vector<256x128xf32>
    %cst_142 = arith.constant dense<0.000000e+00> : vector<128xf32>
    %162 = vector.multi_reduction <add>, %161, %cst_142 [0] : vector<256x128xf32> to vector<128xf32>
    %163 = vector.shape_cast %162 : vector<128xf32> to vector<1x128xf32>
    %cst_143 = arith.constant 2.560000e+02 : f32
    %164 = vector.broadcast %cst_143 : f32 to vector<1x128xf32>
    %165 = arith.divf %163, %164 : vector<1x128xf32>
    %166 = vector.broadcast %165 : vector<1x128xf32> to vector<256x128xf32>
    %167 = arith.subf %161, %166 : vector<256x128xf32>
    %168 = arith.mulf %167, %167 : vector<256x128xf32>
    %cst_144 = arith.constant dense<0.000000e+00> : vector<128xf32>
    %169 = vector.multi_reduction <add>, %168, %cst_144 [0] : vector<256x128xf32> to vector<128xf32>
    %170 = vector.shape_cast %169 : vector<128xf32> to vector<1x128xf32>
    %cst_145 = arith.constant 2.560000e+02 : f32
    %171 = vector.broadcast %cst_145 : f32 to vector<1x128xf32>
    %172 = arith.divf %170, %171 : vector<1x128xf32>
    %173 = vector.broadcast %165 : vector<1x128xf32> to vector<256x128xf32>
    %174 = arith.subf %161, %173 : vector<256x128xf32>
    %cst_146 = arith.constant 9.99999974E-6 : f32
    %175 = vector.broadcast %cst_146 : f32 to vector<1x128xf32>
    %176 = arith.addf %172, %175 : vector<1x128xf32>
    %177 = math.rsqrt %176 : vector<1x128xf32>
    %178 = vector.broadcast %177 : vector<1x128xf32> to vector<256x128xf32>
    %179 = arith.mulf %174, %178 : vector<256x128xf32>
    %c0_147 = arith.constant 0 : index
    %c0_148 = arith.constant 0 : index
    %180 = vector.load %arg6[%c0_147, %c0_148] : memref<1x128xf32, #tpu.memory_space<vmem>>, vector<1x128xf32>
    %181 = vector.broadcast %180 : vector<1x128xf32> to vector<256x128xf32>
    %182 = arith.mulf %179, %181 : vector<256x128xf32>
    %c0_149 = arith.constant 0 : index
    %c0_150 = arith.constant 0 : index
    %183 = vector.load %arg7[%c0_149, %c0_150] : memref<1x128xf32, #tpu.memory_space<vmem>>, vector<1x128xf32>
    %184 = vector.broadcast %183 : vector<1x128xf32> to vector<256x128xf32>
    %185 = arith.addf %182, %184 : vector<256x128xf32>
    %186 = arith.addf %2, %185 : vector<256x128xf32>
    %187 = vector.shape_cast %186 : vector<256x128xf32> to vector<16x16x128xf32>
    %c0_151 = arith.constant 0 : index
    %c0_152 = arith.constant 0 : index
    %c0_153 = arith.constant 0 : index
    %c0_154 = arith.constant 0 : index
    %188 = vector.load %arg8[%c0_151, %c0_152, %c0_153, %c0_154] : memref<1x16x16x128xf32, #tpu.memory_space<vmem>>, vector<1x16x16x128xf32>
    %189 = vector.shape_cast %188 : vector<1x16x16x128xf32> to vector<16x16x128xf32>
    %190 = vector.shape_cast %187 : vector<16x16x128xf32> to vector<1x16x16x128xf32>
    tpu.vector_store %arg8[%c0_151, %c0_152, %c0_153, %c0_154], %190 {strides = array<i32>} : memref<1x16x16x128xf32, #tpu.memory_space<vmem>>, vector<1x16x16x128xf32>,
    return
  }
  func.func @transform_0(%arg0: i32) -> (i32, i32, i32, i32) {
    %c0_i32 = arith.constant 0 : i32
    %c0_i32_0 = arith.constant 0 : i32
    %c0_i32_1 = arith.constant 0 : i32
    %c0_i32_2 = arith.constant 0 : i32
    return %arg0, %c0_i32, %c0_i32_0, %c0_i32_1 : i32, i32, i32, i32
  }
  func.func @transform_1(%arg0: i32) -> (i32, i32, i32) {
    %c0_i32 = arith.constant 0 : i32
    %c0_i32_0 = arith.constant 0 : i32
    %c0_i32_1 = arith.constant 0 : i32
    %c0_i32_2 = arith.constant 0 : i32
    return %c0_i32, %c0_i32_0, %c0_i32_1 : i32, i32, i32
  }
  func.func @transform_2(%arg0: i32) -> (i32, i32) {
    %c0_i32 = arith.constant 0 : i32
    %c0_i32_0 = arith.constant 0 : i32
    %c0_i32_1 = arith.constant 0 : i32
    return %c0_i32, %c0_i32_0 : i32, i32
  }
  func.func @transform_3(%arg0: i32) -> (i32, i32) {
    %c0_i32 = arith.constant 0 : i32
    %c0_i32_0 = arith.constant 0 : i32
    %c0_i32_1 = arith.constant 0 : i32
    return %c0_i32, %c0_i32_0 : i32, i32
  }
  func.func @transform_4(%arg0: i32) -> (i32, i32, i32) {
    %c0_i32 = arith.constant 0 : i32
    %c0_i32_0 = arith.constant 0 : i32
    %c0_i32_1 = arith.constant 0 : i32
    %c0_i32_2 = arith.constant 0 : i32
    return %c0_i32, %c0_i32_0, %c0_i32_1 : i32, i32, i32
  }
  func.func @transform_5(%arg0: i32) -> (i32, i32) {
    %c0_i32 = arith.constant 0 : i32
    %c0_i32_0 = arith.constant 0 : i32
    %c0_i32_1 = arith.constant 0 : i32
    return %c0_i32, %c0_i32_0 : i32, i32
  }
  func.func @transform_6(%arg0: i32) -> (i32, i32) {
    %c0_i32 = arith.constant 0 : i32
    %c0_i32_0 = arith.constant 0 : i32
    %c0_i32_1 = arith.constant 0 : i32
    return %c0_i32, %c0_i32_0 : i32, i32
  }
  func.func @transform_7(%arg0: i32) -> (i32, i32, i32, i32) {
    %c0_i32 = arith.constant 0 : i32
    %c0_i32_0 = arith.constant 0 : i32
    %c0_i32_1 = arith.constant 0 : i32
    %c0_i32_2 = arith.constant 0 : i32
    return %arg0, %c0_i32, %c0_i32_0, %c0_i32_1 : i32, i32, i32, i32
  }
}

</mosaic_0001>

<bundles_post_ra>
// kernel: residual_block_forward.1
= control target key start
LH: loop header
LB: loop body
LE: loop exit
PB: predicated region body
PF: predicated region fallthrough
CT: control target
= control target key end

     0   :  { %12 = vsyncpa [#allocation4], 0  ;;  %s8919_s0 = inlined_call_operand.vmem [shape: f32[2,16,16,128], index: 0, kind: input, shape index: {}]   ;;  %s8920_s1 = inlined_call_operand.vmem [shape: bf16[9,128,128], index: 1, kind: input, shape index: {}]   ;;  %s8921_s2 = inlined_call_operand.vmem [shape: f32[1,128], index: 2, kind: input, shape index: {}]   ;;  %s8922_s3 = inlined_call_operand.vmem [shape: f32[1,128], index: 3, kind: input, shape index: {}]   ;;  %s8923_s4 = inlined_call_operand.vmem [shape: bf16[9,128,128], index: 4, kind: input, shape index: {}]   ;;  %s8924_s5 = inlined_call_operand.vmem [shape: f32[1,128], index: 5, kind: input, shape index: {}]   ;;  %s8925_s6 = inlined_call_operand.vmem [shape: f32[1,128], index: 6, kind: input, shape index: {}]   ;;  %s8926_s7 = inlined_call_operand.hbm [shape: f32[2,16,16,128], index: 7, kind: output, shape index: {}]  }
   0x1   :  { %14 = vsyncpa [#allocation4 + $0x1], 0  ;;  %s6372_s24 = smov 0   ;;  %s6374_s25 = smov 0  }
   0x2   :  { %s6376_s26 = smov 0   ;;  %s6378_s27 = smov 0  }
   0x3 LB: > { %s6393_s28 = sadd.s32 4294967295, %s6325_s27   ;;  %s5202_s29 = sadd.s32 4294967294, %s6325_s27   ;;  %s6325_s27 = sphi %s6378_s27, %s9148_s27   ;;  %s6321_s26 = sphi %s6376_s26, %s9147_s26   ;;  %s6317_s25 = sphi %s6374_s25, %s9146_s25   ;;  %s6313_s24 = sphi %s6372_s24, %s9145_s24  }
   0x4   : > { %s6397_s30 = sadd.s32 1, %s6325_s27   ;;  %s179_s8 = sadd.s32 1, %s6321_s26 }
   0x5   : > { %s176_s9 = ssub.s32 %s6325_s27, %s6397_s30  ;;  %p189_p0 = scmp.ne.s32.totalorder %s6321_s26, %s6317_s25 }
   0x6   : > { %p177_p1 = scmp.eq.s32.totalorder %s176_s9, 0  ;;  %p190_p2 = scmp.eq.s32.totalorder %s6393_s28, 1 }
   0x7   : > { %p195_p3 = scmp.ne.s32.totalorder %s6317_s25, %s6313_s24  ;;  %p196_p4 = scmp.eq.s32.totalorder %s5202_s29, 1 }
   0x8   : > { %s6408_s10 = scalar_select %p177_p1, %s6321_s26, %s179_s8  }
   0x9   : > { %p6410_p5 = por %p190_p2, %p189_p0  ;;  %p6414_p6 = por %p196_p4, %p195_p3 }
   0xa   : > { %p5205_p7 = scmp.ge.s32.totalorder %s6325_s27, 1  ;;  %p240_p8 = scmp.lt.s32.totalorder %s6325_s27, 3 }
   0xc   : > { %p241_p9 = pnand %p5205_p7, %p240_p8 }
   0xe   : > { %244 = sbr.rel (%p241_p9) target bundleno = 2045 (0x7fd), region = 48 }
  0x13   : > { %v6062_v0 = vld [vmem:[%s8920_s1 + $0x78] sm:$0xff]  ;;  %p272_p10 = scmp.lt.s32.totalorder %s6393_s28, 1  ;;  %v6327_v2 = vmov 0.0   ;;  %v6061_v3 = vld [vmem:[%s8920_s1 + $0x70] sm:$0xff]  ;;  %v6060_v5 = vld [vmem:[%s8920_s1 + $0x68] sm:$0xff]  ;;  %v6328_v29 = vmov 0.0|0.0  }
  0x14   : > { %v6054_v1 = vld [vmem:[%s8920_s1 + $0x38] sm:$0xff]  ;;  %333 = vst [vmem:[#allocation2 + $0xc0] sm:$0xff] %v6327_v2  ;;  %6192 = vmatpush.bf16.msra.mxu2 %v6062_v0  ;;  %v6053_v4 = vld [vmem:[%s8920_s1 + $0x30] sm:$0xff]  ;;  %573 = vmatpush.bf16.msra.mxu0 %v6062_v0  ;;  %v6052_v6 = vld [vmem:[%s8920_s1 + $0x28] sm:$0xff]  ;;  %s269_s14 = sand.u32 1, %s6317_s25   ;;  %s6191_s18 = sshll.u32 %s6393_s28, 8 }
  0x15   : > { %6200 = vmatpush.bf16.msra.mxu3 %v6054_v1  ;;  %s273_s21 = scalar_select %p272_p10, %s6393_s28, 1  ;;  %334 = vst [vmem:[#allocation2 + $0xc8] sm:$0xff] %v6327_v2  ;;  %710 = vmatpush.bf16.msra.mxu1 %v6054_v1  ;;  %v6059_v9 = vld [vmem:[%s8920_s1 + $0x60] sm:$0xff]  ;;  %v6058_v11 = vld [vmem:[%s8920_s1 + $0x58] sm:$0xff]  ;;  %v6057_v13 = vld [vmem:[%s8920_s1 + $0x50] sm:$0xff] }
  0x16   : > { %335 = vst [vmem:[#allocation2 + $0xd0] sm:$0x3] %v6327_v2  ;;  %v6051_v10 = vld [vmem:[%s8920_s1 + $0x20] sm:$0xff]  ;;  %v6050_v12 = vld [vmem:[%s8920_s1 + $0x18] sm:$0xff]  ;;  %v6049_v14 = vld [vmem:[%s8920_s1 + $0x10] sm:$0xff]  ;;  %s5206_s17 = sshll.u32 %s269_s14, 8  ;;  %s5136_s20 = scalar_lea.hbm %s8926_s7, %s6191_s18 }
  0x17   : > { %s6046_s22 = sshll.u32 %s273_s21, 8  ;;  %309 = vst [vmem:[#allocation2] sm:$0xff] %v6327_v2  ;;  %v6056_v15 = vld [vmem:[%s8920_s1 + $0x48] sm:$0xff]  ;;  %v6055_v17 = vld [vmem:[%s8920_s1 + $0x40] sm:$0xff]  ;;  %v6070_v23 = vld [vmem:[%s8920_s1 + $0xb8] sm:$0xff]  ;;  %s5125_s23 = scalar_lea.sflag [#allocation4], %s269_s14 }
  0x18   : > { %s6444_s13 = scalar_lea.vmem %s8919_s0, %s6046_s22  ;;  %310 = vst [vmem:[#allocation2 + $0x8] sm:$0xff] %v6327_v2  ;;  %6193 = vmatpush.bf16.msra.mxu2 %v6061_v3  ;;  %574 = vmatpush.bf16.msra.mxu0 %v6061_v3  ;;  %v6048_v16 = vld [vmem:[%s8920_s1 + $0x8] sm:$0xff]  ;;  %v6047_v18 = vld [vmem:[%s8920_s1] sm:$0xff]  ;;  %v6078_v24 = vld [vmem:[%s8920_s1 + $0xf8] sm:$0xff]  ;;  %s5139_s22 = sshll.u32 %s5136_s20, 4  ;;  %s5140_s22 = int_to_ptr.hbm [resolvable:$true] %s5139_s22 }
  0x19   : > { %6201 = vmatpush.bf16.msra.mxu3 %v6053_v4  ;;  %v6451_v7 = vld [vmem:[%s6444_s13 + $0x70] sm:$0xff]  ;;  %v6454_v8 = vld [vmem:[%s6444_s13 + $0x78] sm:$0xff]  ;;  %311 = vst [vmem:[#allocation2 + $0x10] sm:$0x3] %v6327_v2  ;;  %711 = vmatpush.bf16.msra.mxu1 %v6053_v4  ;;  %v6546_v33 = vld [vmem:[%s6444_s13 + $0x80] sm:$0xff]  ;;  %s6277_s29 = sshra.s32 %s5140_s22, 4  ;;  %s6278_s29 = int_to_ptr.hbm [resolvable:$true] %s6277_s29 }
  0x1a   : > { %8983 = vst [vmem:[#allocation6_spill] sm:$0xff] %v6451_v7  ;;  %v500_v25 = vpack.c.bf16 %v6454_v8, %v6451_v7  ;;  %v6086_v28 = vld [vmem:[%s8920_s1 + $0x138] sm:$0xff]  ;;  %v6069_v30 = vld [vmem:[%s8920_s1 + $0xb0] sm:$0xff]  ;;  %v6549_v34 = vld [vmem:[%s6444_s13 + $0x88] sm:$0xff]  ;;  %s6279_s8 = scalar_lea.hbm %s6278_s29, 256  ;;  %s6283_s16 = scalar_lea.hbm %s8926_s7, 512 }
  0x1b   : > { %8984 = vst [vmem:[#allocation7_spill] sm:$0xff] %v6454_v8  ;;  %v6077_v31 = vld [vmem:[%s8920_s1 + $0xf0] sm:$0xff]  ;;  %v501_v35 = vpack.c.bf16 %v6549_v34, %v6546_v33  ;;  %v6555_v36 = vld [vmem:[%s6444_s13] sm:$0xff]  ;;  %v6558_v37 = vld [vmem:[%s6444_s13 + $0x8] sm:$0xff]  ;;  %p6280_p11 = scmp.ne.s32.totalorder %s6278_s29, %s6279_s8  ;;  %p6284_p0 = scmp.lt.s32.totalorder %s6278_s29, %s8926_s7 }
  0x1c   : > { %378 = vst [vmem:[#allocation2 + $0xc1] sm:$0xff] %v6451_v7  ;;  %6194 = vmatpush.bf16.msra.mxu2 %v6060_v5  ;;  %575 = vmatpush.bf16.msra.mxu0 %v6060_v5  ;;  %v6085_v32 = vld [vmem:[%s8920_s1 + $0x130] sm:$0xff]  ;;  %v6563_v38 = vpack.c.bf16 %v6558_v37, %v6555_v36  ;;  %v6068_v39 = vld [vmem:[%s8920_s1 + $0xa8] sm:$0xff]  ;;  %v6592_v43 = vld [vmem:[%s6444_s13 + $0x98] sm:$0xff]  ;;  %p6285_p1 = scmp.lt.s32.totalorder %s6283_s16, %s6279_s8 }
  0x1d   : > { %379 = vst [vmem:[#allocation2 + $0xc9] sm:$0xff] %v6454_v8  ;;  %6202 = vmatpush.bf16.msra.mxu3 %v6052_v6  ;;  %712 = vmatpush.bf16.msra.mxu1 %v6052_v6  ;;  %v6076_v40 = vld [vmem:[%s8920_s1 + $0xe8] sm:$0xff]  ;;  %v6588_v42 = vld [vmem:[%s6444_s13 + $0x90] sm:$0xff]  ;;  %v6602_v46 = vld [vmem:[%s6444_s13 + $0x18] sm:$0xff]  ;;  %p6281_p12 = pnand %p6280_p11, %p6410_p5 }
  0x1e   : > { %312 = vst [vmem:[#allocation2 + $0x18] sm:$0xff] %v6327_v2  ;;  %v6084_v41 = vld [vmem:[%s8920_s1 + $0x128] sm:$0xff]  ;;  %v6596_v44 = vld [vmem:[%s6444_s13 + $0x10] sm:$0xff]  ;;  %v502_v45 = vpack.c.bf16 %v6592_v43, %v6588_v42  ;;  %v6610_v48 = vld [vmem:[%s6444_s13 + $0xa0] sm:$0xff]  ;;  %p6286_p2 = por %p6285_p1, %p6284_p0 }
  0x1f   : > { %313 = vst [vmem:[#allocation2 + $0x20] sm:$0xff] %v6327_v2  ;;  %v460_v21 = vld [vmem:[#allocation2 + $0x1] sm:$0xff]  ;;  %v6607_v47 = vpack.c.bf16 %v6602_v46, %v6596_v44  ;;  %v6641_v61 = vld [vmem:[%s6444_s13 + $0xb0] sm:$0xff]  ;;  %v6644_v62 = vld [vmem:[%s6444_s13 + $0xb8] sm:$0xff]  ;;  %p6282_p13 = pneg %p6281_p12 }
  0x20   : > { %314 = vst [vmem:[#allocation2 + $0x28] sm:$0x3] %v6327_v2  ;;  %6195 = vmatpush.bf16.msra.mxu2 %v6059_v9  ;;  %576 = vmatpush.bf16.msra.mxu0 %v6059_v9  ;;  %v461_v22 = vld [vmem:[#allocation2 + $0x9] sm:$0xff]  ;;  %v6618_v51 = vld [vmem:[%s6444_s13 + $0x20] sm:$0xff]  ;;  %v6652_v0 = vld [vmem:[%s6444_s13 + $0x38] sm:$0xff] }
  0x21   : > { %315 = vst [vmem:[#allocation2 + $0x30] sm:$0xff] %v6327_v2  ;;  %6203 = vmatpush.bf16.msra.mxu3 %v6051_v10  ;;  %713 = vmatpush.bf16.msra.mxu1 %v6051_v10  ;;  %v492_v27 = vpack.c.bf16 %v461_v22, %v460_v21  ;;  %v6614_v49 = vld [vmem:[%s6444_s13 + $0xa8] sm:$0xff]  ;;  %v6067_v58 = vld [vmem:[%s8920_s1 + $0xa0] sm:$0xff]  ;;  %v6649_v63 = vld [vmem:[%s6444_s13 + $0x30] sm:$0xff]  ;;  %p6287_p3 = pnand %p6286_p2, %p6282_p13 }
  0x22   : > { %316 = vst [vmem:[#allocation2 + $0x38] sm:$0xff] %v6327_v2  ;;  %v6622_v53 = vld [vmem:[%s6444_s13 + $0x28] sm:$0xff]  ;;  %v6075_v59 = vld [vmem:[%s8920_s1 + $0xe0] sm:$0xff]  ;;  %v503_v3 = vpack.c.bf16 %v6614_v49, %v6610_v48  ;;  %v6695_v21 = vpack.c.bf16 %v6652_v0, %v6649_v63  ;;  %v6114_v8 = vld [vmem:[%s8920_s1 + $0x218] sm:$0xff] }
  0x23   : > { %317 = vst [vmem:[#allocation2 + $0x40] sm:$0x3] %v6327_v2  ;;  %v412_v19 = vld [vmem:[#allocation2 + $0xc0] sm:$0xff]  ;;  %v6660_v4 = vpack.c.bf16 %v6622_v53, %v6618_v51 }
  0x24   : > { %318 = vst [vmem:[#allocation2 + $0x48] sm:$0xff] %v6327_v2  ;;  %6196 = vmatpush.bf16.msra.mxu2 %v6058_v11  ;;  %577 = vmatpush.bf16.msra.mxu0 %v6058_v11  ;;  %v413_v20 = vld [vmem:[#allocation2 + $0xc8] sm:$0xff]  ;;  %v6083_v60 = vld [vmem:[%s8920_s1 + $0x120] sm:$0xff]  ;;  %v6066_v11 = vld [vmem:[%s8920_s1 + $0x98] sm:$0xff] }
  0x25   : > { %319 = vst [vmem:[#allocation2 + $0x50] sm:$0xff] %v6327_v2  ;;  %6204 = vmatpush.bf16.msra.mxu3 %v6050_v12  ;;  %714 = vmatpush.bf16.msra.mxu1 %v6050_v12  ;;  %v436_v26 = vpack.c.bf16 %v413_v20, %v412_v19  ;;  %v6074_v12 = vld [vmem:[%s8920_s1 + $0xd8] sm:$0xff]  ;;  %v504_v20 = vpack.c.bf16 %v6644_v62, %v6641_v61  ;;  %v1047_v7 = vld [vmem:[#allocation2 + $0xc0] sm:$0xff] }
  0x26   : > { %320 = vst [vmem:[#allocation2 + $0x58] sm:$0x3] %v6327_v2 }
  0x27   : > { %321 = vst [vmem:[#allocation2 + $0x60] sm:$0xff] %v6327_v2 }
  0x28   : > { %322 = vst [vmem:[#allocation2 + $0x68] sm:$0xff] %v6327_v2  ;;  %6197 = vmatpush.bf16.msra.mxu2 %v6057_v13  ;;  %578 = vmatpush.bf16.msra.mxu0 %v6057_v13  ;;  %v6082_v13 = vld [vmem:[%s8920_s1 + $0x118] sm:$0xff] }
  0x29   : > { %323 = vst [vmem:[#allocation2 + $0x70] sm:$0x3] %v6327_v2  ;;  %6205 = vmatpush.bf16.msra.mxu3 %v6049_v14  ;;  %715 = vmatpush.bf16.msra.mxu1 %v6049_v14  ;;  %v6676_v14 = vld [vmem:[%s6444_s13 + $0xc0] sm:$0xff] }
  0x2a   : > { %324 = vst [vmem:[#allocation2 + $0x78] sm:$0xff] %v6327_v2 }
  0x2b   : > { %325 = vst [vmem:[#allocation2 + $0x80] sm:$0xff] %v6327_v2 }
  0x2c   : > { %326 = vst [vmem:[#allocation2 + $0x88] sm:$0x3] %v6327_v2  ;;  %6198 = vmatpush.bf16.msra.mxu2 %v6056_v15  ;;  %579 = vmatpush.bf16.msra.mxu0 %v6056_v15  ;;  %v6679_v15 = vld [vmem:[%s6444_s13 + $0xc8] sm:$0xff] }
  0x2d   : > { %327 = vst [vmem:[#allocation2 + $0x90] sm:$0xff] %v6327_v2  ;;  %6206 = vmatpush.bf16.msra.mxu3 %v6048_v16  ;;  %716 = vmatpush.bf16.msra.mxu1 %v6048_v16  ;;  %v6684_v16 = vld [vmem:[%s6444_s13 + $0x40] sm:$0xff] }
  0x2e   : > { %328 = vst [vmem:[#allocation2 + $0x98] sm:$0xff] %v6327_v2 }
  0x2f   : > { %329 = vst [vmem:[#allocation2 + $0xa0] sm:$0x3] %v6327_v2 }
  0x30   : > { %330 = vst [vmem:[#allocation2 + $0xa8] sm:$0xff] %v6327_v2  ;;  %6199 = vmatpush.bf16.msra.mxu2 %v6055_v17  ;;  %580 = vmatpush.bf16.msra.mxu0 %v6055_v17  ;;  %v6687_v17 = vld [vmem:[%s6444_s13 + $0x48] sm:$0xff] }
  0x31   : > { %331 = vst [vmem:[#allocation2 + $0xb0] sm:$0xff] %v6327_v2  ;;  %6207 = vmatpush.bf16.msra.mxu3 %v6047_v18  ;;  %717 = vmatpush.bf16.msra.mxu1 %v6047_v18 }
  0x32   : > { %332 = vst [vmem:[#allocation2 + $0xb8] sm:$0x3] %v6327_v2 }
  0x33   : > { %336 = vst [vmem:[#allocation2 + $0xd8] sm:$0xff] %v6327_v2  ;;  %621 = vmatmul.bf16.vlgmr.msra.gmra.mxu2 %v500_v25  ;;  %581 = vmatmul.bf16.vlgmr.msra.gmra.mxu0 %v492_v27  ;;  %v6073_v27 = vld [vmem:[%s8920_s1 + $0xd0] sm:$0xff] }
  0x34   : > { %337 = vst [vmem:[#allocation2 + $0xe0] sm:$0xff] %v6327_v2  ;;  %912 = vmatpush.bf16.msrb.mxu2 %v6070_v23  ;;  %758 = vmatmul.bf16.vlgmr.msra.gmra.mxu3 %v436_v26  ;;  %v6065_v26 = vld [vmem:[%s8920_s1 + $0x90] sm:$0xff] }
  0x35   : > { %338 = vst [vmem:[#allocation2 + $0xe8] sm:$0x3] %v6327_v2  ;;  %1146 = vmatpush.bf16.msrb.mxu3 %v6078_v24  ;;  %718 = vmatmul.bf16.vlgmr.msra.gmra.mxu1 %v6328_v29  ;;  %v6711_v29 = vld [vmem:[%s6444_s13 + $0xd0] sm:$0xff] }
  0x36   : > { %339 = vst [vmem:[#allocation2 + $0xf0] sm:$0xff] %v6327_v2  ;;  %1380 = vmatpush.bf16.msrb.mxu0 %v6086_v28  ;;  %v6081_v28 = vld [vmem:[%s8920_s1 + $0x110] sm:$0xff] }
  0x37   : > { %340 = vst [vmem:[#allocation2 + $0xf8] sm:$0xff] %v6327_v2 }
  0x38   : > { %341 = vst [vmem:[#allocation2 + $0x100] sm:$0x3] %v6327_v2  ;;  %913 = vmatpush.bf16.msrb.mxu2 %v6069_v30  ;;  %v6714_v30 = vld [vmem:[%s6444_s13 + $0xd8] sm:$0xff] }
  0x39   : > { %342 = vst [vmem:[#allocation2 + $0x108] sm:$0xff] %v6327_v2  ;;  %1147 = vmatpush.bf16.msrb.mxu3 %v6077_v31  ;;  %v6719_v31 = vld [vmem:[%s6444_s13 + $0x50] sm:$0xff] }
  0x3a   : > { %343 = vst [vmem:[#allocation2 + $0x110] sm:$0xff] %v6327_v2  ;;  %1381 = vmatpush.bf16.msrb.mxu0 %v6085_v32  ;;  %v6722_v32 = vld [vmem:[%s6444_s13 + $0x58] sm:$0xff] }
  0x3b   : > { %344 = vst [vmem:[#allocation2 + $0x118] sm:$0x3] %v6327_v2 }
  0x3c   : > { %345 = vst [vmem:[#allocation2 + $0x120] sm:$0xff] %v6327_v2  ;;  %914 = vmatpush.bf16.msrb.mxu2 %v6068_v39 }
  0x3d   : > { %346 = vst [vmem:[#allocation2 + $0x128] sm:$0xff] %v6327_v2  ;;  %1148 = vmatpush.bf16.msrb.mxu3 %v6076_v40  ;;  %v505_v40 = vpack.c.bf16 %v6679_v15, %v6676_v14 }
  0x3e   : > { %347 = vst [vmem:[#allocation2 + $0x130] sm:$0x3] %v6327_v2  ;;  %1382 = vmatpush.bf16.msrb.mxu0 %v6084_v41  ;;  %v6730_v41 = vpack.c.bf16 %v6687_v17, %v6684_v16 }
  0x3f   : > { %348 = vst [vmem:[#allocation2 + $0x138] sm:$0xff] %v6327_v2 }
  0x40   : > { %349 = vst [vmem:[#allocation2 + $0x140] sm:$0xff] %v6327_v2  ;;  %915 = vmatpush.bf16.msrb.mxu2 %v6067_v58  ;;  %v6080_v58 = vld [vmem:[%s8920_s1 + $0x108] sm:$0xff] }
  0x41   : > { %350 = vst [vmem:[#allocation2 + $0x148] sm:$0x3] %v6327_v2  ;;  %1149 = vmatpush.bf16.msrb.mxu3 %v6075_v59  ;;  %v6094_v59 = vld [vmem:[%s8920_s1 + $0x178] sm:$0xff] }
  0x42   : > { %8985 = vst [vmem:[#allocation8_spill] sm:$0xff] %v6546_v33  ;;  %1383 = vmatpush.bf16.msrb.mxu0 %v6083_v60  ;;  %v6749_v60 = vld [vmem:[%s6444_s13 + $0xe0] sm:$0xff]  ;;  %1614 = vmatpush.bf16.msrb.mxu1 %v6094_v59  ;;  %v6102_v59 = vld [vmem:[%s8920_s1 + $0x1b8] sm:$0xff] }
  0x43   : > { %8986 = vst [vmem:[#allocation9_spill] sm:$0xff] %v6549_v34  ;;  %626 = vmatmul.bf16.gmra.mxu2 %v501_v35  ;;  %586 = vmatmul.bf16.gmra.mxu0 %v6563_v38 }
  0x44   : > { %351 = vst [vmem:[#allocation2 + $0x150] sm:$0xff] %v6327_v2  ;;  %916 = vmatpush.bf16.msrb.mxu2 %v6066_v11  ;;  %v6768_v11 = vpack.c.bf16 %v6722_v32, %v6719_v31 }
  0x45   : > { %8987 = vst [vmem:[#allocation10_spill] sm:$0xff] %v6555_v36  ;;  %1150 = vmatpush.bf16.msrb.mxu3 %v6074_v12 }
  0x46   : > { %8988 = vst [vmem:[#allocation11_spill] sm:$0xff] %v6558_v37  ;;  %1384 = vmatpush.bf16.msrb.mxu0 %v6082_v13 }
  0x47   : > { %352 = vst [vmem:[#allocation2 + $0x158] sm:$0xff] %v6327_v2 }
  0x48   : > { %353 = vst [vmem:[#allocation2 + $0x160] sm:$0x3] %v6327_v2  ;;  %917 = vmatpush.bf16.msrb.mxu2 %v6065_v26  ;;  %v6079_v26 = vld [vmem:[%s8920_s1 + $0x100] sm:$0xff] }
  0x49   : > { %354 = vst [vmem:[#allocation2 + $0x168] sm:$0xff] %v6327_v2  ;;  %1151 = vmatpush.bf16.msrb.mxu3 %v6073_v27  ;;  %v6091_v27 = vld [vmem:[%s8920_s1 + $0x160] sm:$0xff] }
  0x4a   : > { %355 = vst [vmem:[#allocation2 + $0x170] sm:$0xff] %v6327_v2  ;;  %1385 = vmatpush.bf16.msrb.mxu0 %v6081_v28 }
  0x4b   : > { %356 = vst [vmem:[#allocation2 + $0x178] sm:$0x3] %v6327_v2 }
  0x4c   : > { %357 = vst [vmem:[#allocation2 + $0x180] sm:$0xff] %v6327_v2 }
  0x4d   : > { %358 = vst [vmem:[#allocation2 + $0x188] sm:$0xff] %v6327_v2 }
  0x4e   : > { %359 = vst [vmem:[#allocation2 + $0x190] sm:$0x3] %v6327_v2  ;;  %1386 = vmatpush.bf16.msrb.mxu0 %v6080_v58  ;;  %v6089_v58 = vld [vmem:[%s8920_s1 + $0x150] sm:$0xff] }
  0x4f   : > { %360 = vst [vmem:[#allocation2 + $0x198] sm:$0xff] %v6327_v2 }
  0x50   : > { %361 = vst [vmem:[#allocation2 + $0x1a0] sm:$0xff] %v6327_v2 }
  0x51   : > { %362 = vst [vmem:[#allocation2 + $0x1a8] sm:$0x3] %v6327_v2 }
  0x52   : > { %380 = vst [vmem:[#allocation2 + $0xd9] sm:$0xff] %v6546_v33  ;;  %1387 = vmatpush.bf16.msrb.mxu0 %v6079_v26  ;;  %v1516_v33 = vld [vmem:[#allocation2 + $0xca] sm:$0xff] }
  0x53   : > { %381 = vst [vmem:[#allocation2 + $0xe1] sm:$0xff] %v6549_v34  ;;  %631 = vmatmul.bf16.gmra.mxu2 %v502_v45  ;;  %591 = vmatmul.bf16.gmra.mxu0 %v6607_v47  ;;  %v1515_v34 = vld [vmem:[#allocation2 + $0xc2] sm:$0xff] }
  0x54   : > { %8989 = vst [vmem:[#allocation12_spill] sm:$0xff] %v6588_v42 }
  0x55   : > { %364 = vst [vmem:[#allocation2 + $0x19] sm:$0xff] %v6555_v36 }
  0x56   : > { %8990 = vst [vmem:[#allocation13_spill] sm:$0xff] %v6592_v43 }
  0x57   : > { %365 = vst [vmem:[#allocation2 + $0x21] sm:$0xff] %v6558_v37 }
  0x58   : > { %8991 = vst [vmem:[#allocation14_spill] sm:$0xff] %v6596_v44 }
  0x59   : > { %382 = vst [vmem:[#allocation2 + $0xf1] sm:$0xff] %v6588_v42  ;;  %v414_v50 = vld [vmem:[#allocation2 + $0xd8] sm:$0xff] }
  0x5a   : > { %8992 = vst [vmem:[#allocation15_spill] sm:$0xff] %v6602_v46  ;;  %v415_v52 = vld [vmem:[#allocation2 + $0xe0] sm:$0xff] }
  0x5b   : > { %383 = vst [vmem:[#allocation2 + $0xf9] sm:$0xff] %v6592_v43  ;;  %v437_v54 = vpack.c.bf16 %v415_v52, %v414_v50 }
  0x5c   : > { %8993 = vst [vmem:[#allocation16_spill] sm:$0xff] %v6610_v48  ;;  %v398_v55 = vld [vmem:[#allocation2 + $0x18] sm:$0xff] }
  0x5d   : > { %366 = vst [vmem:[#allocation2 + $0x31] sm:$0xff] %v6596_v44  ;;  %763 = vmatmul.bf16.gmra.mxu3 %v437_v54 }
  0x5e   : > { %8994 = vst [vmem:[#allocation17_spill] sm:$0xff] %v6614_v49  ;;  %v399_v56 = vld [vmem:[#allocation2 + $0x20] sm:$0xff] }
  0x5f   : > { %367 = vst [vmem:[#allocation2 + $0x39] sm:$0xff] %v6602_v46  ;;  %v6627_v57 = vpack.c.bf16 %v399_v56, %v398_v55  ;;  %v6064_v55 = vld [vmem:[%s8920_s1 + $0x88] sm:$0xff] }
  0x60   : > { %8995 = vst [vmem:[#allocation18_spill] sm:$0xff] %v6618_v51  ;;  %v416_v1 = vld [vmem:[#allocation2 + $0xf0] sm:$0xff]  ;;  %918 = vmatpush.bf16.msrb.mxu2 %v6064_v55  ;;  %v6072_v56 = vld [vmem:[%s8920_s1 + $0xc8] sm:$0xff] }
  0x61   : > { %384 = vst [vmem:[#allocation2 + $0x109] sm:$0xff] %v6610_v48  ;;  %723 = vmatmul.bf16.gmra.mxu1 %v6627_v57  ;;  %1152 = vmatpush.bf16.msrb.mxu3 %v6072_v56 }
  0x62   : > { %8996 = vst [vmem:[#allocation19_spill] sm:$0xff] %v6622_v53  ;;  %v417_v2 = vld [vmem:[#allocation2 + $0xf8] sm:$0xff] }
  0x63   : > { %385 = vst [vmem:[#allocation2 + $0x111] sm:$0xff] %v6614_v49  ;;  %v438_v9 = vpack.c.bf16 %v417_v2, %v416_v1  ;;  %636 = vmatmul.bf16.gmra.mxu2 %v503_v3  ;;  %596 = vmatmul.bf16.gmra.mxu0 %v6660_v4  ;;  %v6752_v1 = vld [vmem:[%s6444_s13 + $0xe8] sm:$0xff]  ;;  %v6757_v2 = vld [vmem:[%s6444_s13 + $0x60] sm:$0xff]  ;;  %v1519_v46 = vld [vmem:[#allocation2 + $0xf2] sm:$0xff] }
  0x64   : > { %368 = vst [vmem:[#allocation2 + $0x49] sm:$0xff] %v6618_v51  ;;  %v400_v5 = vld [vmem:[#allocation2 + $0x30] sm:$0xff]  ;;  %v6760_v3 = vld [vmem:[%s6444_s13 + $0x68] sm:$0xff]  ;;  %v1520_v44 = vld [vmem:[#allocation2 + $0xfa] sm:$0xff] }
  0x65   : > { %369 = vst [vmem:[#allocation2 + $0x51] sm:$0xff] %v6622_v53  ;;  %v1052_v37 = vld [vmem:[#allocation2 + $0xf8] sm:$0xff] }
  0x66   : > { %8997 = vst [vmem:[#allocation20_spill] sm:$0xff] %v6641_v61  ;;  %v401_v6 = vld [vmem:[#allocation2 + $0x38] sm:$0xff] }
  0x67   : > { %8998 = vst [vmem:[#allocation21_spill] sm:$0xff] %v6644_v62  ;;  %v6662_v10 = vpack.c.bf16 %v401_v6, %v400_v5 }
  0x68   : > { %386 = vst [vmem:[#allocation2 + $0x121] sm:$0xff] %v6641_v61  ;;  %v418_v18 = vld [vmem:[#allocation2 + $0x108] sm:$0xff] }
  0x69   : > { %387 = vst [vmem:[#allocation2 + $0x129] sm:$0xff] %v6644_v62 }
  0x6a   : > { %8999 = vst [vmem:[#allocation22_spill] sm:$0xff] %v6649_v63  ;;  %v419_v19 = vld [vmem:[#allocation2 + $0x110] sm:$0xff] }
  0x6b   : > { %9000 = vst [vmem:[#allocation23_spill] sm:$0xff] %v6652_v0  ;;  %v402_v22 = vld [vmem:[#allocation2 + $0x48] sm:$0xff]  ;;  %v439_v24 = vpack.c.bf16 %v419_v19, %v418_v18 }
  0x6c   : > { %370 = vst [vmem:[#allocation2 + $0x61] sm:$0xff] %v6649_v63  ;;  %v403_v23 = vld [vmem:[#allocation2 + $0x50] sm:$0xff] }
  0x6d   : > { %371 = vst [vmem:[#allocation2 + $0x69] sm:$0xff] %v6652_v0  ;;  %768 = vmatmul.bf16.gmra.mxu3 %v438_v9  ;;  %v6697_v25 = vpack.c.bf16 %v403_v23, %v402_v22  ;;  %v506_v9 = vpack.c.bf16 %v6714_v30, %v6711_v29  ;;  %v6063_v22 = vld [vmem:[%s8920_s1 + $0x80] sm:$0xff] }
  0x6e   : > { %9001 = vst [vmem:[#allocation24_spill] sm:$0xff] %v6676_v14  ;;  %919 = vmatpush.bf16.msrb.mxu2 %v6063_v22  ;;  %v6071_v23 = vld [vmem:[%s8920_s1 + $0xc0] sm:$0xff] }
  0x6f   : > { %9002 = vst [vmem:[#allocation25_spill] sm:$0xff] %v6679_v15  ;;  %v420_v35 = vld [vmem:[#allocation2 + $0x120] sm:$0xff]  ;;  %1153 = vmatpush.bf16.msrb.mxu3 %v6071_v23 }
  0x70   : > { %388 = vst [vmem:[#allocation2 + $0x139] sm:$0xff] %v6676_v14  ;;  %v421_v39 = vld [vmem:[#allocation2 + $0x128] sm:$0xff]  ;;  %v1050_v0 = vld [vmem:[#allocation2 + $0xe0] sm:$0xff] }
  0x71   : > { %728 = vmatmul.bf16.gmra.mxu1 %v6662_v10  ;;  %389 = vst [vmem:[#allocation2 + $0x141] sm:$0xff] %v6679_v15  ;;  %v440_v52 = vpack.c.bf16 %v421_v39, %v420_v35  ;;  %v507_v39 = vpack.c.bf16 %v6752_v1, %v6749_v60 }
  0x72   : > { %9003 = vst [vmem:[#allocation26_spill] sm:$0xff] %v6684_v16  ;;  %1849 = vmatpush.bf16.msra.mxu2 %v6102_v59 }
  0x73   : > { %9004 = vst [vmem:[#allocation27_spill] sm:$0xff] %v6687_v17  ;;  %641 = vmatmul.bf16.gmra.mxu2 %v504_v20  ;;  %601 = vmatmul.bf16.gmra.mxu0 %v6695_v21  ;;  %v404_v45 = vld [vmem:[#allocation2 + $0x60] sm:$0xff]  ;;  %v6093_v20 = vld [vmem:[%s8920_s1 + $0x170] sm:$0xff] }
  0x74   : > { %372 = vst [vmem:[#allocation2 + $0x79] sm:$0xff] %v6684_v16  ;;  %v405_v50 = vld [vmem:[#allocation2 + $0x68] sm:$0xff]  ;;  %1615 = vmatpush.bf16.msrb.mxu1 %v6093_v20  ;;  %v1049_v16 = vld [vmem:[#allocation2 + $0xd8] sm:$0xff] }
  0x75   : > { %373 = vst [vmem:[#allocation2 + $0x81] sm:$0xff] %v6687_v17  ;;  %v6732_v54 = vpack.c.bf16 %v405_v50, %v404_v45  ;;  %v6799_v45 = vpack.c.bf16 %v6760_v3, %v6757_v2  ;;  %v1518_v17 = vld [vmem:[#allocation2 + $0xe2] sm:$0xff] }
  0x76   : > { %9005 = vst [vmem:[#allocation28_spill] sm:$0xff] %v6711_v29 }
  0x77   : > { %9006 = vst [vmem:[#allocation29_spill] sm:$0xff] %v6714_v30  ;;  %v422_v5 = vld [vmem:[#allocation2 + $0x138] sm:$0xff] }
  0x78   : > { %390 = vst [vmem:[#allocation2 + $0x151] sm:$0xff] %v6711_v29  ;;  %v423_v6 = vld [vmem:[#allocation2 + $0x140] sm:$0xff] }
  0x79   : > { %391 = vst [vmem:[#allocation2 + $0x159] sm:$0xff] %v6714_v30  ;;  %v441_v18 = vpack.c.bf16 %v423_v6, %v422_v5  ;;  %v6110_v5 = vld [vmem:[%s8920_s1 + $0x1f8] sm:$0xff]  ;;  %v6088_v6 = vld [vmem:[%s8920_s1 + $0x148] sm:$0xff] }
  0x7a   : > { %9007 = vst [vmem:[#allocation30_spill] sm:$0xff] %v6719_v31  ;;  %2083 = vmatpush.bf16.msra.mxu3 %v6110_v5  ;;  %v1501_v5 = vld [vmem:[#allocation2 + $0x1a] sm:$0xff] }
  0x7b   : > { %9008 = vst [vmem:[#allocation31_spill] sm:$0xff] %v6722_v32  ;;  %v406_v12 = vld [vmem:[#allocation2 + $0x78] sm:$0xff] }
  0x7c   : > { %374 = vst [vmem:[#allocation2 + $0x91] sm:$0xff] %v6719_v31  ;;  %v407_v13 = vld [vmem:[#allocation2 + $0x80] sm:$0xff] }
  0x7d   : > { %773 = vmatmul.bf16.gmra.mxu3 %v439_v24  ;;  %375 = vst [vmem:[#allocation2 + $0x99] sm:$0xff] %v6722_v32  ;;  %v6770_v19 = vpack.c.bf16 %v407_v13, %v406_v12  ;;  %v6092_v24 = vld [vmem:[%s8920_s1 + $0x168] sm:$0xff]  ;;  %v6087_v12 = vld [vmem:[%s8920_s1 + $0x140] sm:$0xff] }
  0x7e   : > { %9009 = vst [vmem:[#allocation32_spill] sm:$0xff] %v6749_v60  ;;  %1616 = vmatpush.bf16.msrb.mxu1 %v6092_v24  ;;  %v799_v13 = vld [vmem:[#allocation2 + $0x2] sm:$0xff] }
  0x7f   : > { %9010 = vst [vmem:[#allocation33_spill] sm:$0xff] %v6752_v1  ;;  %v424_v28 = vld [vmem:[#allocation2 + $0x150] sm:$0xff] }
  0x80   : > { %392 = vst [vmem:[#allocation2 + $0x169] sm:$0xff] %v6749_v60  ;;  %v425_v35 = vld [vmem:[#allocation2 + $0x158] sm:$0xff] }
  0x81   : > { %733 = vmatmul.bf16.gmra.mxu1 %v6697_v25  ;;  %393 = vst [vmem:[#allocation2 + $0x171] sm:$0xff] %v6752_v1  ;;  %v442_v55 = vpack.c.bf16 %v425_v35, %v424_v28 }
  0x82   : > { %9011 = vst [vmem:[#allocation34_spill] sm:$0xff] %v6757_v2  ;;  %1617 = vmatpush.bf16.msrb.mxu1 %v6091_v27 }
  0x83   : > { %646 = vmatmul.bf16.gmra.mxu2 %v505_v40  ;;  %606 = vmatmul.bf16.gmra.mxu0 %v6730_v41  ;;  %9012 = vst [vmem:[#allocation35_spill] sm:$0xff] %v6760_v3  ;;  %v6090_v40 = vld [vmem:[%s8920_s1 + $0x158] sm:$0xff]  ;;  %v408_v50 = vld [vmem:[#allocation2 + $0x90] sm:$0xff] }
  0x84   : > { %376 = vst [vmem:[#allocation2 + $0xa9] sm:$0xff] %v6757_v2 }
  0x85   : > { %377 = vst [vmem:[#allocation2 + $0xb1] sm:$0xff] %v6760_v3  ;;  %v1048_v3 = vld [vmem:[#allocation2 + $0xc8] sm:$0xff] }
  0x86   : > { %1618 = vmatpush.bf16.msrb.mxu1 %v6090_v40 }
  0x87   : > { %v426_v20 = vld [vmem:[#allocation2 + $0x168] sm:$0xff] }
  0x88   : > { %v427_v22 = vld [vmem:[#allocation2 + $0x170] sm:$0xff] }
  0x89   : > { %v443_v35 = vpack.c.bf16 %v427_v22, %v426_v20 }
  0x8a   : > { %1619 = vmatpush.bf16.msrb.mxu1 %v6089_v58 }
  0x8b   : > { %v410_v24 = vld [vmem:[#allocation2 + $0xa8] sm:$0xff] }
  0x8c   : > { %v411_v26 = vld [vmem:[#allocation2 + $0xb0] sm:$0xff] }
  0x8d   : > { %778 = vmatmul.bf16.gmra.mxu3 %v440_v52  ;;  %v409_v52 = vld [vmem:[#allocation2 + $0x98] sm:$0xff]  ;;  %v6825_v40 = vpack.c.bf16 %v411_v26, %v410_v24  ;;  %v1513_v48 = vld [vmem:[#allocation2 + $0xaa] sm:$0xff] }
  0x8e   : > { %v6801_v56 = vpack.c.bf16 %v409_v52, %v408_v50  ;;  %1620 = vmatpush.bf16.msrb.mxu1 %v6088_v6  ;;  %v1502_v6 = vld [vmem:[#allocation2 + $0x22] sm:$0xff]  ;;  %v1503_v24 = vld [vmem:[#allocation2 + $0x32] sm:$0xff] }
  0x91   : > { %738 = vmatmul.bf16.gmra.mxu1 %v6732_v54 }
  0x92   : > { %1621 = vmatpush.bf16.msrb.mxu1 %v6087_v12 }
  0x93   : > { %651 = vmatmul.bf16.gmra.mxu2 %v506_v9  ;;  %611 = vmatmul.bf16.gmra.mxu0 %v6768_v11  ;;  %v6118_v9 = vld [vmem:[%s8920_s1 + $0x238] sm:$0xff] }
  0x94   : > { %2317 = vmatpush.bf16.msra.mxu0 %v6118_v9  ;;  %v1533_v9 = vpack.c.bf16 %v1502_v6, %v1501_v5 }
  0x9d   : > { %783 = vmatmul.bf16.gmra.mxu3 %v441_v18  ;;  %v800_v18 = vld [vmem:[#allocation2 + $0xa] sm:$0xff] }
  0x9e   : > { %v831_v23 = vpack.c.bf16 %v800_v18, %v799_v13  ;;  %v6101_v13 = vld [vmem:[%s8920_s1 + $0x1b0] sm:$0xff] }
  0x9f   : > { %v6109_v18 = vld [vmem:[%s8920_s1 + $0x1f0] sm:$0xff]  ;;  %1850 = vmatpush.bf16.msra.mxu2 %v6101_v13 }
  0xa0   : > { %2084 = vmatpush.bf16.msra.mxu3 %v6109_v18 }
  0xa1   : > { %743 = vmatmul.bf16.gmra.mxu1 %v6770_v19 }
  0xa3   : > { %656 = vmatmul.bf16.gmra.mxu2 %v507_v39  ;;  %616 = vmatmul.bf16.gmra.mxu0 %v6799_v45 }
  0xad   : > { %788 = vmatmul.bf16.gmra.mxu3 %v442_v55 }
  0xb0   : > { %v582_v27 = vpop.f32.mrf.mxu0 }
  0xb1   : > { %748 = vmatmul.bf16.gmra.mxu1 %v6801_v56 }
  0xb2   : > { %v719_v28 = vpop.f32.mrf.mxu1 }
  0xb3   : > { %v6823_v39 = vadd.f32 %v719_v28, %v582_v27  ;;  %920 = vmatmul.bf16.vlgmr.msrb.gmra.mxu2 %v831_v23  ;;  %1388 = vmatmul.bf16.vlgmr.msrb.gmra.mxu0 %v6563_v38 }
  0xb6   : > { %v622_v50 = vpop.f32.mrf.mxu2 }
  0xb7   : > { %v759_v52 = vpop.f32.mrf.mxu3 }
  0xb8   : > { %v6828_v55 = vadd.f32 %v759_v52, %v622_v50  ;;  %v6831_v58 = vpop.f32.mrf.mxu0 }
  0xba   : > { %v6843_v22 = vpop.f32.mrf.mxu1 }
  0xbd   : > { %793 = vmatmul.bf16.gmra.mxu3 %v443_v35 }
  0xbe   : > { %v6833_v59 = vpop.f32.mrf.mxu2 }
  0xbf   : > { %v6848_v26 = vpop.f32.mrf.mxu3 }
  0xc0   : > { %v587_v12 = vpop.f32.mrf.mxu0 }
  0xc1   : > { %753 = vmatmul.bf16.gmra.mxu1 %v6825_v40 }
  0xc3   : > { %925 = vmatmul.bf16.gmra.mxu2 %v1533_v9  ;;  %1393 = vmatmul.bf16.gmra.mxu0 %v6607_v47  ;;  %v1504_v47 = vld [vmem:[#allocation2 + $0x3a] sm:$0xff] }
  0xc4   : > { %v1534_v27 = vpack.c.bf16 %v1504_v47, %v1503_v24  ;;  %v1505_v24 = vld [vmem:[#allocation2 + $0x4a] sm:$0xff]  ;;  %v1506_v47 = vld [vmem:[#allocation2 + $0x52] sm:$0xff] }
  0xc5   : > { %v1535_v60 = vpack.c.bf16 %v1506_v47, %v1505_v24  ;;  %v6116_v24 = vld [vmem:[%s8920_s1 + $0x228] sm:$0xff] }
  0xc6   : > { %v627_v38 = vpop.f32.mrf.mxu2 }
  0xc8   : > { %v589_v20 = vpop.f32.mrf.mxu0 }
  0xcd   : > { %1154 = vmatmul.bf16.vlgmr.msrb.gmra.mxu3 %v6627_v57  ;;  %v6117_v57 = vld [vmem:[%s8920_s1 + $0x230] sm:$0xff] }
  0xce   : > { %v629_v23 = vpop.f32.mrf.mxu2  ;;  %2318 = vmatpush.bf16.msra.mxu0 %v6117_v57 }
  0xd0   : > { %v592_v28 = vpop.f32.mrf.mxu0 }
  0xd1   : > { %1622 = vmatmul.bf16.vlgmr.msrb.gmra.mxu1 %v1533_v9 }
  0xd2   : > { %2319 = vmatpush.bf16.msra.mxu0 %v6116_v24 }
  0xd3   : > { %930 = vmatmul.bf16.gmra.mxu2 %v1534_v27  ;;  %1398 = vmatmul.bf16.gmra.mxu0 %v6660_v4 }
  0xd6   : > { %v632_v52 = vpop.f32.mrf.mxu2 }
  0xd8   : > { %v594_v6 = vpop.f32.mrf.mxu0 }
  0xdd   : > { %1159 = vmatmul.bf16.gmra.mxu3 %v6662_v10 }
  0xde   : > { %v724_v35 = vpop.f32.mrf.mxu1  ;;  %v634_v57 = vpop.f32.mrf.mxu2 }
  0xdf   : > { %v6851_v50 = vadd.f32 %v724_v35, %v587_v12 }
  0xe0   : > { %v764_v5 = vpop.f32.mrf.mxu3  ;;  %v597_v4 = vpop.f32.mrf.mxu0 }
  0xe1   : > { %1627 = vmatmul.bf16.gmra.mxu1 %v1534_v27  ;;  %v6854_v9 = vadd.f32 %v764_v5, %v627_v38  ;;  %v6108_v27 = vld [vmem:[%s8920_s1 + $0x1e8] sm:$0xff] }
  0xe2   : > { %2085 = vmatpush.bf16.msra.mxu3 %v6108_v27  ;;  %v1507_v5 = vld [vmem:[#allocation2 + $0x62] sm:$0xff] }
  0xe3   : > { %935 = vmatmul.bf16.gmra.mxu2 %v1535_v60  ;;  %1403 = vmatmul.bf16.gmra.mxu0 %v6695_v21 }
  0xe6   : > { %v726_v13 = vpop.f32.mrf.mxu1  ;;  %v637_v38 = vpop.f32.mrf.mxu2 }
  0xe7   : > { %v6856_v18 = vadd.f32 %v726_v13, %v589_v20  ;;  %v6100_v20 = vld [vmem:[%s8920_s1 + $0x1a8] sm:$0xff] }
  0xe8   : > { %v766_v1 = vpop.f32.mrf.mxu3  ;;  %1851 = vmatpush.bf16.msra.mxu2 %v6100_v20  ;;  %v1508_v13 = vld [vmem:[#allocation2 + $0x6a] sm:$0xff] }
  0xe9   : > { %v6858_v30 = vadd.f32 %v766_v1, %v629_v23  ;;  %v599_v23 = vpop.f32.mrf.mxu0 }
  0xed   : > { %1164 = vmatmul.bf16.gmra.mxu3 %v6697_v25 }
  0xee   : > { %v729_v10 = vpop.f32.mrf.mxu1  ;;  %v639_v25 = vpop.f32.mrf.mxu2 }
  0xef   : > { %v6861_v12 = vadd.f32 %v729_v10, %v592_v28  ;;  %v1536_v10 = vpack.c.bf16 %v1508_v13, %v1507_v5  ;;  %v1510_v13 = vld [vmem:[#allocation2 + $0x82] sm:$0xff] }
  0xf0   : > { %v769_v1 = vpop.f32.mrf.mxu3 }
  0xf1   : > { %1632 = vmatmul.bf16.gmra.mxu1 %v1535_v60  ;;  %v6870_v21 = vadd.f32 %v769_v1, %v632_v52  ;;  %v602_v60 = vpop.f32.mrf.mxu0 }
  0xf3   : > { %940 = vmatmul.bf16.gmra.mxu2 %v1536_v10  ;;  %1408 = vmatmul.bf16.gmra.mxu0 %v6730_v41 }
  0xf6   : > { %v731_v28 = vpop.f32.mrf.mxu1 }
  0xf7   : > { %v6872_v35 = vadd.f32 %v731_v28, %v594_v6  ;;  %v642_v6 = vpop.f32.mrf.mxu2 }
  0xf8   : > { %v771_v47 = vpop.f32.mrf.mxu3 }
  0xf9   : > { %v6877_v20 = vadd.f32 %v771_v47, %v634_v57  ;;  %v604_v28 = vpop.f32.mrf.mxu0  ;;  %v1509_v57 = vld [vmem:[#allocation2 + $0x7a] sm:$0xff] }
  0xfa   : > { %v6887_v14 = vpack.c.bf16 %v1510_v13, %v1509_v57  ;;  %v1511_v57 = vld [vmem:[#allocation2 + $0x92] sm:$0xff]  ;;  %v1512_v13 = vld [vmem:[#allocation2 + $0x9a] sm:$0xff] }
  0xfb   : > { %v6910_v62 = vpack.c.bf16 %v1512_v13, %v1511_v57  ;;  %v1281_v13 = vld [vmem:[#allocation2 + $0xc1] sm:$0xff] }
  0xfd   : > { %1169 = vmatmul.bf16.gmra.mxu3 %v6732_v54 }
  0xfe   : > { %v734_v52 = vpop.f32.mrf.mxu1 }
  0xff   : > { %v6880_v27 = vadd.f32 %v734_v52, %v597_v4  ;;  %v644_v5 = vpop.f32.mrf.mxu2  ;;  %v6107_v52 = vld [vmem:[%s8920_s1 + $0x1e0] sm:$0xff] }
 0x100   : > { %v774_v1 = vpop.f32.mrf.mxu3  ;;  %2086 = vmatpush.bf16.msra.mxu3 %v6107_v52 }
 0x101   : > { %1637 = vmatmul.bf16.gmra.mxu1 %v1536_v10  ;;  %v6883_v29 = vadd.f32 %v774_v1, %v637_v38  ;;  %v607_v41 = vpop.f32.mrf.mxu0 }
 0x103   : > { %945 = vmatmul.bf16.gmra.mxu2 %v6887_v14  ;;  %1413 = vmatmul.bf16.gmra.mxu0 %v6768_v11 }
 0x106   : > { %v736_v24 = vpop.f32.mrf.mxu1 }
 0x107   : > { %v6885_v15 = vadd.f32 %v736_v24, %v599_v23  ;;  %v647_v38 = vpop.f32.mrf.mxu2  ;;  %v6099_v23 = vld [vmem:[%s8920_s1 + $0x1a0] sm:$0xff] }
 0x108   : > { %v776_v47 = vpop.f32.mrf.mxu3  ;;  %1852 = vmatpush.bf16.msra.mxu2 %v6099_v23 }
 0x109   : > { %v6889_v4 = vadd.f32 %v776_v47, %v639_v25  ;;  %v609_v1 = vpop.f32.mrf.mxu0  ;;  %v6115_v47 = vld [vmem:[%s8920_s1 + $0x220] sm:$0xff] }
 0x10a   : > { %2320 = vmatpush.bf16.msra.mxu0 %v6115_v47 }
 0x10d   : > { %1174 = vmatmul.bf16.gmra.mxu3 %v6770_v19 }
 0x10e   : > { %v739_v54 = vpop.f32.mrf.mxu1  ;;  %2321 = vmatpush.bf16.msra.mxu0 %v6114_v8 }
 0x10f   : > { %v6893_v10 = vadd.f32 %v739_v54, %v602_v60  ;;  %v649_v19 = vpop.f32.mrf.mxu2 }
 0x110   : > { %v779_v25 = vpop.f32.mrf.mxu3 }
 0x111   : > { %1642 = vmatmul.bf16.gmra.mxu1 %v6887_v14  ;;  %v6903_v11 = vadd.f32 %v779_v25, %v642_v6  ;;  %v612_v23 = vpop.f32.mrf.mxu0 }
 0x113   : > { %950 = vmatmul.bf16.gmra.mxu2 %v6910_v62  ;;  %1418 = vmatmul.bf16.gmra.mxu0 %v6799_v45  ;;  %v1514_v45 = vld [vmem:[#allocation2 + $0xb2] sm:$0xff] }
 0x116   : > { %v741_v60 = vpop.f32.mrf.mxu1 }
 0x117   : > { %v6905_v24 = vadd.f32 %v741_v60, %v604_v28  ;;  %v652_v52 = vpop.f32.mrf.mxu2 }
 0x118   : > { %v781_v54 = vpop.f32.mrf.mxu3 }
 0x119   : > { %v6912_v61 = vadd.f32 %v781_v54, %v644_v5  ;;  %v614_v60 = vpop.f32.mrf.mxu0  ;;  %v1282_v5 = vld [vmem:[#allocation2 + $0xc9] sm:$0xff] }
 0x11a   : > { %v6924_v43 = vpack.c.bf16 %v1282_v5, %v1281_v13 }
 0x11d   : > { %1179 = vmatmul.bf16.gmra.mxu3 %v6801_v56 }
 0x11e   : > { %v744_v6 = vpop.f32.mrf.mxu1 }
 0x11f   : > { %v6916_v28 = vadd.f32 %v744_v6, %v607_v41  ;;  %v654_v49 = vpop.f32.mrf.mxu2  ;;  %v6926_v6 = vpack.c.bf16 %v1514_v45, %v1513_v48  ;;  %v6106_v48 = vld [vmem:[%s8920_s1 + $0x1d8] sm:$0xff] }
 0x120   : > { %v784_v25 = vpop.f32.mrf.mxu3  ;;  %2087 = vmatpush.bf16.msra.mxu3 %v6106_v48  ;;  %v1283_v45 = vld [vmem:[#allocation2 + $0xd9] sm:$0xff] }
 0x121   : > { %1647 = vmatmul.bf16.gmra.mxu1 %v6910_v62  ;;  %v6920_v47 = vadd.f32 %v784_v25, %v647_v38  ;;  %v617_v56 = vpop.f32.mrf.mxu0 }
 0x123   : > { %955 = vmatmul.bf16.gmra.mxu2 %v6926_v6  ;;  %1423 = vmatmul.bf16.gmra.mxu0 %v6924_v43 }
 0x126   : > { %v746_v57 = vpop.f32.mrf.mxu1 }
 0x127   : > { %v6922_v54 = vadd.f32 %v746_v57, %v609_v1  ;;  %v657_v1 = vpop.f32.mrf.mxu2  ;;  %v6098_v57 = vld [vmem:[%s8920_s1 + $0x198] sm:$0xff] }
 0x128   : > { %v786_v41 = vpop.f32.mrf.mxu3  ;;  %1853 = vmatpush.bf16.msra.mxu2 %v6098_v57 }
 0x129   : > { %v6928_v42 = vadd.f32 %v786_v41, %v649_v19  ;;  %v619_v13 = vpop.f32.mrf.mxu0 }
 0x12d   : > { %1184 = vmatmul.bf16.gmra.mxu3 %v6825_v40  ;;  %v1284_v40 = vld [vmem:[#allocation2 + $0xe1] sm:$0xff] }
 0x12e   : > { %v749_v38 = vpop.f32.mrf.mxu1  ;;  %v6949_v57 = vpack.c.bf16 %v1284_v40, %v1283_v45  ;;  %v1285_v40 = vld [vmem:[#allocation2 + $0xf1] sm:$0xff] }
 0x12f   : > { %v6932_v25 = vadd.f32 %v749_v38, %v612_v23  ;;  %v659_v38 = vpop.f32.mrf.mxu2 }
 0x130   : > { %v789_v19 = vpop.f32.mrf.mxu3 }
 0x131   : > { %1652 = vmatmul.bf16.gmra.mxu1 %v6926_v6  ;;  %v6942_v5 = vadd.f32 %v789_v19, %v652_v52  ;;  %v6951_v52 = vpack.c.bf16 %v1516_v33, %v1515_v34  ;;  %v1389_v19 = vpop.f32.mrf.mxu0 }
 0x133   : > { %960 = vmatmul.bf16.gmra.mxu2 %v6951_v52  ;;  %1428 = vmatmul.bf16.gmra.mxu0 %v6949_v57 }
 0x136   : > { %v751_v23 = vpop.f32.mrf.mxu1 }
 0x137   : > { %v6944_v41 = vadd.f32 %v751_v23, %v614_v60  ;;  %v6955_v60 = vpack.c.bf16 %v1048_v3, %v1047_v7  ;;  %v921_v45 = vpop.f32.mrf.mxu2  ;;  %v722_v7 = vadd.f32 %v6843_v22, %v6831_v58  ;;  %v6976_v58 = vpack.c.bf16 %v1050_v0, %v1049_v16 }
 0x138   : > { %v791_v48 = vpop.f32.mrf.mxu3  ;;  %v1001_v8 = vadd.f32 %v921_v45, %v6823_v39 }
 0x139   : > { %v6953_v2 = vadd.f32 %v791_v48, %v654_v49  ;;  %v1391_v34 = vpop.f32.mrf.mxu0  ;;  %v1286_v48 = vld [vmem:[#allocation2 + $0xf9] sm:$0xff] }
 0x13a   : > { %v6970_v45 = vpack.c.bf16 %v1286_v48, %v1285_v40  ;;  %v1287_v48 = vld [vmem:[#allocation2 + $0x109] sm:$0xff] }
 0x13c   : > { %9013 = vst [vmem:[#allocation36_spill] sm:$0xff] %v6970_v45 }
 0x13d   : > { %1189 = vmatmul.bf16.gmra.mxu3 %v6955_v60 }
 0x13e   : > { %v754_v23 = vpop.f32.mrf.mxu1 }
 0x13f   : > { %v6959_v32 = vadd.f32 %v754_v23, %v617_v56  ;;  %v923_v56 = vpop.f32.mrf.mxu2  ;;  %v1517_v23 = vld [vmem:[#allocation2 + $0xda] sm:$0xff] }
 0x140   : > { %v794_v33 = vpop.f32.mrf.mxu3  ;;  %v1002_v39 = vadd.f32 %v923_v56, %v722_v7  ;;  %v6972_v53 = vpack.c.bf16 %v1518_v17, %v1517_v23  ;;  %v6097_v7 = vld [vmem:[%s8920_s1 + $0x190] sm:$0xff] }
 0x141   : > { %1657 = vmatmul.bf16.gmra.mxu1 %v6951_v52  ;;  %v6964_v49 = vadd.f32 %v794_v33, %v657_v1  ;;  %v1394_v1 = vpop.f32.mrf.mxu0  ;;  %v6105_v17 = vld [vmem:[%s8920_s1 + $0x1d0] sm:$0xff]  ;;  %1854 = vmatpush.bf16.msra.mxu2 %v6097_v7 }
 0x142   : > { %2088 = vmatpush.bf16.msra.mxu3 %v6105_v17  ;;  %v1288_v56 = vld [vmem:[#allocation2 + $0x111] sm:$0xff] }
 0x143   : > { %965 = vmatmul.bf16.gmra.mxu2 %v6972_v53  ;;  %1433 = vmatmul.bf16.gmra.mxu0 %v6970_v45  ;;  %v6995_v36 = vpack.c.bf16 %v1288_v56, %v1287_v48  ;;  %v1289_v56 = vld [vmem:[#allocation2 + $0x121] sm:$0xff] }
 0x145   : > { %9015 = vst [vmem:[#allocation38_spill] sm:$0xff] %v6995_v36 }
 0x146   : > { %v756_v3 = vpop.f32.mrf.mxu1 }
 0x147   : > { %v6968_v31 = vadd.f32 %v756_v3, %v619_v13  ;;  %v926_v13 = vpop.f32.mrf.mxu2 }
 0x148   : > { %v796_v63 = vpop.f32.mrf.mxu3 }
 0x149   : > { %v6974_v33 = vadd.f32 %v796_v63, %v659_v38  ;;  %v1003_v63 = vadd.f32 %v926_v13, %v6851_v50  ;;  %v1396_v16 = vpop.f32.mrf.mxu0  ;;  %v6113_v50 = vld [vmem:[%s8920_s1 + $0x210] sm:$0xff] }
 0x14a   : > { %v1051_v13 = vld [vmem:[#allocation2 + $0xf0] sm:$0xff]  ;;  %2322 = vmatpush.bf16.msra.mxu0 %v6113_v50 }
 0x14b   : > { %v1290_v50 = vld [vmem:[#allocation2 + $0x129] sm:$0xff] }
 0x14d   : > { %1194 = vmatmul.bf16.gmra.mxu3 %v6976_v58 }
 0x14e   : > { %v1623_v22 = vpop.f32.mrf.mxu1 }
 0x14f   : > { %v928_v51 = vpop.f32.mrf.mxu2 }
 0x150   : > { %v1155_v0 = vpop.f32.mrf.mxu3  ;;  %v1004_v7 = vadd.f32 %v928_v51, %v6856_v18 }
 0x151   : > { %1662 = vmatmul.bf16.gmra.mxu1 %v6972_v53  ;;  %v1235_v38 = vadd.f32 %v1155_v0, %v1001_v8  ;;  %v6997_v8 = vpack.c.bf16 %v1520_v44, %v1519_v46  ;;  %v1399_v17 = vpop.f32.mrf.mxu0  ;;  %v6999_v0 = vpack.c.bf16 %v1052_v37, %v1051_v13 }
 0x153   : > { %v1469_v3 = vadd.f32 %v1389_v19, %v1235_v38  ;;  %970 = vmatmul.bf16.gmra.mxu2 %v6997_v8  ;;  %1438 = vmatmul.bf16.gmra.mxu0 %v6995_v36  ;;  %v1053_v36 = vld [vmem:[#allocation2 + $0x108] sm:$0xff] }
 0x155   : > { %v6989_v23 = vadd.f32 %v1623_v22, %v1469_v3 }
 0x156   : > { %v1625_v40 = vpop.f32.mrf.mxu1 }
 0x157   : > { %9014 = vst [vmem:[#allocation37_spill] sm:$0xff] %v6989_v23  ;;  %v931_v51 = vpop.f32.mrf.mxu2 }
 0x158   : > { %v1157_v19 = vpop.f32.mrf.mxu3  ;;  %v1005_v18 = vadd.f32 %v931_v51, %v6861_v12 }
 0x159   : > { %v1236_v22 = vadd.f32 %v1157_v19, %v1002_v39  ;;  %v1401_v46 = vpop.f32.mrf.mxu0  ;;  %v1521_v19 = vld [vmem:[#allocation2 + $0x10a] sm:$0xff] }
 0x15b   : > { %v1470_v38 = vadd.f32 %v1391_v34, %v1236_v22  ;;  %v1522_v22 = vld [vmem:[#allocation2 + $0x112] sm:$0xff] }
 0x15c   : > { %v7013_v51 = vpack.c.bf16 %v1522_v22, %v1521_v19  ;;  %v1291_v19 = vld [vmem:[#allocation2 + $0x139] sm:$0xff]  ;;  %v1292_v22 = vld [vmem:[#allocation2 + $0x141] sm:$0xff] }
 0x15d   : > { %1199 = vmatmul.bf16.gmra.mxu3 %v6999_v0  ;;  %v7004_v45 = vadd.f32 %v1625_v40, %v1470_v38  ;;  %v1054_v40 = vld [vmem:[#allocation2 + $0x110] sm:$0xff] }
 0x15e   : > { %v1628_v3 = vpop.f32.mrf.mxu1 }
 0x15f   : > { %9016 = vst [vmem:[#allocation39_spill] sm:$0xff] %v7004_v45  ;;  %v933_v13 = vpop.f32.mrf.mxu2  ;;  %v7011_v45 = vpack.c.bf16 %v1290_v50, %v1289_v56 }
 0x160   : > { %v1160_v44 = vpop.f32.mrf.mxu3  ;;  %v1006_v38 = vadd.f32 %v933_v13, %v6872_v35 }
 0x161   : > { %1667 = vmatmul.bf16.gmra.mxu1 %v6997_v8  ;;  %v1237_v39 = vadd.f32 %v1160_v44, %v1003_v63  ;;  %9017 = vst [vmem:[#allocation40_spill] sm:$0xff] %v7011_v45  ;;  %v1404_v23 = vpop.f32.mrf.mxu0 }
 0x163   : > { %v1471_v37 = vadd.f32 %v1394_v1, %v1237_v39  ;;  %v7015_v1 = vpack.c.bf16 %v1054_v40, %v1053_v36  ;;  %975 = vmatmul.bf16.gmra.mxu2 %v7013_v51  ;;  %1443 = vmatmul.bf16.gmra.mxu0 %v7011_v45  ;;  %v6104_v36 = vld [vmem:[%s8920_s1 + $0x1c8] sm:$0xff] }
 0x164   : > { %2089 = vmatpush.bf16.msra.mxu3 %v6104_v36  ;;  %v1056_v45 = vld [vmem:[#allocation2 + $0x128] sm:$0xff] }
 0x165   : > { %v7008_v34 = vadd.f32 %v1628_v3, %v1471_v37  ;;  %v6096_v37 = vld [vmem:[%s8920_s1 + $0x188] sm:$0xff] }
 0x166   : > { %v1630_v48 = vpop.f32.mrf.mxu1  ;;  %1855 = vmatpush.bf16.msra.mxu2 %v6096_v37 }
 0x167   : > { %v936_v35 = vpop.f32.mrf.mxu2 }
 0x168   : > { %v1162_v12 = vpop.f32.mrf.mxu3 }
 0x169   : > { %v1238_v63 = vadd.f32 %v1162_v12, %v1004_v7  ;;  %v1007_v7 = vadd.f32 %v936_v35, %v6880_v27  ;;  %v1406_v56 = vpop.f32.mrf.mxu0  ;;  %v6112_v27 = vld [vmem:[%s8920_s1 + $0x208] sm:$0xff]  ;;  %v1055_v35 = vld [vmem:[#allocation2 + $0x120] sm:$0xff] }
 0x16a   : > { %2323 = vmatpush.bf16.msra.mxu0 %v6112_v27  ;;  %v1294_v27 = vld [vmem:[#allocation2 + $0x159] sm:$0xff] }
 0x16b   : > { %v1472_v3 = vadd.f32 %v1396_v16, %v1238_v63  ;;  %v1523_v63 = vld [vmem:[#allocation2 + $0x122] sm:$0xff] }
 0x16d   : > { %1204 = vmatmul.bf16.gmra.mxu3 %v7015_v1  ;;  %v7020_v39 = vadd.f32 %v1630_v48, %v1472_v3  ;;  %v1524_v3 = vld [vmem:[#allocation2 + $0x12a] sm:$0xff] }
 0x16e   : > { %v1633_v44 = vpop.f32.mrf.mxu1 }
 0x16f   : > { %9018 = vst [vmem:[#allocation41_spill] sm:$0xff] %v7020_v39  ;;  %v938_v12 = vpop.f32.mrf.mxu2  ;;  %v7036_v39 = vpack.c.bf16 %v1292_v22, %v1291_v19 }
 0x170   : > { %v1165_v16 = vpop.f32.mrf.mxu3  ;;  %v1008_v37 = vadd.f32 %v938_v12, %v6885_v15 }
 0x171   : > { %1672 = vmatmul.bf16.gmra.mxu1 %v7013_v51  ;;  %v1239_v50 = vadd.f32 %v1165_v16, %v1005_v18  ;;  %9020 = vst [vmem:[#allocation43_spill] sm:$0xff] %v7036_v39  ;;  %v7038_v18 = vpack.c.bf16 %v1524_v3, %v1523_v63  ;;  %v1409_v36 = vpop.f32.mrf.mxu0  ;;  %v7040_v16 = vpack.c.bf16 %v1056_v45, %v1055_v35  ;;  %v1293_v3 = vld [vmem:[#allocation2 + $0x151] sm:$0xff] }
 0x173   : > { %v1473_v48 = vadd.f32 %v1399_v17, %v1239_v50  ;;  %9021 = vst [vmem:[#allocation44_spill] sm:$0xff] %v7038_v18  ;;  %980 = vmatmul.bf16.gmra.mxu2 %v7038_v18  ;;  %1448 = vmatmul.bf16.gmra.mxu0 %v7036_v39  ;;  %v1057_v39 = vld [vmem:[#allocation2 + $0x138] sm:$0xff] }
 0x175   : > { %v7030_v40 = vadd.f32 %v1633_v44, %v1473_v48 }
 0x176   : > { %v1635_v13 = vpop.f32.mrf.mxu1 }
 0x177   : > { %9019 = vst [vmem:[#allocation42_spill] sm:$0xff] %v7030_v40  ;;  %v941_v15 = vpop.f32.mrf.mxu2 }
 0x178   : > { %v1167_v17 = vpop.f32.mrf.mxu3  ;;  %v1009_v19 = vadd.f32 %v941_v15, %v6893_v10 }
 0x179   : > { %v1240_v44 = vadd.f32 %v1167_v17, %v1006_v38  ;;  %v1411_v12 = vpop.f32.mrf.mxu0  ;;  %v1525_v17 = vld [vmem:[#allocation2 + $0x13a] sm:$0xff] }
 0x17b   : > { %v1474_v50 = vadd.f32 %v1401_v46, %v1240_v44  ;;  %v1526_v44 = vld [vmem:[#allocation2 + $0x142] sm:$0xff] }
 0x17c   : > { %v7054_v15 = vpack.c.bf16 %v1526_v44, %v1525_v17 }
 0x17d   : > { %1209 = vmatmul.bf16.gmra.mxu3 %v7040_v16  ;;  %v7045_v40 = vadd.f32 %v1635_v13, %v1474_v50  ;;  %v1058_v13 = vld [vmem:[#allocation2 + $0x140] sm:$0xff] }
 0x17e   : > { %v1638_v48 = vpop.f32.mrf.mxu1 }
 0x17f   : > { %9022 = vst [vmem:[#allocation45_spill] sm:$0xff] %v7045_v40  ;;  %v943_v35 = vpop.f32.mrf.mxu2  ;;  %v7052_v40 = vpack.c.bf16 %v1294_v27, %v1293_v3 }
 0x180   : > { %v1170_v22 = vpop.f32.mrf.mxu3  ;;  %v1010_v50 = vadd.f32 %v943_v35, %v6905_v24  ;;  %v7075_v35 = vld [vmem:[%s6444_s13 + $0xf8] sm:$0xff] }
 0x181   : > { %1677 = vmatmul.bf16.gmra.mxu1 %v7038_v18  ;;  %v1241_v38 = vadd.f32 %v1170_v22, %v1007_v7  ;;  %9023 = vst [vmem:[#allocation46_spill] sm:$0xff] %v7052_v40  ;;  %v1414_v18 = vpop.f32.mrf.mxu0 }
 0x182   : > { %9026 = vst [vmem:[#allocation49_spill] sm:$0xff] %v7075_v35 }
 0x183   : > { %v1475_v45 = vadd.f32 %v1404_v23, %v1241_v38  ;;  %v7056_v23 = vpack.c.bf16 %v1058_v13, %v1057_v39  ;;  %985 = vmatmul.bf16.gmra.mxu2 %v7054_v15  ;;  %1453 = vmatmul.bf16.gmra.mxu0 %v7052_v40  ;;  %v6103_v39 = vld [vmem:[%s8920_s1 + $0x1c0] sm:$0xff]  ;;  %v1295_v13 = vld [vmem:[#allocation2 + $0x169] sm:$0xff]  ;;  %395 = vst [vmem:[#allocation2 + $0x189] sm:$0xff] %v7075_v35 }
 0x184   : > { %2090 = vmatpush.bf16.msra.mxu3 %v6103_v39  ;;  %v1060_v39 = vld [vmem:[#allocation2 + $0x158] sm:$0xff] }
 0x185   : > { %v7049_v46 = vadd.f32 %v1638_v48, %v1475_v45  ;;  %v6095_v45 = vld [vmem:[%s8920_s1 + $0x180] sm:$0xff] }
 0x186   : > { %v1640_v63 = vpop.f32.mrf.mxu1  ;;  %1856 = vmatpush.bf16.msra.mxu2 %v6095_v45  ;;  %v1059_v45 = vld [vmem:[#allocation2 + $0x150] sm:$0xff] }
 0x187   : > { %v946_v38 = vpop.f32.mrf.mxu2 }
 0x188   : > { %v1172_v10 = vpop.f32.mrf.mxu3 }
 0x189   : > { %v1242_v7 = vadd.f32 %v1172_v10, %v1008_v37  ;;  %v1011_v37 = vadd.f32 %v946_v38, %v6916_v28  ;;  %v1416_v3 = vpop.f32.mrf.mxu0  ;;  %v1296_v10 = vld [vmem:[#allocation2 + $0x171] sm:$0xff]  ;;  %v1528_v38 = vld [vmem:[#allocation2 + $0x15a] sm:$0xff] }
 0x18b   : > { %v1476_v48 = vadd.f32 %v1406_v56, %v1242_v7 }
 0x18d   : > { %1214 = vmatmul.bf16.gmra.mxu3 %v7056_v23  ;;  %v7061_v24 = vadd.f32 %v1640_v63, %v1476_v48  ;;  %v7072_v63 = vld [vmem:[%s6444_s13 + $0xf0] sm:$0xff]  ;;  %s8696_s13 = scalar_lea.vmem [#allocation3], %s5206_s17 }
 0x18e   : > { %v1643_v22 = vpop.f32.mrf.mxu1  ;;  %9025 = vst [vmem:[#allocation48_spill] sm:$0xff] %v7072_v63  ;;  %v1527_v48 = vld [vmem:[#allocation2 + $0x152] sm:$0xff]  ;;  %s5137_s21 = sshll.u32 %s8696_s13, 4  ;;  %s5138_s21 = int_to_ptr.vmem [resolvable:$true] %s5137_s21 }
 0x18f   : > { %9024 = vst [vmem:[#allocation47_spill] sm:$0xff] %v7061_v24  ;;  %v948_v7 = vpop.f32.mrf.mxu2 }
 0x190   : > { %v1175_v56 = vpop.f32.mrf.mxu3  ;;  %394 = vst [vmem:[#allocation2 + $0x181] sm:$0xff] %v7072_v63 }
 0x191   : > { %1682 = vmatmul.bf16.gmra.mxu1 %v7054_v15  ;;  %v1243_v27 = vadd.f32 %v1175_v56, %v1009_v19  ;;  %v6111_v19 = vld [vmem:[%s8920_s1 + $0x200] sm:$0xff]  ;;  %v7087_v56 = vpack.c.bf16 %v1296_v10, %v1295_v13  ;;  %v1419_v40 = vpop.f32.mrf.mxu0 }
 0x192   : > { %2324 = vmatpush.bf16.msra.mxu0 %v6111_v19 }
 0x193   : > { %v1477_v17 = vadd.f32 %v1409_v36, %v1243_v27  ;;  %v1012_v36 = vadd.f32 %v948_v7, %v6922_v54  ;;  %9029 = vst [vmem:[#allocation52_spill] sm:$0xff] %v7087_v56  ;;  %1458 = vmatmul.bf16.gmra.mxu0 %v7087_v56 }
 0x195   : > { %v7081_v28 = vadd.f32 %v1643_v22, %v1477_v17  ;;  %v7091_v17 = vpack.c.bf16 %v1060_v39, %v1059_v45  ;;  %v1529_v45 = vld [vmem:[#allocation2 + $0x16a] sm:$0xff]  ;;  %v1530_v39 = vld [vmem:[#allocation2 + $0x172] sm:$0xff] }
 0x196   : > { %v7078_v44 = vpop.f32.mrf.mxu1  ;;  %v7109_v56 = vpack.c.bf16 %v1530_v39, %v1529_v45 }
 0x197   : > { %9027 = vst [vmem:[#allocation50_spill] sm:$0xff] %v7078_v44  ;;  %v7089_v44 = vpack.c.bf16 %v1528_v38, %v1527_v48  ;;  %v951_v54 = vpop.f32.mrf.mxu2 }
 0x198   : > { %9028 = vst [vmem:[#allocation51_spill] sm:$0xff] %v7081_v28  ;;  %v1177_v27 = vpop.f32.mrf.mxu3  ;;  %v1013_v13 = vadd.f32 %v951_v54, %v6932_v25  ;;  %v7107_v25 = vpack.c.bf16 %v7075_v35, %v7072_v63 }
 0x199   : > { %v1244_v22 = vadd.f32 %v1177_v27, %v1010_v50  ;;  %990 = vmatmul.bf16.gmra.mxu2 %v7089_v44  ;;  %v1421_v7 = vpop.f32.mrf.mxu0  ;;  %v1061_v27 = vld [vmem:[#allocation2 + $0x168] sm:$0xff]  ;;  %9034 = vst [vmem:[#allocation57_spill] sm:$0xff] %v7109_v56 }
 0x19a   : > { %9033 = vst [vmem:[#allocation56_spill] sm:$0xff] %v7107_v25 }
 0x19b   : > { %v7094_v28 = vadd.f32 %v1411_v12, %v1244_v22  ;;  %v1062_v22 = vld [vmem:[#allocation2 + $0x170] sm:$0xff] }
 0x19d   : > { %9030 = vst [vmem:[#allocation53_spill] sm:$0xff] %v7094_v28  ;;  %1219 = vmatmul.bf16.gmra.mxu3 %v7091_v17 }
 0x19e   : > { %v1648_v24 = vpop.f32.mrf.mxu1 }
 0x19f   : > { %v953_v12 = vpop.f32.mrf.mxu2 }
 0x1a0   : > { %v1180_v10 = vpop.f32.mrf.mxu3  ;;  %v1014_v28 = vadd.f32 %v953_v12, %v6944_v41 }
 0x1a1   : > { %1687 = vmatmul.bf16.gmra.mxu1 %v7089_v44  ;;  %v1245_v48 = vadd.f32 %v1180_v10, %v1011_v37  ;;  %v1424_v37 = vpop.f32.mrf.mxu0  ;;  %v7111_v10 = vpack.c.bf16 %v1062_v22, %v1061_v27  ;;  %v1736_v27 = vld [vmem:[#allocation2 + $0x30] sm:$0xff]  ;;  %v1737_v22 = vld [vmem:[#allocation2 + $0x38] sm:$0xff] }
 0x1a3   : > { %v1479_v50 = vadd.f32 %v1414_v18, %v1245_v48  ;;  %9035 = vst [vmem:[#allocation58_spill] sm:$0xff] %v7111_v10  ;;  %1463 = vmatmul.bf16.gmra.mxu0 %v7107_v25 }
 0x1a5   : > { %v7102_v19 = vadd.f32 %v1648_v24, %v1479_v50 }
 0x1a6   : > { %v7100_v38 = vpop.f32.mrf.mxu1 }
 0x1a7   : > { %9031 = vst [vmem:[#allocation54_spill] sm:$0xff] %v7100_v38  ;;  %v956_v41 = vpop.f32.mrf.mxu2  ;;  %v1063_v38 = vld [vmem:[#allocation2 + $0x180] sm:$0xff] }
 0x1a8   : > { %9032 = vst [vmem:[#allocation55_spill] sm:$0xff] %v7102_v19  ;;  %v1182_v54 = vpop.f32.mrf.mxu3  ;;  %v1015_v50 = vadd.f32 %v956_v41, %v6959_v32  ;;  %v1768_v32 = vpack.c.bf16 %v1737_v22, %v1736_v27 }
 0x1a9   : > { %v1246_v18 = vadd.f32 %v1182_v54, %v1012_v36  ;;  %995 = vmatmul.bf16.gmra.mxu2 %v7109_v56  ;;  %v1426_v45 = vpop.f32.mrf.mxu0 }
 0x1ab   : > { %v7114_v24 = vadd.f32 %v1416_v3, %v1246_v18  ;;  %v2204_v3 = vld [vmem:[#allocation2 + $0x32] sm:$0xff]  ;;  %v2205_v18 = vld [vmem:[#allocation2 + $0x3a] sm:$0xff] }
 0x1ac   : > { %v2236_v41 = vpack.c.bf16 %v2205_v18, %v2204_v3 }
 0x1ad   : > { %9036 = vst [vmem:[#allocation59_spill] sm:$0xff] %v7114_v24  ;;  %1224 = vmatmul.bf16.gmra.mxu3 %v7111_v10  ;;  %v1064_v24 = vld [vmem:[#allocation2 + $0x188] sm:$0xff] }
 0x1ae   : > { %v1653_v48 = vpop.f32.mrf.mxu1  ;;  %v1532_v10 = vld [vmem:[#allocation2 + $0x18a] sm:$0xff] }
 0x1af   : > { %v958_v35 = vpop.f32.mrf.mxu2 }
 0x1b0   : > { %v1185_v12 = vpop.f32.mrf.mxu3  ;;  %v1016_v25 = vadd.f32 %v958_v35, %v6968_v31 }
 0x1b1   : > { %1692 = vmatmul.bf16.gmra.mxu1 %v7109_v56  ;;  %v1247_v39 = vadd.f32 %v1185_v12, %v1013_v13  ;;  %v1531_v56 = vld [vmem:[#allocation2 + $0x182] sm:$0xff]  ;;  %v1429_v13 = vpop.f32.mrf.mxu0  ;;  %v7125_v12 = vpack.c.bf16 %v1064_v24, %v1063_v38  ;;  %v2207_v24 = vld [vmem:[#allocation2 + $0x52] sm:$0xff] }
 0x1b2   : > { %v1738_v38 = vld [vmem:[#allocation2 + $0x48] sm:$0xff] }
 0x1b3   : > { %v1481_v36 = vadd.f32 %v1419_v40, %v1247_v39  ;;  %2325 = vmatmul.bf16.vlgmr.msra.gmra.mxu0 %v2236_v41 }
 0x1b5   : > { %v7122_v63 = vadd.f32 %v1653_v48, %v1481_v36 }
 0x1b6   : > { %v7120_v54 = vpop.f32.mrf.mxu1 }
 0x1b7   : > { %9037 = vst [vmem:[#allocation60_spill] sm:$0xff] %v7120_v54  ;;  %v7129_v54 = vpack.c.bf16 %v1532_v10, %v1531_v56  ;;  %v961_v36 = vpop.f32.mrf.mxu2  ;;  %v2206_v10 = vld [vmem:[#allocation2 + $0x4a] sm:$0xff] }
 0x1b8   : > { %9038 = vst [vmem:[#allocation61_spill] sm:$0xff] %v7122_v63  ;;  %v1187_v19 = vpop.f32.mrf.mxu3  ;;  %v1017_v31 = vadd.f32 %v961_v36, %v6828_v55  ;;  %v1971_v55 = vld [vmem:[#allocation2 + $0x39] sm:$0xff]  ;;  %v2237_v36 = vpack.c.bf16 %v2207_v24, %v2206_v10  ;;  %v2208_v10 = vld [vmem:[#allocation2 + $0x62] sm:$0xff] }
 0x1b9   : > { %v1248_v40 = vadd.f32 %v1187_v19, %v1014_v28  ;;  %1857 = vmatmul.bf16.vlgmr.msra.gmra.mxu2 %v1768_v32  ;;  %v1431_v27 = vpop.f32.mrf.mxu0  ;;  %v1739_v19 = vld [vmem:[#allocation2 + $0x50] sm:$0xff] }
 0x1ba   : > { %v1970_v32 = vld [vmem:[#allocation2 + $0x31] sm:$0xff]  ;;  %v1972_v24 = vld [vmem:[#allocation2 + $0x49] sm:$0xff] }
 0x1bb   : > { %v7127_v39 = vadd.f32 %v1421_v7, %v1248_v40  ;;  %v762_v7 = vadd.f32 %v6848_v26, %v6833_v59  ;;  %v1769_v40 = vpack.c.bf16 %v1739_v19, %v1738_v38  ;;  %v1741_v38 = vld [vmem:[#allocation2 + $0x68] sm:$0xff] }
 0x1bd   : > { %9039 = vst [vmem:[#allocation62_spill] sm:$0xff] %v7127_v39  ;;  %1229 = vmatmul.bf16.gmra.mxu3 %v7125_v12 }
 0x1be   : > { %v1658_v48 = vpop.f32.mrf.mxu1 }
 0x1bf   : > { %v963_v18 = vpop.f32.mrf.mxu2 }
 0x1c0   : > { %v1190_v35 = vpop.f32.mrf.mxu3  ;;  %v1018_v41 = vadd.f32 %v963_v18, %v762_v7  ;;  %v1740_v7 = vld [vmem:[#allocation2 + $0x60] sm:$0xff]  ;;  %v1973_v18 = vld [vmem:[#allocation2 + $0x51] sm:$0xff] }
 0x1c1   : > { %1697 = vmatmul.bf16.gmra.mxu1 %v7129_v54  ;;  %v1249_v22 = vadd.f32 %v1190_v35, %v1015_v50  ;;  %v1434_v50 = vpop.f32.mrf.mxu0  ;;  %v2002_v35 = vpack.c.bf16 %v1971_v55, %v1970_v32  ;;  %v1770_v55 = vpack.c.bf16 %v1741_v38, %v1740_v7  ;;  %v1743_v7 = vld [vmem:[#allocation2 + $0x80] sm:$0xff] }
 0x1c3   : > { %v1483_v28 = vadd.f32 %v1424_v37, %v1249_v22  ;;  %2330 = vmatmul.bf16.gmra.mxu0 %v2237_v36 }
 0x1c5   : > { %v7138_v3 = vadd.f32 %v1658_v48, %v1483_v28 }
 0x1c6   : > { %v7136_v56 = vpop.f32.mrf.mxu1 }
 0x1c7   : > { %9040 = vst [vmem:[#allocation63_spill] sm:$0xff] %v7136_v56  ;;  %v966_v26 = vpop.f32.mrf.mxu2 }
 0x1c8   : > { %9041 = vst [vmem:[#allocation64_spill] sm:$0xff] %v7138_v3  ;;  %v1192_v39 = vpop.f32.mrf.mxu3  ;;  %v1019_v48 = vadd.f32 %v966_v26, %v6854_v9 }
 0x1c9   : > { %v1250_v37 = vadd.f32 %v1192_v39, %v1016_v25  ;;  %1862 = vmatmul.bf16.gmra.mxu2 %v1769_v40  ;;  %v1436_v56 = vpop.f32.mrf.mxu0  ;;  %v2209_v25 = vld [vmem:[#allocation2 + $0x6a] sm:$0xff] }
 0x1ca   : > { %v2238_v40 = vpack.c.bf16 %v2209_v25, %v2208_v10  ;;  %v1975_v25 = vld [vmem:[#allocation2 + $0x69] sm:$0xff] }
 0x1cb   : > { %v7140_v22 = vadd.f32 %v1426_v45, %v1250_v37 }
 0x1cd   : > { %2091 = vmatmul.bf16.vlgmr.msra.gmra.mxu3 %v2002_v35 }
 0x1ce   : > { %v1663_v59 = vpop.f32.mrf.mxu1 }
 0x1cf   : > { %v968_v45 = vpop.f32.mrf.mxu2 }
 0x1d0   : > { %v1195_v28 = vpop.f32.mrf.mxu3  ;;  %v1020_v32 = vadd.f32 %v968_v45, %v6858_v30  ;;  %v1742_v30 = vld [vmem:[#allocation2 + $0x78] sm:$0xff] }
 0x1d1   : > { %v1251_v3 = vadd.f32 %v1195_v28, %v1017_v31  ;;  %v1439_v36 = vpop.f32.mrf.mxu0  ;;  %v2003_v31 = vpack.c.bf16 %v1973_v18, %v1972_v24  ;;  %v1771_v45 = vpack.c.bf16 %v1743_v7, %v1742_v30  ;;  %v1976_v30 = vld [vmem:[#allocation2 + $0x79] sm:$0xff]  ;;  %v1977_v7 = vld [vmem:[#allocation2 + $0x81] sm:$0xff] }
 0x1d3   : > { %v1485_v63 = vadd.f32 %v1429_v13, %v1251_v3  ;;  %2335 = vmatmul.bf16.gmra.mxu0 %v2238_v40 }
 0x1d5   : > { %v7145_v39 = vadd.f32 %v1663_v59, %v1485_v63 }
 0x1d6   : > { %v7143_v19 = vpop.f32.mrf.mxu1 }
 0x1d7   : > { %9042 = vst [vmem:[#allocation65_spill] sm:$0xff] %v7143_v19  ;;  %v971_v35 = vpop.f32.mrf.mxu2 }
 0x1d8   : > { %v1197_v9 = vpop.f32.mrf.mxu3  ;;  %v1021_v63 = vadd.f32 %v971_v35, %v6870_v21  ;;  %v1744_v35 = vld [vmem:[#allocation2 + $0x90] sm:$0xff] }
 0x1d9   : > { %v1252_v37 = vadd.f32 %v1197_v9, %v1018_v41  ;;  %1867 = vmatmul.bf16.gmra.mxu2 %v1770_v55  ;;  %v1441_v26 = vpop.f32.mrf.mxu0  ;;  %v1974_v41 = vld [vmem:[#allocation2 + $0x61] sm:$0xff] }
 0x1da   : > { %v2004_v21 = vpack.c.bf16 %v1975_v25, %v1974_v41 }
 0x1db   : > { %v7148_v13 = vadd.f32 %v1431_v27, %v1252_v37 }
 0x1dd   : > { %2096 = vmatmul.bf16.gmra.mxu3 %v2003_v31 }
 0x1de   : > { %v1668_v3 = vpop.f32.mrf.mxu1 }
 0x1df   : > { %v973_v10 = vpop.f32.mrf.mxu2 }
 0x1e0   : > { %v1200_v59 = vpop.f32.mrf.mxu3  ;;  %v1022_v27 = vadd.f32 %v973_v10, %v6877_v20 }
 0x1e1   : > { %v1253_v28 = vadd.f32 %v1200_v59, %v1019_v48  ;;  %v1444_v55 = vpop.f32.mrf.mxu0  ;;  %v1745_v59 = vld [vmem:[#allocation2 + $0x98] sm:$0xff] }
 0x1e2   : > { %v1772_v10 = vpack.c.bf16 %v1745_v59, %v1744_v35 }
 0x1e3   : > { %v1487_v19 = vadd.f32 %v1434_v50, %v1253_v28  ;;  %2340 = vmatmul.bf16.gmra.mxu0 %v6887_v14 }
 0x1e5   : > { %v7151_v38 = vadd.f32 %v1668_v3, %v1487_v19 }
 0x1e6   : > { %v7154_v24 = vpop.f32.mrf.mxu1 }
 0x1e7   : > { %v976_v50 = vpop.f32.mrf.mxu2 }
 0x1e8   : > { %v1202_v18 = vpop.f32.mrf.mxu3  ;;  %v1023_v48 = vadd.f32 %v976_v50, %v6883_v29 }
 0x1e9   : > { %v1254_v40 = vadd.f32 %v1202_v18, %v1020_v32  ;;  %1872 = vmatmul.bf16.gmra.mxu2 %v1771_v45  ;;  %v1446_v37 = vpop.f32.mrf.mxu0  ;;  %v2005_v45 = vpack.c.bf16 %v1977_v7, %v1976_v30 }
 0x1eb   : > { %v7156_v9 = vadd.f32 %v1436_v56, %v1254_v40 }
 0x1ed   : > { %2101 = vmatmul.bf16.gmra.mxu3 %v2004_v21 }
 0x1ee   : > { %v1673_v20 = vpop.f32.mrf.mxu1 }
 0x1ef   : > { %v978_v32 = vpop.f32.mrf.mxu2 }
 0x1f0   : > { %v1205_v19 = vpop.f32.mrf.mxu3  ;;  %v1024_v56 = vadd.f32 %v978_v32, %v6889_v4  ;;  %v1746_v4 = vld [vmem:[#allocation2 + $0xa8] sm:$0xff] }
 0x1f1   : > { %v1255_v31 = vadd.f32 %v1205_v19, %v1021_v63  ;;  %v1449_v41 = vpop.f32.mrf.mxu0  ;;  %v1747_v19 = vld [vmem:[#allocation2 + $0xb0] sm:$0xff] }
 0x1f3   : > { %v1489_v3 = vadd.f32 %v1439_v36, %v1255_v31  ;;  %2345 = vmatmul.bf16.gmra.mxu0 %v6910_v62 }
 0x1f5   : > { %v7160_v28 = vadd.f32 %v1673_v20, %v1489_v3  ;;  %v1978_v20 = vld [vmem:[#allocation2 + $0x91] sm:$0xff] }
 0x1f7   : > { %v981_v36 = vpop.f32.mrf.mxu2 }
 0x1f8   : > { %v1207_v14 = vpop.f32.mrf.mxu3  ;;  %v1025_v63 = vadd.f32 %v981_v36, %v6903_v11 }
 0x1f9   : > { %v1256_v25 = vadd.f32 %v1207_v14, %v1022_v27  ;;  %1877 = vmatmul.bf16.gmra.mxu2 %v1772_v10  ;;  %v1451_v40 = vpop.f32.mrf.mxu0  ;;  %v1979_v27 = vld [vmem:[#allocation2 + $0x99] sm:$0xff] }
 0x1fa   : > { %v2006_v32 = vpack.c.bf16 %v1979_v27, %v1978_v20 }
 0x1fb   : > { %v7163_v29 = vadd.f32 %v1441_v26, %v1256_v25  ;;  %v1773_v26 = vpack.c.bf16 %v1747_v19, %v1746_v4  ;;  %v1980_v25 = vld [vmem:[#allocation2 + $0xa9] sm:$0xff] }
 0x1fd   : > { %2106 = vmatmul.bf16.gmra.mxu3 %v2005_v45  ;;  %v1981_v45 = vld [vmem:[#allocation2 + $0xb1] sm:$0xff] }
 0x1ff   : > { %v983_v31 = vpop.f32.mrf.mxu2 }
 0x200   : > { %v1210_v18 = vpop.f32.mrf.mxu3  ;;  %v1026_v3 = vadd.f32 %v983_v31, %v6912_v61 }
 0x201   : > { %v1257_v21 = vadd.f32 %v1210_v18, %v1023_v48  ;;  %v1454_v59 = vpop.f32.mrf.mxu0 }
 0x203   : > { %v7167_v50 = vadd.f32 %v1444_v55, %v1257_v21  ;;  %2350 = vmatmul.bf16.gmra.mxu0 %v6926_v6  ;;  %v2007_v21 = vpack.c.bf16 %v1981_v45, %v1980_v25  ;;  %v9048_v45 = vld [vmem:[#allocation39_spill] sm:$0xff] }
 0x207   : > { %v986_v11 = vpop.f32.mrf.mxu2 }
 0x208   : > { %v1212_v35 = vpop.f32.mrf.mxu3  ;;  %v1027_v55 = vadd.f32 %v986_v11, %v6920_v47 }
 0x209   : > { %v1258_v62 = vadd.f32 %v1212_v35, %v1024_v56  ;;  %1882 = vmatmul.bf16.gmra.mxu2 %v1773_v26  ;;  %v1456_v7 = vpop.f32.mrf.mxu0 }
 0x20b   : > { %v7170_v30 = vadd.f32 %v1446_v37, %v1258_v62 }
 0x20d   : > { %2111 = vmatmul.bf16.gmra.mxu3 %v2006_v32 }
 0x20f   : > { %v988_v61 = vpop.f32.mrf.mxu2 }
 0x210   : > { %v1215_v48 = vpop.f32.mrf.mxu3  ;;  %v1028_v56 = vadd.f32 %v988_v61, %v6928_v42 }
 0x211   : > { %v1259_v10 = vadd.f32 %v1215_v48, %v1025_v63  ;;  %v1459_v18 = vpop.f32.mrf.mxu0 }
 0x213   : > { %v7174_v14 = vadd.f32 %v1449_v41, %v1259_v10  ;;  %2355 = vmatmul.bf16.gmra.mxu0 %v6951_v52 }
 0x218   : > { %v1217_v36 = vpop.f32.mrf.mxu3 }
 0x219   : > { %v1260_v37 = vadd.f32 %v1217_v36, %v1026_v3  ;;  %1887 = vmatmul.bf16.gmra.mxu2 %v6955_v60  ;;  %v1461_v4 = vpop.f32.mrf.mxu0 }
 0x21b   : > { %v7178_v6 = vadd.f32 %v1451_v40, %v1260_v37 }
 0x21c   : > { %v991_v47 = vpop.f32.mrf.mxu2 }
 0x21d   : > { %2116 = vmatmul.bf16.gmra.mxu3 %v2007_v21  ;;  %v1029_v41 = vadd.f32 %v991_v47, %v6942_v5 }
 0x220   : > { %v1220_v63 = vpop.f32.mrf.mxu3 }
 0x221   : > { %v1261_v19 = vadd.f32 %v1220_v63, %v1027_v55  ;;  %v1464_v3 = vpop.f32.mrf.mxu0 }
 0x223   : > { %v7182_v31 = vadd.f32 %v1454_v59, %v1261_v19  ;;  %2360 = vmatmul.bf16.gmra.mxu0 %v6972_v53  ;;  %v9046_v53 = vld [vmem:[#allocation37_spill] sm:$0xff] }
 0x224   : > { %v993_v42 = vpop.f32.mrf.mxu2 }
 0x225   : > { %v1030_v20 = vadd.f32 %v993_v42, %v6953_v2  ;;  %v9052_v42 = vld [vmem:[#allocation41_spill] sm:$0xff] }
 0x228   : > { %v1222_v27 = vpop.f32.mrf.mxu3 }
 0x229   : > { %v1262_v26 = vadd.f32 %v1222_v27, %v1028_v56  ;;  %1892 = vmatmul.bf16.gmra.mxu2 %v6976_v58  ;;  %v1466_v35 = vpop.f32.mrf.mxu0 }
 0x22b   : > { %v7186_v60 = vadd.f32 %v1456_v7, %v1262_v26 }
 0x22c   : > { %v996_v5 = vpop.f32.mrf.mxu2 }
 0x22d   : > { %9043 = vst [vmem:[#allocation66_spill] sm:$0xff] %v7186_v60  ;;  %2121 = vmatmul.bf16.gmra.mxu3 %v6924_v43  ;;  %v1031_v52 = vadd.f32 %v996_v5, %v6964_v49  ;;  %v9055_v5 = vld [vmem:[#allocation38_spill] sm:$0xff] }
 0x230   : > { %v1225_v40 = vpop.f32.mrf.mxu3 }
 0x231   : > { %v1263_v59 = vadd.f32 %v1225_v40, %v1029_v41  ;;  %v2326_v55 = vpop.f32.mrf.mxu0 }
 0x233   : > { %v7191_v62 = vadd.f32 %v1459_v18, %v1263_v59  ;;  %2365 = vmatmul.bf16.gmra.mxu0 %v6997_v8 }
 0x234   : > { %v998_v2 = vpop.f32.mrf.mxu2 }
 0x235   : > { %9044 = vst [vmem:[#allocation67_spill] sm:$0xff] %v7191_v62  ;;  %v1032_v32 = vadd.f32 %v998_v2, %v6974_v33 }
 0x238   : > { %v1227_v11 = vpop.f32.mrf.mxu3 }
 0x239   : > { %v1264_v58 = vadd.f32 %v1227_v11, %v1030_v20  ;;  %1897 = vmatmul.bf16.gmra.mxu2 %v6999_v0  ;;  %v2328_v10 = vpop.f32.mrf.mxu0 }
 0x23b   : > { %v7195_v48 = vadd.f32 %v1461_v4, %v1264_v58 }
 0x23c   : > { %v1858_v43 = vpop.f32.mrf.mxu2 }
 0x23d   : > { %9045 = vst [vmem:[#allocation68_spill] sm:$0xff] %v7195_v48  ;;  %2126 = vmatmul.bf16.gmra.mxu3 %v6949_v57  ;;  %v1938_v49 = vadd.f32 %v1858_v43, %v9046_v53  ;;  %v9050_v57 = vld [vmem:[#allocation36_spill] sm:$0xff] }
 0x240   : > { %v1230_v7 = vpop.f32.mrf.mxu3 }
 0x241   : > { %v1265_v61 = vadd.f32 %v1230_v7, %v1031_v52  ;;  %v2331_v18 = vpop.f32.mrf.mxu0  ;;  %v9056_v52 = vld [vmem:[#allocation42_spill] sm:$0xff]  ;;  %v9060_v7 = vld [vmem:[#allocation40_spill] sm:$0xff] }
 0x243   : > { %v7200_v25 = vadd.f32 %v1464_v3, %v1265_v61  ;;  %2370 = vmatmul.bf16.gmra.mxu0 %v7013_v51  ;;  %v9054_v51 = vld [vmem:[#allocation44_spill] sm:$0xff] }
 0x244   : > { %v1860_v33 = vpop.f32.mrf.mxu2 }
 0x245   : > { %9047 = vst [vmem:[#allocation37_spill] sm:$0xff] %v7200_v25  ;;  %v1939_v56 = vadd.f32 %v1860_v33, %v9048_v45  ;;  %v9077_v25 = vld [vmem:[#allocation50_spill] sm:$0xff] }
 0x248   : > { %v1232_v36 = vpop.f32.mrf.mxu3 }
 0x249   : > { %v1266_v0 = vadd.f32 %v1232_v36, %v1032_v32  ;;  %1902 = vmatmul.bf16.gmra.mxu2 %v7015_v1  ;;  %v2333_v41 = vpop.f32.mrf.mxu0 }
 0x24b   : > { %v7204_v37 = vadd.f32 %v1466_v35, %v1266_v0  ;;  %v9061_v0 = vld [vmem:[#allocation47_spill] sm:$0xff] }
 0x24c   : > { %v1863_v8 = vpop.f32.mrf.mxu2 }
 0x24d   : > { %9049 = vst [vmem:[#allocation39_spill] sm:$0xff] %v7204_v37  ;;  %2131 = vmatmul.bf16.gmra.mxu3 %v9050_v57  ;;  %v1940_v21 = vadd.f32 %v1863_v8, %v7008_v34 }
 0x250   : > { %v2092_v47 = vpop.f32.mrf.mxu3 }
 0x251   : > { %v2172_v63 = vadd.f32 %v2092_v47, %v1938_v49  ;;  %v2336_v3 = vpop.f32.mrf.mxu0 }
 0x253   : > { %v7209_v4 = vadd.f32 %v2326_v55, %v2172_v63  ;;  %2375 = vmatmul.bf16.gmra.mxu0 %v9054_v51  ;;  %v9058_v55 = vld [vmem:[#allocation45_spill] sm:$0xff] }
 0x254   : > { %v1865_v19 = vpop.f32.mrf.mxu2 }
 0x255   : > { %9051 = vst [vmem:[#allocation36_spill] sm:$0xff] %v7209_v4  ;;  %v1941_v20 = vadd.f32 %v1865_v19, %v9052_v42 }
 0x258   : > { %v2094_v27 = vpop.f32.mrf.mxu3 }
 0x259   : > { %v2173_v1 = vadd.f32 %v2094_v27, %v1939_v56  ;;  %1907 = vmatmul.bf16.gmra.mxu2 %v7040_v16  ;;  %v2338_v59 = vpop.f32.mrf.mxu0 }
 0x25b   : > { %v7213_v26 = vadd.f32 %v2328_v10, %v2173_v1 }
 0x25c   : > { %v1868_v34 = vpop.f32.mrf.mxu2 }
 0x25d   : > { %9053 = vst [vmem:[#allocation41_spill] sm:$0xff] %v7213_v26  ;;  %2136 = vmatmul.bf16.gmra.mxu3 %v9055_v5  ;;  %v1942_v40 = vadd.f32 %v1868_v34, %v9056_v52  ;;  %v9064_v5 = vld [vmem:[#allocation58_spill] sm:$0xff] }
 0x25e   : > { %v9066_v52 = vld [vmem:[#allocation46_spill] sm:$0xff] }
 0x260   : > { %v2097_v35 = vpop.f32.mrf.mxu3 }
 0x261   : > { %v2174_v2 = vadd.f32 %v2097_v35, %v1940_v21  ;;  %v2341_v53 = vpop.f32.mrf.mxu0  ;;  %v9067_v35 = vld [vmem:[#allocation55_spill] sm:$0xff] }
 0x263   : > { %v7218_v32 = vadd.f32 %v2331_v18, %v2174_v2  ;;  %2380 = vmatmul.bf16.gmra.mxu0 %v7054_v15  ;;  %v9062_v15 = vld [vmem:[#allocation43_spill] sm:$0xff] }
 0x264   : > { %v1870_v11 = vpop.f32.mrf.mxu2 }
 0x265   : > { %9057 = vst [vmem:[#allocation44_spill] sm:$0xff] %v7218_v32  ;;  %v1943_v58 = vadd.f32 %v1870_v11, %v9058_v55 }
 0x268   : > { %v2099_v43 = vpop.f32.mrf.mxu3 }
 0x269   : > { %v2175_v16 = vadd.f32 %v2099_v43, %v1941_v20  ;;  %1912 = vmatmul.bf16.gmra.mxu2 %v7056_v23  ;;  %v2343_v45 = vpop.f32.mrf.mxu0 }
 0x26b   : > { %v7222_v49 = vadd.f32 %v2333_v41, %v2175_v16  ;;  %v9063_v41 = vld [vmem:[#allocation51_spill] sm:$0xff] }
 0x26c   : > { %v1873_v10 = vpop.f32.mrf.mxu2 }
 0x26d   : > { %9059 = vst [vmem:[#allocation38_spill] sm:$0xff] %v7222_v49  ;;  %2141 = vmatmul.bf16.gmra.mxu3 %v9060_v7  ;;  %v1944_v61 = vadd.f32 %v1873_v10, %v7049_v46  ;;  %v9068_v7 = vld [vmem:[#allocation52_spill] sm:$0xff] }
 0x270   : > { %v2102_v33 = vpop.f32.mrf.mxu3 }
 0x271   : > { %v2176_v56 = vadd.f32 %v2102_v33, %v1942_v40  ;;  %v2346_v21 = vpop.f32.mrf.mxu0 }
 0x273   : > { %v7227_v36 = vadd.f32 %v2336_v3, %v2176_v56  ;;  %2385 = vmatmul.bf16.gmra.mxu0 %v7089_v44  ;;  %v9065_v44 = vld [vmem:[#allocation57_spill] sm:$0xff] }
 0x274   : > { %v1875_v18 = vpop.f32.mrf.mxu2 }
 0x275   : > { %v1945_v57 = vadd.f32 %v1875_v18, %v9061_v0 }
 0x278   : > { %v2104_v8 = vpop.f32.mrf.mxu3 }
 0x279   : > { %v2177_v23 = vadd.f32 %v2104_v8, %v1943_v58  ;;  %1917 = vmatmul.bf16.gmra.mxu2 %v7091_v17  ;;  %v7236_v42 = vpop.f32.mrf.mxu0  ;;  %v2235_v8 = vld [vmem:[#allocation2 + $0x1a2] sm:$0xff] }
 0x27b   : > { %v7231_v47 = vadd.f32 %v2338_v59, %v2177_v23 }
 0x27c   : > { %v1878_v46 = vpop.f32.mrf.mxu2 }
 0x27d   : > { %2146 = vmatmul.bf16.gmra.mxu3 %v9062_v15  ;;  %v1946_v63 = vadd.f32 %v1878_v46, %v9063_v41 }
 0x280   : > { %v2107_v19 = vpop.f32.mrf.mxu3 }
 0x281   : > { %v2178_v20 = vadd.f32 %v2107_v19, %v1944_v61  ;;  %v2351_v51 = vpop.f32.mrf.mxu0  ;;  %v9069_v61 = vld [vmem:[#allocation61_spill] sm:$0xff] }
 0x283   : > { %v7238_v27 = vadd.f32 %v2341_v53, %v2178_v20  ;;  %2390 = vmatmul.bf16.gmra.mxu0 %v9065_v44  ;;  %v9072_v20 = vld [vmem:[#allocation64_spill] sm:$0xff] }
 0x284   : > { %v7240_v3 = vpop.f32.mrf.mxu2 }
 0x288   : > { %v2109_v1 = vpop.f32.mrf.mxu3 }
 0x289   : > { %v2179_v17 = vadd.f32 %v2109_v1, %v1945_v57  ;;  %1922 = vmatmul.bf16.gmra.mxu2 %v9064_v5  ;;  %v7248_v11 = vpop.f32.mrf.mxu0  ;;  %v2234_v57 = vld [vmem:[#allocation2 + $0x19a] sm:$0xff] }
 0x28a   : > { %v2251_v15 = vpack.c.bf16 %v2235_v8, %v2234_v57 }
 0x28b   : > { %v7243_v34 = vadd.f32 %v2343_v45, %v2179_v17 }
 0x28c   : > { %v1883_v40 = vpop.f32.mrf.mxu2 }
 0x28d   : > { %2151 = vmatmul.bf16.gmra.mxu3 %v9066_v52  ;;  %v1948_v59 = vadd.f32 %v1883_v40, %v9067_v35  ;;  %v2000_v40 = vld [vmem:[#allocation2 + $0x199] sm:$0xff]  ;;  %v2001_v35 = vld [vmem:[#allocation2 + $0x1a1] sm:$0xff] }
 0x290   : > { %v2112_v2 = vpop.f32.mrf.mxu3 }
 0x291   : > { %v2180_v55 = vadd.f32 %v2112_v2, %v1946_v63  ;;  %v2356_v16 = vpop.f32.mrf.mxu0  ;;  %v9071_v63 = vld [vmem:[#allocation56_spill] sm:$0xff] }
 0x293   : > { %v7250_v58 = vadd.f32 %v2346_v21, %v2180_v55  ;;  %2395 = vmatmul.bf16.gmra.mxu0 %v7129_v54  ;;  %v6261_v54 = vld [vmem:[#allocation2] sm:$0xff]  ;;  %v2017_v55 = vpack.c.bf16 %v2001_v35, %v2000_v40 }
 0x294   : > { %v7252_v43 = vpop.f32.mrf.mxu2  ;;  %v7269_v23 = vpack.c.bf16 %v6261_v54, %v6261_v54 }
 0x296   : > { %9070 = vst [vmem:[#allocation42_spill] sm:$0xff] %v7269_v23 }
 0x298   : > { %v7254_v53 = vpop.f32.mrf.mxu3 }
 0x299   : > { %1927 = vmatmul.bf16.gmra.mxu2 %v7125_v12  ;;  %v7260_v56 = vpop.f32.mrf.mxu0  ;;  %v6134_v12 = vld [vmem:[%s8923_s4 + $0x78] sm:$0xff] }
 0x29a   : > { %2941 = vmatpush.bf16.msra.mxu1 %v6134_v12 }
 0x29c   : > { %v1888_v10 = vpop.f32.mrf.mxu2 }
 0x29d   : > { %2156 = vmatmul.bf16.gmra.mxu3 %v9068_v7  ;;  %v1950_v33 = vadd.f32 %v1888_v10, %v9069_v61 }
 0x2a0   : > { %v2117_v45 = vpop.f32.mrf.mxu3 }
 0x2a1   : > { %v2182_v18 = vadd.f32 %v2117_v45, %v1948_v59  ;;  %v2361_v41 = vpop.f32.mrf.mxu0 }
 0x2a3   : > { %v7262_v0 = vadd.f32 %v2351_v51, %v2182_v18  ;;  %2400 = vmatmul.bf16.gmra.mxu0 %v2251_v15 }
 0x2a4   : > { %v7264_v21 = vpop.f32.mrf.mxu2 }
 0x2a8   : > { %v7271_v46 = vpop.f32.mrf.mxu3 }
 0x2a9   : > { %1932 = vmatmul.bf16.gmra.mxu2 %v7269_v23  ;;  %v7276_v17 = vpop.f32.mrf.mxu0  ;;  %v2438_v23 = vadd.f32 %v7213_v26, %v7209_v4 }
 0x2ab   : > { %v2439_v62 = vadd.f32 %v2438_v23, %v7218_v32  ;;  %v9081_v23 = vld [vmem:[#allocation60_spill] sm:$0xff] }
 0x2ac   : > { %v1893_v19 = vpop.f32.mrf.mxu2 }
 0x2ad   : > { %2161 = vmatmul.bf16.gmra.mxu3 %v9071_v63  ;;  %v1952_v1 = vadd.f32 %v1893_v19, %v9072_v20  ;;  %v2440_v60 = vadd.f32 %v2439_v62, %v7222_v49 }
 0x2b0   : > { %v2122_v51 = vpop.f32.mrf.mxu3 }
 0x2b1   : > { %v2184_v5 = vadd.f32 %v2122_v51, %v1950_v33  ;;  %v2366_v2 = vpop.f32.mrf.mxu0  ;;  %v6133_v33 = vld [vmem:[%s8923_s4 + $0x70] sm:$0xff]  ;;  %v7305_v51 = vpop.f32.mrf.mxu1 }
 0x2b2   : > { %2942 = vmatpush.bf16.msra.mxu1 %v6133_v33 }
 0x2b3   : > { %v7278_v44 = vadd.f32 %v2356_v16, %v2184_v5 }
 0x2b4   : > { %v7280_v52 = vpop.f32.mrf.mxu2 }
 0x2b8   : > { %v7282_v59 = vpop.f32.mrf.mxu3 }
 0x2b9   : > { %v7285_v45 = vpop.f32.mrf.mxu0 }
 0x2bc   : > { %v1898_v7 = vpop.f32.mrf.mxu2 }
 0x2bd   : > { %2166 = vmatmul.bf16.gmra.mxu3 %v2017_v55  ;;  %v1954_v10 = vadd.f32 %v1898_v7, %v7145_v39 }
 0x2c0   : > { %v2127_v61 = vpop.f32.mrf.mxu3 }
 0x2c1   : > { %v2186_v18 = vadd.f32 %v2127_v61, %v1952_v1  ;;  %v2371_v12 = vpop.f32.mrf.mxu0 }
 0x2c3   : > { %v7287_v57 = vadd.f32 %v2361_v41, %v2186_v18 }
 0x2c4   : > { %v7289_v16 = vpop.f32.mrf.mxu2 }
 0x2c8   : > { %v7294_v8 = vpop.f32.mrf.mxu3 }
 0x2c9   : > { %v7297_v19 = vpop.f32.mrf.mxu0 }
 0x2cc   : > { %v1903_v54 = vpop.f32.mrf.mxu2 }
 0x2cd   : > { %v1956_v15 = vadd.f32 %v1903_v54, %v7151_v38  ;;  %v7310_v38 = vpop.f32.mrf.mxu1 }
 0x2d0   : > { %v2132_v39 = vpop.f32.mrf.mxu3 }
 0x2d1   : > { %v2188_v63 = vadd.f32 %v2132_v39, %v1954_v10  ;;  %v2376_v5 = vpop.f32.mrf.mxu0 }
 0x2d3   : > { %v7299_v20 = vadd.f32 %v2366_v2, %v2188_v63  ;;  %v6132_v2 = vld [vmem:[%s8923_s4 + $0x68] sm:$0xff] }
 0x2d4   : > { %v7301_v41 = vpop.f32.mrf.mxu2  ;;  %2943 = vmatpush.bf16.msra.mxu1 %v6132_v2  ;;  %v9076_v2 = vld [vmem:[#allocation53_spill] sm:$0xff] }
 0x2d5   : > { %v1680_v39 = vpop.f32.mrf.mxu1  ;;  %v1712_v48 = vadd.f32 %v9077_v25, %v9076_v2  ;;  %v9080_v2 = vld [vmem:[#allocation62_spill] sm:$0xff] }
 0x2d6   : > { %v1716_v32 = vadd.f32 %v9081_v23, %v9080_v2 }
 0x2d8   : > { %v7303_v1 = vpop.f32.mrf.mxu3 }
 0x2d9   : > { %v7317_v18 = vpop.f32.mrf.mxu0 }
 0x2da   : > { %9073 = vst [vmem:[#allocation45_spill] sm:$0xff] %v7317_v18 }
 0x2dc   : > { %v1908_v40 = vpop.f32.mrf.mxu2 }
 0x2dd   : > { %v1958_v35 = vadd.f32 %v1908_v40, %v7160_v28 }
 0x2e0   : > { %v2137_v55 = vpop.f32.mrf.mxu3 }
 0x2e1   : > { %v2190_v7 = vadd.f32 %v2137_v55, %v1956_v15  ;;  %v7321_v63 = vpop.f32.mrf.mxu0 }
 0x2e2   : > { %9074 = vst [vmem:[#allocation40_spill] sm:$0xff] %v7321_v63 }
 0x2e3   : > { %v7308_v61 = vadd.f32 %v2371_v12, %v2190_v7  ;;  %v1683_v7 = vpop.f32.mrf.mxu1 }
 0x2e4   : > { %v7312_v10 = vpop.f32.mrf.mxu2 }
 0x2e8   : > { %v2139_v33 = vpop.f32.mrf.mxu3 }
 0x2e9   : > { %v7331_v37 = vpop.f32.mrf.mxu0 }
 0x2eb   : > { %v1685_v62 = vpop.f32.mrf.mxu1 }
 0x2ec   : > { %v7319_v54 = vpop.f32.mrf.mxu2 }
 0x2f0   : > { %v2142_v28 = vpop.f32.mrf.mxu3 }
 0x2f1   : > { %v2192_v12 = vadd.f32 %v2142_v28, %v1958_v35  ;;  %v9078_v28 = vld [vmem:[#allocation59_spill] sm:$0xff] }
 0x2f3   : > { %v7323_v15 = vadd.f32 %v2376_v5, %v2192_v12  ;;  %v1947_v5 = vadd.f32 %v7240_v3, %v1712_v48  ;;  %v9079_v12 = vld [vmem:[#allocation54_spill] sm:$0xff]  ;;  %v7349_v3 = vpop.f32.mrf.mxu0  ;;  %v1688_v23 = vpop.f32.mrf.mxu1 }
 0x2f4   : > { %v7325_v40 = vpop.f32.mrf.mxu2  ;;  %v1714_v63 = vadd.f32 %v9079_v12, %v9078_v28 }
 0x2f5   : > { %9075 = vst [vmem:[#allocation47_spill] sm:$0xff] %v7323_v15  ;;  %v2441_v15 = vadd.f32 %v2440_v60, %v7227_v36  ;;  %v2181_v4 = vadd.f32 %v7254_v53, %v1947_v5 }
 0x2f6   : > { %v1949_v25 = vadd.f32 %v7252_v43, %v1714_v63  ;;  %v6131_v43 = vld [vmem:[%s8923_s4 + $0x60] sm:$0xff]  ;;  %v9082_v63 = vld [vmem:[#allocation63_spill] sm:$0xff] }
 0x2f7   : > { %v2442_v26 = vadd.f32 %v2441_v15, %v7231_v47  ;;  %v7353_v28 = vadd.f32 %v7236_v42, %v2181_v4  ;;  %v1951_v15 = vadd.f32 %v7264_v21, %v1716_v32  ;;  %v1718_v5 = vadd.f32 %v9082_v63, %v7140_v22  ;;  %2944 = vmatpush.bf16.msra.mxu1 %v6131_v43  ;;  %v9083_v21 = vld [vmem:[#allocation65_spill] sm:$0xff] }
 0x2f8   : > { %v7327_v55 = vpop.f32.mrf.mxu3  ;;  %v2183_v60 = vadd.f32 %v7271_v46, %v1949_v25  ;;  %v1720_v46 = vadd.f32 %v9083_v21, %v7148_v13 }
 0x2f9   : > { %v2443_v48 = vadd.f32 %v2442_v26, %v7238_v27  ;;  %v2185_v42 = vadd.f32 %v7282_v59, %v1951_v15  ;;  %v1953_v32 = vadd.f32 %v7280_v52, %v1718_v5  ;;  %v1722_v59 = vadd.f32 %v7154_v24, %v7156_v9 }
 0x2fa   : > { %v7365_v4 = vadd.f32 %v7248_v11, %v2183_v60  ;;  %v1955_v11 = vadd.f32 %v7289_v16, %v1720_v46  ;;  %v1724_v16 = vadd.f32 %v7305_v51, %v7163_v29  ;;  %v1725_v24 = vadd.f32 %v7310_v38, %v7167_v50 }
 0x2fb   : > { %v2444_v49 = vadd.f32 %v2443_v48, %v7243_v34  ;;  %v2187_v48 = vadd.f32 %v7294_v8, %v1953_v32  ;;  %v2388_v60 = vpop.f32.mrf.mxu0  ;;  %v1957_v5 = vadd.f32 %v7301_v41, %v1722_v59  ;;  %v1727_v51 = vadd.f32 %v1683_v7, %v7174_v14 }
 0x2fc   : > { %v7338_v35 = vpop.f32.mrf.mxu2  ;;  %v1960_v29 = vadd.f32 %v7319_v54, %v1725_v24  ;;  %v1729_v14 = vadd.f32 %v1688_v23, %v7182_v31 }
 0x2fd   : > { %v2445_v26 = vadd.f32 %v2444_v49, %v7250_v58  ;;  %v7374_v49 = vadd.f32 %v7260_v56, %v2185_v42  ;;  %v7383_v63 = vadd.f32 %v7276_v17, %v2187_v48  ;;  %v2189_v56 = vadd.f32 %v7303_v1, %v1955_v11  ;;  %v1690_v42 = vpop.f32.mrf.mxu1 }
 0x2fe   : > { %v1959_v17 = vadd.f32 %v7312_v10, %v1724_v16  ;;  %v1726_v1 = vadd.f32 %v1680_v39, %v7170_v30  ;;  %v1728_v30 = vadd.f32 %v1685_v62, %v7178_v6  ;;  %v1962_v54 = vadd.f32 %v7338_v35, %v1727_v51 }
 0x2ff   : > { %v2446_v2 = vadd.f32 %v2445_v26, %v7353_v28  ;;  %v7394_v26 = vadd.f32 %v7285_v45, %v2189_v56  ;;  %v9087_v56 = vld [vmem:[#allocation66_spill] sm:$0xff] }
 0x300   : > { %v2147_v18 = vpop.f32.mrf.mxu3  ;;  %v2193_v45 = vadd.f32 %v7327_v55, %v1959_v17  ;;  %v1961_v10 = vadd.f32 %v7325_v40, %v1726_v1  ;;  %v9085_v55 = vld [vmem:[#allocation47_spill] sm:$0xff]  ;;  %v9086_v40 = vld [vmem:[#allocation40_spill] sm:$0xff] }
 0x301   : > { %v2447_v25 = vadd.f32 %v2446_v2, %v7262_v0  ;;  %v2191_v2 = vadd.f32 %v2139_v33, %v1957_v5  ;;  %v2194_v46 = vadd.f32 %v2147_v18, %v1960_v29  ;;  %v1730_v5 = vadd.f32 %v1690_v42, %v9087_v56  ;;  %v9088_v42 = vld [vmem:[#allocation67_spill] sm:$0xff] }
 0x303   : > { %v2448_v22 = vadd.f32 %v2447_v25, %v7365_v4  ;;  %v2391_v21 = vpop.f32.mrf.mxu0  ;;  %v7403_v38 = vadd.f32 %v7297_v19, %v2191_v2  ;;  %v9084_v25 = vld [vmem:[#allocation45_spill] sm:$0xff]  ;;  %v7417_v59 = vadd.f32 %v9086_v40, %v2194_v46 }
 0x304   : > { %v1920_v53 = vpop.f32.mrf.mxu2  ;;  %v9090_v40 = vld [vmem:[#allocation37_spill] sm:$0xff] }
 0x305   : > { %v2449_v52 = vadd.f32 %v2448_v22, %v7278_v44  ;;  %v7413_v22 = vadd.f32 %v9084_v25, %v2193_v45  ;;  %v1963_v48 = vadd.f32 %v1920_v53, %v1728_v30  ;;  %v1693_v18 = vpop.f32.mrf.mxu1 }
 0x307   : > { %v2450_v43 = vadd.f32 %v2449_v52, %v7374_v49 }
 0x308   : > { %v2149_v12 = vpop.f32.mrf.mxu3 }
 0x309   : > { %v2451_v8 = vadd.f32 %v2450_v43, %v7287_v57  ;;  %v2195_v19 = vadd.f32 %v2149_v12, %v1961_v10 }
 0x30b   : > { %v2452_v9 = vadd.f32 %v2451_v8, %v7383_v63  ;;  %v7421_v31 = vadd.f32 %v7331_v37, %v2195_v19  ;;  %v2393_v43 = vpop.f32.mrf.mxu0  ;;  %v6130_v37 = vld [vmem:[%s8923_s4 + $0x58] sm:$0xff] }
 0x30c   : > { %v1923_v13 = vpop.f32.mrf.mxu2  ;;  %2945 = vmatpush.bf16.msra.mxu1 %v6130_v37 }
 0x30d   : > { %v2453_v41 = vadd.f32 %v2452_v9, %v7299_v20  ;;  %v1964_v62 = vadd.f32 %v1923_v13, %v1729_v14  ;;  %v1695_v29 = vpop.f32.mrf.mxu1 }
 0x30f   : > { %v2454_v50 = vadd.f32 %v2453_v41, %v7394_v26  ;;  %v1731_v41 = vadd.f32 %v1693_v18, %v9088_v42 }
 0x310   : > { %v2152_v15 = vpop.f32.mrf.mxu3 }
 0x311   : > { %v2455_v39 = vadd.f32 %v2454_v50, %v7308_v61  ;;  %v2196_v6 = vadd.f32 %v2152_v15, %v1962_v54 }
 0x313   : > { %v2456_v7 = vadd.f32 %v2455_v39, %v7403_v38  ;;  %v7426_v12 = vadd.f32 %v7349_v3, %v2196_v6  ;;  %v9089_v39 = vld [vmem:[#allocation68_spill] sm:$0xff] }
 0x314   : > { %v1925_v33 = vpop.f32.mrf.mxu2  ;;  %v1732_v46 = vadd.f32 %v1695_v29, %v9089_v39 }
 0x315   : > { %v2457_v11 = vadd.f32 %v2456_v7, %v9085_v55  ;;  %v1965_v24 = vadd.f32 %v1925_v33, %v1730_v5 }
 0x317   : > { %v2458_v35 = vadd.f32 %v2457_v11, %v7413_v22 }
 0x318   : > { %v2154_v32 = vpop.f32.mrf.mxu3 }
 0x319   : > { %v2197_v23 = vadd.f32 %v2154_v32, %v1963_v48  ;;  %v2459_v53 = vadd.f32 %v2458_v35, %v7417_v59 }
 0x31b   : > { %v2460_v15 = vadd.f32 %v2459_v53, %v7421_v31  ;;  %v7429_v13 = vadd.f32 %v2388_v60, %v2197_v23  ;;  %v2396_v60 = vpop.f32.mrf.mxu0  ;;  %v9091_v53 = vld [vmem:[#allocation39_spill] sm:$0xff] }
 0x31c   : > { %v1928_v8 = vpop.f32.mrf.mxu2 }
 0x31d   : > { %v2461_v9 = vadd.f32 %v2460_v15, %v7426_v12  ;;  %v1966_v45 = vadd.f32 %v1928_v8, %v1731_v41  ;;  %v6329_v15 = vmov 256.0  }
 0x31e   : > { %6255 = vrcp.f32 %v6329_v15 }
 0x31f   : > { %v2462_v1 = vadd.f32 %v2461_v9, %v7429_v13 }
 0x320   : > { %v2157_v52 = vpop.f32.mrf.mxu3 }
 0x321   : > { %v2198_v16 = vadd.f32 %v2157_v52, %v1964_v62 }
 0x323   : > { %v2432_v2 = vadd.f32 %v2391_v21, %v2198_v16  ;;  %v1698_v21 = vpop.f32.mrf.mxu1  ;;  %v2398_v25 = vpop.f32.mrf.mxu0 }
 0x324   : > { %v1930_v10 = vpop.f32.mrf.mxu2  ;;  %v1733_v6 = vadd.f32 %v1698_v21, %v9090_v40 }
 0x325   : > { %v2463_v51 = vadd.f32 %v2462_v1, %v2432_v2  ;;  %v1967_v7 = vadd.f32 %v1930_v10, %v1732_v46 }
 0x328   : > { %v2159_v17 = vpop.f32.mrf.mxu3 }
 0x329   : > { %v2199_v3 = vadd.f32 %v2159_v17, %v1965_v24  ;;  %v6256_v17 = vpop.eup %6255 }
 0x32a   : > { %v2476_v41 = vmul.f32 256.0, %v6256_v17  ;;  %vm2480_vm0 = vweird.f32 %v6256_v17 }
 0x32b   : > { %v2433_v32 = vadd.f32 %v2393_v43, %v2199_v3  ;;  %v1700_v35 = vpop.f32.mrf.mxu1  ;;  %v2401_v23 = vpop.f32.mrf.mxu0 }
 0x32c   : > { %v1933_v48 = vpop.f32.mrf.mxu2  ;;  %v1734_v16 = vadd.f32 %v1700_v35, %v9091_v53 }
 0x32d   : > { %v2464_v50 = vadd.f32 %v2463_v51, %v2433_v32  ;;  %v1968_v18 = vadd.f32 %v1933_v48, %v1733_v6  ;;  %v9093_v6 = vld [vmem:[#allocation36_spill] sm:$0xff] }
 0x330   : > { %v2162_v33 = vpop.f32.mrf.mxu3 }
 0x331   : > { %v2200_v30 = vadd.f32 %v2162_v33, %v1966_v45 }
 0x333   : > { %v2434_v54 = vadd.f32 %v2396_v60, %v2200_v30  ;;  %v2403_v3 = vpop.f32.mrf.mxu0  ;;  %v2477_v60 = vsub.f32 1.0, %v2476_v41 }
 0x334   : > { %v1935_v5 = vpop.f32.mrf.mxu2 }
 0x335   : > { %v2465_v14 = vadd.f32 %v2464_v50, %v2434_v54  ;;  %v1969_v37 = vadd.f32 %v1935_v5, %v1734_v16  ;;  %v2478_v10 = vmul.f32 %v6256_v17, %v2477_v60 }
 0x337   : > { %v2479_v39 = vadd.f32 %v6256_v17, %v2478_v10 }
 0x338   : > { %v2164_v19 = vpop.f32.mrf.mxu3 }
 0x339   : > { %v2201_v11 = vadd.f32 %v2164_v19, %v1967_v7  ;;  %v7440_v21 = vsel %vm2480_vm0, %v6256_v17, %v2479_v39 }
 0x33a   : > { %9092 = vst [vmem:[#allocation43_spill] sm:$0xff] %v7440_v21 }
 0x33b   : > { %v2435_v62 = vadd.f32 %v2398_v25, %v2201_v11 }
 0x33d   : > { %v2466_v52 = vadd.f32 %v2465_v14, %v2435_v62 }
 0x340   : > { %v2167_v43 = vpop.f32.mrf.mxu3 }
 0x341   : > { %v2202_v56 = vadd.f32 %v2167_v43, %v1968_v18 }
 0x343   : > { %v2436_v8 = vadd.f32 %v2401_v23, %v2202_v56  ;;  %v9096_v23 = vld [vmem:[#allocation38_spill] sm:$0xff] }
 0x345   : > { %v2467_v24 = vadd.f32 %v2466_v52, %v2436_v8 }
 0x348   : > { %v2169_v9 = vpop.f32.mrf.mxu3 }
 0x349   : > { %v2203_v1 = vadd.f32 %v2169_v9, %v1969_v37 }
 0x34b   : > { %v2437_v42 = vadd.f32 %v2403_v3, %v2203_v1 }
 0x34d   : > { %v2468_v29 = vadd.f32 %v2467_v24, %v2437_v42 }
 0x34f   : > { %v2469_v51 = vrot.slane %v2468_v29, 4 }
 0x351   : > { %v2470_v50 = vadd.f32 %v2469_v51, %v2468_v29 }
 0x353   : > { %v2471_v45 = vrot.slane %v2470_v50, 2 }
 0x355   : > { %v2472_v33 = vadd.f32 %v2471_v45, %v2470_v50 }
 0x357   : > { %v2473_v30 = vrot.slane %v2472_v33, 1 }
 0x359   : > { %v2474_v46 = vadd.f32 %v2473_v30, %v2472_v33 }
 0x35b   : > { %v7443_v14 = vmul.f32 %v7440_v21, %v2474_v46 }
 0x35d   : > { %v7446_v7 = vsub.f32 %v2432_v2, %v7443_v14  ;;  %v7449_v25 = vsub.f32 %v2433_v32, %v7443_v14  ;;  %v7452_v19 = vsub.f32 %v2434_v54, %v7443_v14  ;;  %v7455_v48 = vsub.f32 %v2435_v62, %v7443_v14  ;;  %v9094_v2 = vld [vmem:[#allocation41_spill] sm:$0xff]  ;;  %v9095_v54 = vld [vmem:[#allocation44_spill] sm:$0xff] }
 0x35e   : > { %v7458_v11 = vsub.f32 %v2436_v8, %v7443_v14  ;;  %v7461_v40 = vsub.f32 %v2437_v42, %v7443_v14  ;;  %v7465_v52 = vsub.f32 %v9093_v6, %v7443_v14  ;;  %v7469_v32 = vsub.f32 %v9094_v2, %v7443_v14 }
 0x35f   : > { %v7473_v18 = vsub.f32 %v9095_v54, %v7443_v14  ;;  %v7481_v43 = vsub.f32 %v9096_v23, %v7443_v14  ;;  %v7485_v56 = vsub.f32 %v7227_v36, %v7443_v14  ;;  %v7491_v16 = vsub.f32 %v7231_v47, %v7443_v14 }
 0x360   : > { %v2515_v62 = vmul.f32 %v7465_v52, %v7465_v52  ;;  %v2516_v35 = vmul.f32 %v7469_v32, %v7469_v32  ;;  %v7497_v24 = vsub.f32 %v7238_v27, %v7443_v14  ;;  %v7503_v9 = vsub.f32 %v7243_v34, %v7443_v14 }
 0x361   : > { %v2517_v5 = vmul.f32 %v7473_v18, %v7473_v18  ;;  %v2518_v8 = vmul.f32 %v7481_v43, %v7481_v43  ;;  %v2519_v36 = vmul.f32 %v7485_v56, %v7485_v56  ;;  %v2520_v47 = vmul.f32 %v7491_v16, %v7491_v16 }
 0x362   : > { %v2547_v53 = vadd.f32 %v2516_v35, %v2515_v62  ;;  %v7509_v1 = vsub.f32 %v7250_v58, %v7443_v14  ;;  %v2521_v27 = vmul.f32 %v7497_v24, %v7497_v24  ;;  %v7515_v42 = vsub.f32 %v7353_v28, %v7443_v14 }
 0x363   : > { %v2522_v34 = vmul.f32 %v7503_v9, %v7503_v9  ;;  %v7521_v29 = vsub.f32 %v7262_v0, %v7443_v14  ;;  %v7527_v60 = vsub.f32 %v7365_v4, %v7443_v14  ;;  %v7533_v45 = vsub.f32 %v7278_v44, %v7443_v14 }
 0x364   : > { %v2548_v15 = vadd.f32 %v2547_v53, %v2517_v5  ;;  %v2523_v58 = vmul.f32 %v7509_v1, %v7509_v1  ;;  %v2524_v28 = vmul.f32 %v7515_v42, %v7515_v42  ;;  %v7539_v33 = vsub.f32 %v7374_v49, %v7443_v14 }
 0x365   : > { %v2525_v0 = vmul.f32 %v7521_v29, %v7521_v29  ;;  %v2526_v4 = vmul.f32 %v7527_v60, %v7527_v60  ;;  %v7545_v39 = vsub.f32 %v7287_v57, %v7443_v14  ;;  %v2527_v44 = vmul.f32 %v7533_v45, %v7533_v45 }
 0x366   : > { %v2549_v37 = vadd.f32 %v2548_v15, %v2518_v8  ;;  %v7551_v6 = vsub.f32 %v7383_v63, %v7443_v14  ;;  %v2528_v49 = vmul.f32 %v7539_v33, %v7539_v33  ;;  %v7557_v54 = vsub.f32 %v7299_v20, %v7443_v14 }
 0x367   : > { %v2529_v57 = vmul.f32 %v7545_v39, %v7545_v39  ;;  %v7563_v35 = vsub.f32 %v7394_v26, %v7443_v14  ;;  %v7569_v5 = vsub.f32 %v7308_v61, %v7443_v14  ;;  %v7575_v8 = vsub.f32 %v7403_v38, %v7443_v14 }
 0x368   : > { %v2550_v17 = vadd.f32 %v2549_v37, %v2519_v36  ;;  %v2530_v63 = vmul.f32 %v7551_v6, %v7551_v6  ;;  %v2531_v20 = vmul.f32 %v7557_v54, %v7557_v54  ;;  %v7581_v36 = vsub.f32 %v9085_v55, %v7443_v14 }
 0x369   : > { %v2532_v26 = vmul.f32 %v7563_v35, %v7563_v35  ;;  %v2533_v61 = vmul.f32 %v7569_v5, %v7569_v5  ;;  %v2534_v38 = vmul.f32 %v7575_v8, %v7575_v8 }
 0x36a   : > { %v2551_v3 = vadd.f32 %v2550_v17, %v2520_v47  ;;  %v7587_v47 = vsub.f32 %v7413_v22, %v7443_v14  ;;  %v2535_v55 = vmul.f32 %v7581_v36, %v7581_v36 }
 0x36c   : > { %v2552_v41 = vadd.f32 %v2551_v3, %v2521_v27  ;;  %v7593_v27 = vsub.f32 %v7417_v59, %v7443_v14  ;;  %v2536_v22 = vmul.f32 %v7587_v47, %v7587_v47 }
 0x36e   : > { %v2553_v51 = vadd.f32 %v2552_v41, %v2522_v34  ;;  %v7599_v34 = vsub.f32 %v7421_v31, %v7443_v14  ;;  %v2537_v59 = vmul.f32 %v7593_v27, %v7593_v27 }
 0x370   : > { %v2554_v50 = vadd.f32 %v2553_v51, %v2523_v58  ;;  %v7605_v58 = vsub.f32 %v7426_v12, %v7443_v14  ;;  %v2538_v31 = vmul.f32 %v7599_v34, %v7599_v34 }
 0x372   : > { %v2555_v10 = vadd.f32 %v2554_v50, %v2524_v28  ;;  %v7611_v28 = vsub.f32 %v7429_v13, %v7443_v14  ;;  %v2542_v13 = vmul.f32 %v7449_v25, %v7449_v25 }
 0x374   : > { %v2556_v30 = vadd.f32 %v2555_v10, %v2525_v0  ;;  %v2539_v0 = vmul.f32 %v7605_v58, %v7605_v58  ;;  %v2540_v12 = vmul.f32 %v7611_v28, %v7611_v28 }
 0x376   : > { %v2557_v46 = vadd.f32 %v2556_v30, %v2526_v4  ;;  %v2541_v30 = vmul.f32 %v7446_v7, %v7446_v7 }
 0x378   : > { %v2558_v2 = vadd.f32 %v2557_v46, %v2527_v44  ;;  %v2543_v46 = vmul.f32 %v7452_v19, %v7452_v19 }
 0x37a   : > { %v2559_v62 = vadd.f32 %v2558_v2, %v2528_v49  ;;  %v2544_v2 = vmul.f32 %v7455_v48, %v7455_v48 }
 0x37c   : > { %v2560_v23 = vadd.f32 %v2559_v62, %v2529_v57  ;;  %v2545_v62 = vmul.f32 %v7458_v11, %v7458_v11 }
 0x37e   : > { %v2561_v53 = vadd.f32 %v2560_v23, %v2530_v63  ;;  %v2546_v23 = vmul.f32 %v7461_v40, %v7461_v40 }
 0x380   : > { %v2562_v15 = vadd.f32 %v2561_v53, %v2531_v20  ;;  %v6126_v53 = vld [vmem:[%s8923_s4 + $0x38] sm:$0xff] }
 0x381   : > { %3078 = vmatpush.bf16.msrb.mxu2 %v6126_v53 }
 0x382   : > { %v2563_v37 = vadd.f32 %v2562_v15, %v2532_v26  ;;  %v6142_v15 = vld [vmem:[%s8923_s4 + $0xb8] sm:$0xff] }
 0x383   : > { %3280 = vmatpush.bf16.msrb.mxu3 %v6142_v15  ;;  %v3168_v15 = vld [vmem:[#allocation2 + $0xa] sm:$0xff] }
 0x384   : > { %v2564_v17 = vadd.f32 %v2563_v37, %v2533_v61  ;;  %v6129_v37 = vld [vmem:[%s8923_s4 + $0x50] sm:$0xff] }
 0x385   : > { %2946 = vmatpush.bf16.msra.mxu1 %v6129_v37 }
 0x386   : > { %v2565_v3 = vadd.f32 %v2564_v17, %v2534_v38  ;;  %v6125_v38 = vld [vmem:[%s8923_s4 + $0x30] sm:$0xff] }
 0x387   : > { %3079 = vmatpush.bf16.msrb.mxu2 %v6125_v38 }
 0x388   : > { %v2566_v41 = vadd.f32 %v2565_v3, %v2535_v55  ;;  %v6141_v55 = vld [vmem:[%s8923_s4 + $0xb0] sm:$0xff] }
 0x389   : > { %3281 = vmatpush.bf16.msrb.mxu3 %v6141_v55  ;;  %v7693_v55 = vld [vmem:[%s8921_s2] ss:$0 sm:$0xff] }
 0x38a   : > { %v2567_v51 = vadd.f32 %v2566_v41, %v2536_v22  ;;  %v6124_v22 = vld [vmem:[%s8923_s4 + $0x28] sm:$0xff] }
 0x38b   : > { %3080 = vmatpush.bf16.msrb.mxu2 %v6124_v22  ;;  %v7700_v22 = vld [vmem:[%s8922_s3] ss:$0 sm:$0xff] }
 0x38c   : > { %v2568_v50 = vadd.f32 %v2567_v51, %v2537_v59  ;;  %v6140_v59 = vld [vmem:[%s8923_s4 + $0xa8] sm:$0xff] }
 0x38d   : > { %3282 = vmatpush.bf16.msrb.mxu3 %v6140_v59  ;;  %v6150_v59 = vld [vmem:[%s8923_s4 + $0xf8] sm:$0xff] }
 0x38e   : > { %v2569_v10 = vadd.f32 %v2568_v50, %v2538_v31  ;;  %v6123_v31 = vld [vmem:[%s8923_s4 + $0x20] sm:$0xff]  ;;  %3514 = vmatpush.bf16.msrb.mxu0 %v6150_v59 }
 0x38f   : > { %3081 = vmatpush.bf16.msrb.mxu2 %v6123_v31 }
 0x390   : > { %v2570_v4 = vadd.f32 %v2569_v10, %v2539_v0  ;;  %v6139_v0 = vld [vmem:[%s8923_s4 + $0xa0] sm:$0xff] }
 0x391   : > { %3283 = vmatpush.bf16.msrb.mxu3 %v6139_v0 }
 0x392   : > { %v2571_v44 = vadd.f32 %v2570_v4, %v2540_v12  ;;  %v6122_v12 = vld [vmem:[%s8923_s4 + $0x18] sm:$0xff] }
 0x393   : > { %3082 = vmatpush.bf16.msrb.mxu2 %v6122_v12 }
 0x394   : > { %v2572_v14 = vadd.f32 %v2571_v44, %v2541_v30  ;;  %v6138_v30 = vld [vmem:[%s8923_s4 + $0x98] sm:$0xff]  ;;  %v6121_v44 = vld [vmem:[%s8923_s4 + $0x10] sm:$0xff] }
 0x395   : > { %3284 = vmatpush.bf16.msrb.mxu3 %v6138_v30 }
 0x396   : > { %v2573_v49 = vadd.f32 %v2572_v14, %v2542_v13  ;;  %v6137_v13 = vld [vmem:[%s8923_s4 + $0x90] sm:$0xff]  ;;  %v6120_v14 = vld [vmem:[%s8923_s4 + $0x8] sm:$0xff] }
 0x397   : > { %3083 = vmatpush.bf16.msrb.mxu2 %v6121_v44 }
 0x398   : > { %v2574_v57 = vadd.f32 %v2573_v49, %v2543_v46 }
 0x399   : > { %3285 = vmatpush.bf16.msrb.mxu3 %v6137_v13 }
 0x39a   : > { %v2575_v63 = vadd.f32 %v2574_v57, %v2544_v2  ;;  %v6136_v2 = vld [vmem:[%s8923_s4 + $0x88] sm:$0xff] }
 0x39b   : > { %3084 = vmatpush.bf16.msrb.mxu2 %v6120_v14 }
 0x39c   : > { %v2576_v20 = vadd.f32 %v2575_v63, %v2545_v62  ;;  %v6119_v62 = vld [vmem:[%s8923_s4] sm:$0xff] }
 0x39d   : > { %3286 = vmatpush.bf16.msrb.mxu3 %v6136_v2 }
 0x39e   : > { %v2577_v26 = vadd.f32 %v2576_v20, %v2546_v23  ;;  %v6128_v23 = vld [vmem:[%s8923_s4 + $0x48] sm:$0xff]  ;;  %v6135_v20 = vld [vmem:[%s8923_s4 + $0x80] sm:$0xff] }
 0x39f   : > { %3085 = vmatpush.bf16.msrb.mxu2 %v6119_v62  ;;  %2947 = vmatpush.bf16.msra.mxu1 %v6128_v23 }
 0x3a0   : > { %v2578_v61 = vrot.slane %v2577_v26, 4 }
 0x3a1   : > { %3287 = vmatpush.bf16.msrb.mxu3 %v6135_v20 }
 0x3a2   : > { %v2579_v17 = vadd.f32 %v2578_v61, %v2577_v26  ;;  %v3167_v26 = vld [vmem:[#allocation2 + $0x2] sm:$0xff]  ;;  %v9097_v61 = vld [vmem:[#allocation42_spill] sm:$0xff] }
 0x3a3   : > { %3086 = vmatmul.bf16.vlgmr.msrb.gmra.mxu2 %v9097_v61  ;;  %v3199_v37 = vpack.c.bf16 %v3168_v15, %v3167_v26 }
 0x3a4   : > { %v2580_v3 = vrot.slane %v2579_v17, 2 }
 0x3a5   : > { %3288 = vmatmul.bf16.vlgmr.msrb.gmra.mxu3 %v3199_v37 }
 0x3a6   : > { %v2581_v41 = vadd.f32 %v2580_v3, %v2579_v17  ;;  %v6127_v17 = vld [vmem:[%s8923_s4 + $0x40] sm:$0xff] }
 0x3a7   : > { %2948 = vmatpush.bf16.msra.mxu1 %v6127_v17 }
 0x3a8   : > { %v2582_v51 = vrot.slane %v2581_v41, 1 }
 0x3aa   : > { %v2583_v50 = vadd.f32 %v2582_v51, %v2581_v41 }
 0x3ac   : > { %v2584_v10 = vmul.f32 %v2583_v50, %v7440_v21 }
 0x3ae   : > { %v2585_v4 = vadd.f32 1e-05, %v2584_v10 }
 0x3b0   : > { %6257 = vrsqrt.f32 %v2585_v4  ;;  %vm2592_vm2 = vweird.f32 %v2585_v4 }
 0x3b6   : > { %v6258_v46 = vpop.eup %6257 }
 0x3b7   : > { %v2587_v49 = vmul.f32 %v6258_v46, %v2585_v4  ;;  %vm2593_vm1 = vweird.f32 %v6258_v46 }
 0x3b8   : > { %vm2594_vm3 = vmor %vm2592_vm2, %vm2593_vm1 }
 0x3b9   : > { %v2588_v57 = vmul.f32 %v6258_v46, %v2587_v49 }
 0x3bb   : > { %v2589_v63 = vmul.f32 0.5, %v2588_v57 }
 0x3bd   : > { %v2590_v53 = vsub.f32 1.5, %v2589_v63 }
 0x3bf   : > { %v2591_v38 = vmul.f32 %v6258_v46, %v2590_v53  ;;  %v6147_v53 = vld [vmem:[%s8923_s4 + $0xe0] sm:$0xff] }
 0x3c1   : > { %v7695_v3 = vsel %vm2594_vm3, %v6258_v46, %v2591_v38 }
 0x3c2   : > { %v2627_v41 = vmul.f32 %v7695_v3, %v7461_v40  ;;  %v2596_v31 = vmul.f32 %v7695_v3, %v7465_v52  ;;  %v2597_v50 = vmul.f32 %v7695_v3, %v7469_v32  ;;  %v2598_v0 = vmul.f32 %v7695_v3, %v7473_v18 }
 0x3c3   : > { %v2599_v10 = vmul.f32 %v7695_v3, %v7481_v43  ;;  %v2600_v40 = vmul.f32 %v7695_v3, %v7485_v56  ;;  %v2601_v12 = vmul.f32 %v7695_v3, %v7491_v16  ;;  %v2602_v4 = vmul.f32 %v7695_v3, %v7497_v24 }
 0x3c4   : > { %v2663_v51 = vmul.f32 %v7693_v55, %v2627_v41  ;;  %v2603_v32 = vmul.f32 %v7695_v3, %v7503_v9  ;;  %v2604_v18 = vmul.f32 %v7695_v3, %v7509_v1  ;;  %v2605_v43 = vmul.f32 %v7695_v3, %v7515_v42  ;;  %v6149_v9 = vld [vmem:[%s8923_s4 + $0xf0] sm:$0xff] }
 0x3c5   : > { %v2606_v56 = vmul.f32 %v7695_v3, %v7521_v29  ;;  %v2607_v16 = vmul.f32 %v7695_v3, %v7527_v60  ;;  %v2608_v24 = vmul.f32 %v7695_v3, %v7533_v45  ;;  %v2609_v30 = vmul.f32 %v7695_v3, %v7539_v33  ;;  %3515 = vmatpush.bf16.msrb.mxu0 %v6149_v9 }
 0x3c6   : > { %v2699_v52 = vadd.f32 %v7700_v22, %v2663_v51  ;;  %v2610_v42 = vmul.f32 %v7695_v3, %v7545_v39  ;;  %v2611_v29 = vmul.f32 %v7695_v3, %v7551_v6  ;;  %v2612_v60 = vmul.f32 %v7695_v3, %v7557_v54 }
 0x3c7   : > { %v2613_v45 = vmul.f32 %v7695_v3, %v7563_v35  ;;  %v2614_v33 = vmul.f32 %v7695_v3, %v7569_v5  ;;  %v2615_v44 = vmul.f32 %v7695_v3, %v7575_v8  ;;  %v2616_v13 = vmul.f32 %v7695_v3, %v7581_v36 }
 0x3c8   : > { %v2731_v1 = vmax.f32 %v2699_v52, 0.0  ;;  %v2617_v39 = vmul.f32 %v7695_v3, %v7587_v47  ;;  %v2618_v6 = vmul.f32 %v7695_v3, %v7593_v27  ;;  %v2619_v54 = vmul.f32 %v7695_v3, %v7599_v34  ;;  %v6148_v27 = vld [vmem:[%s8923_s4 + $0xe8] sm:$0xff]  ;;  %v6146_v52 = vld [vmem:[%s8923_s4 + $0xd8] sm:$0xff] }
 0x3c9   : > { %v2620_v35 = vmul.f32 %v7695_v3, %v7605_v58  ;;  %v2621_v5 = vmul.f32 %v7695_v3, %v7611_v28  ;;  %v2622_v8 = vmul.f32 %v7695_v3, %v7446_v7  ;;  %v2623_v36 = vmul.f32 %v7695_v3, %v7449_v25  ;;  %3516 = vmatpush.bf16.msrb.mxu0 %v6148_v27 }
 0x3ca   : > { %2763 = vst [vmem:[#allocation2 + $0x189] sm:$0xff] %v2731_v1  ;;  %v2624_v47 = vmul.f32 %v7695_v3, %v7452_v19  ;;  %v2625_v34 = vmul.f32 %v7695_v3, %v7455_v48  ;;  %v2632_v58 = vmul.f32 %v7693_v55, %v2596_v31  ;;  %v2633_v28 = vmul.f32 %v7693_v55, %v2597_v50 }
 0x3cb   : > { %v2634_v14 = vmul.f32 %v7693_v55, %v2598_v0  ;;  %v2635_v7 = vmul.f32 %v7693_v55, %v2599_v10  ;;  %v2636_v25 = vmul.f32 %v7693_v55, %v2600_v40  ;;  %v2637_v46 = vmul.f32 %v7693_v55, %v2601_v12 }
 0x3cc   : > { %v2638_v19 = vmul.f32 %v7693_v55, %v2602_v4  ;;  %v2639_v49 = vmul.f32 %v7693_v55, %v2603_v32  ;;  %v2640_v2 = vmul.f32 %v7693_v55, %v2604_v18  ;;  %v2641_v48 = vmul.f32 %v7693_v55, %v2605_v43 }
 0x3cd   : > { %v2642_v57 = vmul.f32 %v7693_v55, %v2606_v56  ;;  %v2643_v62 = vmul.f32 %v7693_v55, %v2607_v16  ;;  %v2644_v63 = vmul.f32 %v7693_v55, %v2608_v24  ;;  %v2645_v23 = vmul.f32 %v7693_v55, %v2609_v30  ;;  %3517 = vmatpush.bf16.msrb.mxu0 %v6147_v53 }
 0x3ce   : > { %v2646_v20 = vmul.f32 %v7693_v55, %v2610_v42  ;;  %v2647_v26 = vmul.f32 %v7693_v55, %v2611_v29  ;;  %v2648_v15 = vmul.f32 %v7693_v55, %v2612_v60  ;;  %v2649_v61 = vmul.f32 %v7693_v55, %v2613_v45 }
 0x3cf   : > { %v2650_v37 = vmul.f32 %v7693_v55, %v2614_v33  ;;  %v2651_v38 = vmul.f32 %v7693_v55, %v2615_v44  ;;  %v2652_v17 = vmul.f32 %v7693_v55, %v2616_v13  ;;  %v2653_v41 = vmul.f32 %v7693_v55, %v2617_v39  ;;  %v6145_v39 = vld [vmem:[%s8923_s4 + $0xd0] sm:$0xff] }
 0x3d0   : > { %v2654_v59 = vmul.f32 %v7693_v55, %v2618_v6  ;;  %v2655_v51 = vmul.f32 %v7693_v55, %v2619_v54  ;;  %v2656_v31 = vmul.f32 %v7693_v55, %v2620_v35  ;;  %v2657_v50 = vmul.f32 %v7693_v55, %v2621_v5 }
 0x3d1   : > { %v2658_v0 = vmul.f32 %v7693_v55, %v2622_v8  ;;  %v2659_v10 = vmul.f32 %v7693_v55, %v2623_v36  ;;  %v2660_v40 = vmul.f32 %v7693_v55, %v2624_v47  ;;  %v2661_v12 = vmul.f32 %v7693_v55, %v2625_v34  ;;  %3518 = vmatpush.bf16.msrb.mxu0 %v6146_v52 }
 0x3d2   : > { %v7809_v4 = vadd.f32 %v7700_v22, %v2632_v58  ;;  %v7815_v32 = vadd.f32 %v7700_v22, %v2633_v28  ;;  %v7818_v18 = vadd.f32 %v7700_v22, %v2634_v14  ;;  %v7821_v43 = vadd.f32 %v7700_v22, %v2635_v7  ;;  %v6158_v7 = vld [vmem:[%s8923_s4 + $0x138] sm:$0xff] }
 0x3d3   : > { %v7824_v56 = vadd.f32 %v7700_v22, %v2636_v25  ;;  %v7827_v16 = vadd.f32 %v7700_v22, %v2637_v46  ;;  %v7830_v24 = vadd.f32 %v7700_v22, %v2638_v19  ;;  %v7833_v30 = vadd.f32 %v7700_v22, %v2639_v49  ;;  %v6144_v25 = vld [vmem:[%s8923_s4 + $0xc8] sm:$0xff]  ;;  %3748 = vmatpush.bf16.msrb.mxu1 %v6158_v7  ;;  %v6157_v7 = vld [vmem:[%s8923_s4 + $0x130] sm:$0xff] }
 0x3d4   : > { %v7836_v9 = vadd.f32 %v7700_v22, %v2640_v2  ;;  %v7839_v1 = vadd.f32 %v7700_v22, %v2641_v48  ;;  %v7842_v42 = vadd.f32 %v7700_v22, %v2642_v57  ;;  %v7845_v29 = vadd.f32 %v7700_v22, %v2643_v62 }
 0x3d5   : > { %v7848_v60 = vadd.f32 %v7700_v22, %v2644_v63  ;;  %v7851_v45 = vadd.f32 %v7700_v22, %v2645_v23  ;;  %v7854_v33 = vadd.f32 %v7700_v22, %v2646_v20  ;;  %v7857_v44 = vadd.f32 %v7700_v22, %v2647_v26  ;;  %3519 = vmatpush.bf16.msrb.mxu0 %v6145_v39 }
 0x3d6   : > { %v7860_v13 = vadd.f32 %v7700_v22, %v2648_v15  ;;  %v7866_v6 = vadd.f32 %v7700_v22, %v2649_v61  ;;  %v7869_v54 = vadd.f32 %v7700_v22, %v2650_v37  ;;  %v7872_v35 = vadd.f32 %v7700_v22, %v2651_v38  ;;  %v6143_v15 = vld [vmem:[%s8923_s4 + $0xc0] sm:$0xff] }
 0x3d7   : > { %v7875_v5 = vadd.f32 %v7700_v22, %v2652_v17  ;;  %v7878_v8 = vadd.f32 %v7700_v22, %v2653_v41  ;;  %v7881_v36 = vadd.f32 %v7700_v22, %v2654_v59  ;;  %v7884_v47 = vadd.f32 %v7700_v22, %v2655_v51  ;;  %v2828_v41 = vld [vmem:[#allocation2 + $0x1] sm:$0xff]  ;;  %3749 = vmatpush.bf16.msrb.mxu1 %v6157_v7 }
 0x3d8   : > { %v7887_v27 = vadd.f32 %v7700_v22, %v2656_v31  ;;  %v7890_v34 = vadd.f32 %v7700_v22, %v2657_v50  ;;  %v2700_v58 = vmax.f32 %v7809_v4, 0.0  ;;  %v2701_v28 = vmax.f32 %v7815_v32, 0.0 }
 0x3d9   : > { %v2702_v14 = vmax.f32 %v7818_v18, 0.0  ;;  %v7902_v46 = vadd.f32 %v7700_v22, %v2658_v0  ;;  %v7905_v19 = vadd.f32 %v7700_v22, %v2659_v10  ;;  %v7908_v49 = vadd.f32 %v7700_v22, %v2660_v40  ;;  %3520 = vmatpush.bf16.msrb.mxu0 %v6144_v25  ;;  %v2829_v0 = vld [vmem:[#allocation2 + $0x9] sm:$0xff] }
 0x3da   : > { %v2703_v2 = vmax.f32 %v7821_v43, 0.0  ;;  %v7912_v48 = vadd.f32 %v7700_v22, %v2661_v12  ;;  %v2704_v57 = vmax.f32 %v7824_v56, 0.0  ;;  %v2705_v62 = vmax.f32 %v7827_v16, 0.0  ;;  %2732 = vst [vmem:[#allocation2 + $0x19] sm:$0xff] %v2700_v58  ;;  %v6155_v56 = vld [vmem:[%s8923_s4 + $0x120] sm:$0xff] }
 0x3db   : > { %v2706_v63 = vmax.f32 %v7830_v24, 0.0  ;;  %v2707_v23 = vmax.f32 %v7833_v30, 0.0  ;;  %v2708_v20 = vmax.f32 %v7836_v9, 0.0  ;;  %v2709_v53 = vmax.f32 %v7839_v1, 0.0  ;;  %2733 = vst [vmem:[#allocation2 + $0x21] sm:$0xff] %v2701_v28 }
 0x3dc   : > { %v2710_v26 = vmax.f32 %v7842_v42, 0.0  ;;  %v2711_v61 = vmax.f32 %v7845_v29, 0.0  ;;  %v2712_v37 = vmax.f32 %v7848_v60, 0.0  ;;  %v2713_v38 = vmax.f32 %v7851_v45, 0.0  ;;  %2734 = vst [vmem:[#allocation2 + $0x31] sm:$0xff] %v2702_v14 }
 0x3dd   : > { %v2714_v17 = vmax.f32 %v7854_v33, 0.0  ;;  %v2715_v59 = vmax.f32 %v7857_v44, 0.0  ;;  %v2716_v51 = vmax.f32 %v7860_v13, 0.0  ;;  %v2717_v31 = vmax.f32 %v7866_v6, 0.0  ;;  %2735 = vst [vmem:[#allocation2 + $0x39] sm:$0xff] %v2703_v2  ;;  %3521 = vmatpush.bf16.msrb.mxu0 %v6143_v15 }
 0x3de   : > { %v2718_v50 = vmax.f32 %v7869_v54, 0.0  ;;  %v2719_v10 = vmax.f32 %v7872_v35, 0.0  ;;  %v2720_v40 = vmax.f32 %v7875_v5, 0.0  ;;  %v2721_v12 = vmax.f32 %v7878_v8, 0.0  ;;  %2736 = vst [vmem:[#allocation2 + $0x49] sm:$0xff] %v2704_v57 }
 0x3df   : > { %v2722_v52 = vmax.f32 %v7881_v36, 0.0  ;;  %v2723_v24 = vmax.f32 %v7884_v47, 0.0  ;;  %v2724_v30 = vmax.f32 %v7887_v27, 0.0  ;;  %v2725_v9 = vmax.f32 %v7890_v34, 0.0  ;;  %2737 = vst [vmem:[#allocation2 + $0x51] sm:$0xff] %v2705_v62 }
 0x3e0   : > { %v2726_v1 = vmax.f32 %v7902_v46, 0.0  ;;  %v2727_v42 = vmax.f32 %v7905_v19, 0.0  ;;  %v2728_v29 = vmax.f32 %v7908_v49, 0.0  ;;  %v2729_v60 = vmax.f32 %v7912_v48, 0.0  ;;  %2738 = vst [vmem:[#allocation2 + $0x61] sm:$0xff] %v2706_v63 }
 0x3e1   : > { %v2860_v45 = vpack.c.bf16 %v2829_v0, %v2828_v41  ;;  %2739 = vst [vmem:[#allocation2 + $0x69] sm:$0xff] %v2707_v23  ;;  %v2766_v33 = vld [vmem:[#allocation2 + $0x18] sm:$0xff]  ;;  %v7955_v44 = vpack.c.bf16 %v2707_v23, %v2706_v63  ;;  %v7957_v13 = vpack.c.bf16 %v2709_v53, %v2708_v20  ;;  %v7959_v39 = vpack.c.bf16 %v2711_v61, %v2710_v26 }
 0x3e2   : > { %v7961_v6 = vpack.c.bf16 %v2713_v38, %v2712_v37  ;;  %2740 = vst [vmem:[#allocation2 + $0x79] sm:$0xff] %v2708_v20  ;;  %v2767_v54 = vld [vmem:[#allocation2 + $0x20] sm:$0xff]  ;;  %v7963_v8 = vpack.c.bf16 %v2715_v59, %v2714_v17  ;;  %v7965_v36 = vpack.c.bf16 %v2717_v31, %v2716_v51  ;;  %v7967_v47 = vpack.c.bf16 %v2719_v10, %v2718_v50 }
 0x3e3   : > { %2949 = vmatmul.bf16.vlgmr.msra.gmra.mxu1 %v2860_v45  ;;  %v3169_v35 = vld [vmem:[#allocation2 + $0x1a] sm:$0xff]  ;;  %v3170_v5 = vld [vmem:[#allocation2 + $0x22] sm:$0xff]  ;;  %2741 = vst [vmem:[#allocation2 + $0x81] sm:$0xff] %v2709_v53  ;;  %v2797_v27 = vpack.c.bf16 %v2767_v54, %v2766_v33  ;;  %v7974_v25 = vpack.c.bf16 %v2721_v12, %v2720_v40  ;;  %v7976_v46 = vpack.c.bf16 %v2723_v24, %v2722_v52 }
 0x3e4   : > { %v7969_v34 = vpack.c.bf16 %v3170_v5, %v3169_v35  ;;  %2742 = vst [vmem:[#allocation2 + $0x91] sm:$0xff] %v2710_v26  ;;  %v7978_v19 = vpack.c.bf16 %v2725_v9, %v2724_v30  ;;  %v7980_v49 = vpack.c.bf16 %v2727_v42, %v2726_v1  ;;  %v7984_v63 = vpack.c.bf16 %v2729_v60, %v2728_v29  ;;  %v2768_v26 = vld [vmem:[#allocation2 + $0x30] sm:$0xff] }
 0x3e5   : > { %2743 = vst [vmem:[#allocation2 + $0x99] sm:$0xff] %v2711_v61  ;;  %3091 = vmatmul.bf16.gmra.mxu2 %v2797_v27  ;;  %3522 = vmatmul.bf16.vlgmr.msrb.gmra.mxu0 %v2797_v27  ;;  %v2626_v23 = vmul.f32 %v7695_v3, %v7458_v11  ;;  %v2861_v53 = vpack.c.bf16 %v2701_v28, %v2700_v58  ;;  %v2769_v11 = vld [vmem:[#allocation2 + $0x38] sm:$0xff] }
 0x3e6   : > { %3293 = vmatmul.bf16.gmra.mxu3 %v7969_v34  ;;  %2744 = vst [vmem:[#allocation2 + $0xa9] sm:$0xff] %v2712_v37  ;;  %v3171_v3 = vld [vmem:[#allocation2 + $0x32] sm:$0xff]  ;;  %v3172_v61 = vld [vmem:[#allocation2 + $0x3a] sm:$0xff]  ;;  %v2862_v32 = vpack.c.bf16 %v2703_v2, %v2702_v14  ;;  %v3173_v28 = vld [vmem:[#allocation2 + $0x4a] sm:$0xff]  ;;  %v2863_v43 = vpack.c.bf16 %v2705_v62, %v2704_v57 }
 0x3e7   : > { %2745 = vst [vmem:[#allocation2 + $0xb1] sm:$0xff] %v2713_v38  ;;  %v2662_v20 = vmul.f32 %v7693_v55, %v2626_v23  ;;  %v7995_v55 = vpack.c.bf16 %v2769_v11, %v2768_v26  ;;  %v7997_v37 = vpack.c.bf16 %v3172_v61, %v3171_v3  ;;  %v2771_v58 = vld [vmem:[#allocation2 + $0x50] sm:$0xff]  ;;  %v2772_v18 = vld [vmem:[#allocation2 + $0x60] sm:$0xff] }
 0x3e8   : > { %2746 = vst [vmem:[#allocation2 + $0xc1] sm:$0xff] %v2714_v17  ;;  %v3174_v38 = vld [vmem:[#allocation2 + $0x52] sm:$0xff]  ;;  %v6156_v17 = vld [vmem:[%s8923_s4 + $0x128] sm:$0xff] }
 0x3e9   : > { %2747 = vst [vmem:[#allocation2 + $0xc9] sm:$0xff] %v2715_v59  ;;  %v2698_v15 = vadd.f32 %v7700_v22, %v2662_v20  ;;  %v2770_v22 = vld [vmem:[#allocation2 + $0x48] sm:$0xff]  ;;  %v8013_v59 = vpack.c.bf16 %v3174_v38, %v3173_v28  ;;  %3750 = vmatpush.bf16.msrb.mxu1 %v6156_v17 }
 0x3ea   : > { %2748 = vst [vmem:[#allocation2 + $0xd9] sm:$0xff] %v2716_v51  ;;  %v8011_v41 = vpack.c.bf16 %v2771_v58, %v2770_v22  ;;  %v2773_v14 = vld [vmem:[#allocation2 + $0x68] sm:$0xff]  ;;  %v2775_v0 = vld [vmem:[#allocation2 + $0x80] sm:$0xff] }
 0x3eb   : > { %2749 = vst [vmem:[#allocation2 + $0xe1] sm:$0xff] %v2717_v31  ;;  %v2730_v4 = vmax.f32 %v2698_v15, 0.0  ;;  %v3175_v2 = vld [vmem:[#allocation2 + $0x62] sm:$0xff]  ;;  %v3176_v48 = vld [vmem:[#allocation2 + $0x6a] sm:$0xff]  ;;  %v8022_v51 = vpack.c.bf16 %v2773_v14, %v2772_v18 }
 0x3ec   : > { %2750 = vst [vmem:[#allocation2 + $0xf1] sm:$0xff] %v2718_v50  ;;  %v3203_v31 = vpack.c.bf16 %v3176_v48, %v3175_v2  ;;  %v2774_v50 = vld [vmem:[#allocation2 + $0x78] sm:$0xff]  ;;  %v2776_v62 = vld [vmem:[#allocation2 + $0x90] sm:$0xff] }
 0x3ed   : > { %2751 = vst [vmem:[#allocation2 + $0xf9] sm:$0xff] %v2719_v10  ;;  %v3177_v10 = vld [vmem:[#allocation2 + $0x7a] sm:$0xff]  ;;  %v8030_v16 = vpack.c.bf16 %v2775_v0, %v2774_v50  ;;  %3751 = vmatpush.bf16.msrb.mxu1 %v6155_v56 }
 0x3ee   : > { %2752 = vst [vmem:[#allocation2 + $0x109] sm:$0xff] %v2720_v40  ;;  %v3178_v40 = vld [vmem:[#allocation2 + $0x82] sm:$0xff] }
 0x3ef   : > { %2753 = vst [vmem:[#allocation2 + $0x111] sm:$0xff] %v2721_v12  ;;  %v3204_v57 = vpack.c.bf16 %v3178_v40, %v3177_v10  ;;  %v2777_v12 = vld [vmem:[#allocation2 + $0x98] sm:$0xff] }
 0x3f0   : > { %2754 = vst [vmem:[#allocation2 + $0x121] sm:$0xff] %v2722_v52  ;;  %v3179_v52 = vld [vmem:[#allocation2 + $0x92] sm:$0xff]  ;;  %v2781_v54 = vld [vmem:[#allocation2 + $0xc8] sm:$0xff] }
 0x3f1   : > { %2755 = vst [vmem:[#allocation2 + $0x129] sm:$0xff] %v2723_v24  ;;  %v3180_v24 = vld [vmem:[#allocation2 + $0x9a] sm:$0xff]  ;;  %v3183_v35 = vld [vmem:[#allocation2 + $0xc2] sm:$0xff]  ;;  %v3184_v5 = vld [vmem:[#allocation2 + $0xca] sm:$0xff] }
 0x3f2   : > { %2756 = vst [vmem:[#allocation2 + $0x139] sm:$0xff] %v2724_v30  ;;  %v2802_v30 = vpack.c.bf16 %v2777_v12, %v2776_v62  ;;  %v3207_v7 = vpack.c.bf16 %v3184_v5, %v3183_v35  ;;  %v2783_v3 = vld [vmem:[#allocation2 + $0xe0] sm:$0xff] }
 0x3f3   : > { %2954 = vmatmul.bf16.gmra.mxu1 %v2861_v53  ;;  %2757 = vst [vmem:[#allocation2 + $0x141] sm:$0xff] %v2725_v9  ;;  %v3205_v9 = vpack.c.bf16 %v3180_v24, %v3179_v52  ;;  %v2782_v53 = vld [vmem:[#allocation2 + $0xd8] sm:$0xff]  ;;  %v2784_v50 = vld [vmem:[#allocation2 + $0xf0] sm:$0xff] }
 0x3f4   : > { %2758 = vst [vmem:[#allocation2 + $0x151] sm:$0xff] %v2726_v1  ;;  %v2778_v1 = vld [vmem:[#allocation2 + $0xa8] sm:$0xff]  ;;  %v3185_v61 = vld [vmem:[#allocation2 + $0xda] sm:$0xff]  ;;  %v2805_v58 = vpack.c.bf16 %v2783_v3, %v2782_v53 }
 0x3f5   : > { %2759 = vst [vmem:[#allocation2 + $0x159] sm:$0xff] %v2727_v42  ;;  %3096 = vmatmul.bf16.gmra.mxu2 %v7995_v55  ;;  %3527 = vmatmul.bf16.gmra.mxu0 %v7995_v55  ;;  %v2779_v42 = vld [vmem:[#allocation2 + $0xb0] sm:$0xff]  ;;  %v2785_v56 = vld [vmem:[#allocation2 + $0xf8] sm:$0xff] }
 0x3f6   : > { %3298 = vmatmul.bf16.gmra.mxu3 %v7997_v37  ;;  %2760 = vst [vmem:[#allocation2 + $0x169] sm:$0xff] %v2728_v29  ;;  %v3181_v29 = vld [vmem:[#allocation2 + $0xaa] sm:$0xff]  ;;  %v2803_v45 = vpack.c.bf16 %v2779_v42, %v2778_v1  ;;  %v3188_v62 = vld [vmem:[#allocation2 + $0xfa] sm:$0xff]  ;;  %v2806_v24 = vpack.c.bf16 %v2785_v56, %v2784_v50 }
 0x3f7   : > { %2761 = vst [vmem:[#allocation2 + $0x171] sm:$0xff] %v2729_v60  ;;  %v3182_v60 = vld [vmem:[#allocation2 + $0xb2] sm:$0xff] }
 0x3f8   : > { %2762 = vst [vmem:[#allocation2 + $0x181] sm:$0xff] %v2730_v4  ;;  %v3206_v33 = vpack.c.bf16 %v3182_v60, %v3181_v29  ;;  %v3186_v4 = vld [vmem:[#allocation2 + $0xe2] sm:$0xff] }
 0x3f9   : > { %v3208_v28 = vpack.c.bf16 %v3186_v4, %v3185_v61 }
 0x403   : > { %2959 = vmatmul.bf16.gmra.mxu1 %v2862_v32 }
 0x405   : > { %3101 = vmatmul.bf16.gmra.mxu2 %v8011_v41  ;;  %3532 = vmatmul.bf16.gmra.mxu0 %v8011_v41 }
 0x406   : > { %3303 = vmatmul.bf16.gmra.mxu3 %v8013_v59 }
 0x413   : > { %2964 = vmatmul.bf16.gmra.mxu1 %v2863_v43 }
 0x415   : > { %3106 = vmatmul.bf16.gmra.mxu2 %v8022_v51  ;;  %3537 = vmatmul.bf16.gmra.mxu0 %v8022_v51 }
 0x416   : > { %3308 = vmatmul.bf16.gmra.mxu3 %v3203_v31 }
 0x423   : > { %2969 = vmatmul.bf16.gmra.mxu1 %v7955_v44  ;;  %v6154_v44 = vld [vmem:[%s8923_s4 + $0x118] sm:$0xff] }
 0x424   : > { %3752 = vmatpush.bf16.msrb.mxu1 %v6154_v44 }
 0x425   : > { %3111 = vmatmul.bf16.gmra.mxu2 %v8030_v16  ;;  %3542 = vmatmul.bf16.gmra.mxu0 %v8030_v16 }
 0x426   : > { %3313 = vmatmul.bf16.gmra.mxu3 %v3204_v57  ;;  %v3187_v57 = vld [vmem:[#allocation2 + $0xf2] sm:$0xff] }
 0x428   : > { %v3289_v23 = vpop.f32.mrf.mxu3 }
 0x430   : > { %v3291_v11 = vpop.f32.mrf.mxu3 }
 0x433   : > { %2974 = vmatmul.bf16.gmra.mxu1 %v7957_v13  ;;  %v2780_v13 = vld [vmem:[#allocation2 + $0xc0] sm:$0xff] }
 0x434   : > { %v2804_v27 = vpack.c.bf16 %v2781_v54, %v2780_v13  ;;  %v2786_v54 = vld [vmem:[#allocation2 + $0x108] sm:$0xff] }
 0x435   : > { %3116 = vmatmul.bf16.gmra.mxu2 %v2802_v30  ;;  %3547 = vmatmul.bf16.gmra.mxu0 %v2802_v30  ;;  %v3209_v30 = vpack.c.bf16 %v3188_v62, %v3187_v57 }
 0x436   : > { %3318 = vmatmul.bf16.gmra.mxu3 %v3205_v9 }
 0x443   : > { %2979 = vmatmul.bf16.gmra.mxu1 %v7959_v39  ;;  %v3087_v39 = vpop.f32.mrf.mxu2 }
 0x445   : > { %3121 = vmatmul.bf16.gmra.mxu2 %v2803_v45  ;;  %3552 = vmatmul.bf16.gmra.mxu0 %v2803_v45 }
 0x446   : > { %3323 = vmatmul.bf16.gmra.mxu3 %v3206_v33 }
 0x44b   : > { %v3089_v15 = vpop.f32.mrf.mxu2 }
 0x453   : > { %2984 = vmatmul.bf16.gmra.mxu1 %v7961_v6  ;;  %v6153_v6 = vld [vmem:[%s8923_s4 + $0x110] sm:$0xff] }
 0x454   : > { %3753 = vmatpush.bf16.msrb.mxu1 %v6153_v6 }
 0x455   : > { %3126 = vmatmul.bf16.gmra.mxu2 %v2804_v27  ;;  %3557 = vmatmul.bf16.gmra.mxu0 %v2804_v27  ;;  %v2787_v27 = vld [vmem:[#allocation2 + $0x110] sm:$0xff] }
 0x456   : > { %3328 = vmatmul.bf16.gmra.mxu3 %v3207_v7  ;;  %v3189_v7 = vld [vmem:[#allocation2 + $0x10a] sm:$0xff] }
 0x460   : > { %v2950_v20 = vpop.f32.mrf.mxu1 }
 0x461   : > { %v3088_v26 = vadd.f32 %v3087_v39, %v2950_v20  ;;  %v3190_v39 = vld [vmem:[#allocation2 + $0x112] sm:$0xff]  ;;  %v6152_v20 = vld [vmem:[%s8923_s4 + $0x108] sm:$0xff] }
 0x462   : > { %v3523_v32 = vpop.f32.mrf.mxu0  ;;  %3754 = vmatpush.bf16.msrb.mxu1 %v6152_v20  ;;  %v6165_v20 = vld [vmem:[%s8923_s4 + $0x170] sm:$0xff] }
 0x463   : > { %v3369_v22 = vadd.f32 %v3289_v23, %v3088_v26  ;;  %2989 = vmatmul.bf16.gmra.mxu1 %v7963_v8  ;;  %v2807_v26 = vpack.c.bf16 %v2787_v27, %v2786_v54 }
 0x465   : > { %v8044_v38 = vadd.f32 %v3523_v32, %v3369_v22  ;;  %3131 = vmatmul.bf16.gmra.mxu2 %v2805_v58  ;;  %3562 = vmatmul.bf16.gmra.mxu0 %v2805_v58 }
 0x466   : > { %3333 = vmatmul.bf16.gmra.mxu3 %v3208_v28  ;;  %v2788_v28 = vld [vmem:[#allocation2 + $0x120] sm:$0xff] }
 0x468   : > { %v2952_v17 = vpop.f32.mrf.mxu1  ;;  %v3092_v43 = vpop.f32.mrf.mxu2 }
 0x469   : > { %v3090_v18 = vadd.f32 %v3089_v15, %v2952_v17  ;;  %v3294_v14 = vpop.f32.mrf.mxu3  ;;  %v3210_v15 = vpack.c.bf16 %v3190_v39, %v3189_v7 }
 0x46a   : > { %v3525_v48 = vpop.f32.mrf.mxu0 }
 0x46b   : > { %v3370_v2 = vadd.f32 %v3291_v11, %v3090_v18 }
 0x46d   : > { %v8046_v8 = vadd.f32 %v3525_v48, %v3370_v2  ;;  %v3191_v2 = vld [vmem:[#allocation2 + $0x122] sm:$0xff]  ;;  %v3192_v48 = vld [vmem:[#allocation2 + $0x12a] sm:$0xff] }
 0x470   : > { %v2955_v31 = vpop.f32.mrf.mxu1  ;;  %v3094_v10 = vpop.f32.mrf.mxu2 }
 0x471   : > { %v3093_v0 = vadd.f32 %v3092_v43, %v2955_v31  ;;  %v3296_v40 = vpop.f32.mrf.mxu3 }
 0x472   : > { %v3528_v52 = vpop.f32.mrf.mxu0 }
 0x473   : > { %2994 = vmatmul.bf16.gmra.mxu1 %v7965_v36  ;;  %v3371_v12 = vadd.f32 %v3294_v14, %v3093_v0  ;;  %v2789_v14 = vld [vmem:[#allocation2 + $0x128] sm:$0xff] }
 0x474   : > { %v2808_v0 = vpack.c.bf16 %v2789_v14, %v2788_v28  ;;  %v2792_v28 = vld [vmem:[#allocation2 + $0x150] sm:$0xff] }
 0x475   : > { %v8049_v9 = vadd.f32 %v3528_v52, %v3371_v12  ;;  %3136 = vmatmul.bf16.gmra.mxu2 %v2806_v24  ;;  %3567 = vmatmul.bf16.gmra.mxu0 %v2806_v24 }
 0x476   : > { %3338 = vmatmul.bf16.gmra.mxu3 %v3209_v30 }
 0x478   : > { %v2957_v1 = vpop.f32.mrf.mxu1  ;;  %v3097_v29 = vpop.f32.mrf.mxu2 }
 0x479   : > { %v3095_v42 = vadd.f32 %v3094_v10, %v2957_v1  ;;  %v3299_v60 = vpop.f32.mrf.mxu3  ;;  %v3211_v10 = vpack.c.bf16 %v3192_v48, %v3191_v2  ;;  %v2793_v48 = vld [vmem:[#allocation2 + $0x158] sm:$0xff] }
 0x47a   : > { %v3530_v33 = vpop.f32.mrf.mxu0 }
 0x47b   : > { %v3372_v45 = vadd.f32 %v3296_v40, %v3095_v42  ;;  %v2790_v42 = vld [vmem:[#allocation2 + $0x138] sm:$0xff] }
 0x47d   : > { %v8051_v44 = vadd.f32 %v3530_v33, %v3372_v45  ;;  %v2791_v45 = vld [vmem:[#allocation2 + $0x140] sm:$0xff] }
 0x47e   : > { %v3193_v33 = vld [vmem:[#allocation2 + $0x13a] sm:$0xff]  ;;  %v2809_v7 = vpack.c.bf16 %v2791_v45, %v2790_v42  ;;  %v6169_v42 = vld [vmem:[%s8923_s4 + $0x190] sm:$0xff] }
 0x480   : > { %v2960_v13 = vpop.f32.mrf.mxu1  ;;  %v3099_v35 = vpop.f32.mrf.mxu2 }
 0x481   : > { %v3098_v36 = vadd.f32 %v3097_v29, %v2960_v13  ;;  %v3301_v5 = vpop.f32.mrf.mxu3  ;;  %v3194_v13 = vld [vmem:[#allocation2 + $0x142] sm:$0xff] }
 0x482   : > { %v3533_v53 = vpop.f32.mrf.mxu0  ;;  %v3212_v39 = vpack.c.bf16 %v3194_v13, %v3193_v33  ;;  %v6180_v33 = vld [vmem:[%s8923_s4 + $0x1e8] sm:$0xff] }
 0x483   : > { %2999 = vmatmul.bf16.gmra.mxu1 %v7967_v47  ;;  %v3373_v23 = vadd.f32 %v3299_v60, %v3098_v36  ;;  %v6151_v36 = vld [vmem:[%s8923_s4 + $0x100] sm:$0xff] }
 0x484   : > { %3755 = vmatpush.bf16.msrb.mxu1 %v6151_v36 }
 0x485   : > { %v8057_v11 = vadd.f32 %v3533_v53, %v3373_v23  ;;  %3141 = vmatmul.bf16.gmra.mxu2 %v2807_v26  ;;  %3572 = vmatmul.bf16.gmra.mxu0 %v2807_v26  ;;  %v6173_v53 = vld [vmem:[%s8923_s4 + $0x1b0] sm:$0xff] }
 0x486   : > { %3343 = vmatmul.bf16.gmra.mxu3 %v3210_v15 }
 0x488   : > { %v2962_v3 = vpop.f32.mrf.mxu1  ;;  %v3102_v4 = vpop.f32.mrf.mxu2 }
 0x489   : > { %v3100_v61 = vadd.f32 %v3099_v35, %v2962_v3  ;;  %v3304_v22 = vpop.f32.mrf.mxu3  ;;  %v6166_v35 = vld [vmem:[%s8923_s4 + $0x178] sm:$0xff] }
 0x48a   : > { %v3535_v47 = vpop.f32.mrf.mxu0  ;;  %3982 = vmatpush.bf16.msra.mxu2 %v6166_v35  ;;  %v6168_v35 = vld [vmem:[%s8923_s4 + $0x188] sm:$0xff] }
 0x48b   : > { %v3374_v6 = vadd.f32 %v3301_v5, %v3100_v61  ;;  %v6174_v5 = vld [vmem:[%s8923_s4 + $0x1b8] sm:$0xff]  ;;  %v6164_v61 = vld [vmem:[%s8923_s4 + $0x168] sm:$0xff] }
 0x48c   : > { %4216 = vmatpush.bf16.msra.mxu3 %v6174_v5 }
 0x48d   : > { %v8059_v32 = vadd.f32 %v3535_v47, %v3374_v6 }
 0x48e   : > { %3983 = vmatpush.bf16.msra.mxu2 %v6165_v20  ;;  %v6179_v20 = vld [vmem:[%s8923_s4 + $0x1e0] sm:$0xff] }
 0x490   : > { %v2965_v58 = vpop.f32.mrf.mxu1  ;;  %v3104_v18 = vpop.f32.mrf.mxu2  ;;  %4217 = vmatpush.bf16.msra.mxu3 %v6173_v53 }
 0x491   : > { %v3103_v17 = vadd.f32 %v3102_v4, %v2965_v58  ;;  %v3306_v43 = vpop.f32.mrf.mxu3 }
 0x492   : > { %v3538_v50 = vpop.f32.mrf.mxu0  ;;  %3984 = vmatpush.bf16.msra.mxu2 %v6164_v61  ;;  %v3197_v61 = vld [vmem:[#allocation2 + $0x16a] sm:$0xff] }
 0x493   : > { %3004 = vmatmul.bf16.gmra.mxu1 %v7974_v25  ;;  %v3375_v31 = vadd.f32 %v3304_v22, %v3103_v17  ;;  %v6172_v22 = vld [vmem:[%s8923_s4 + $0x1a8] sm:$0xff]  ;;  %v6163_v17 = vld [vmem:[%s8923_s4 + $0x160] sm:$0xff] }
 0x494   : > { %4218 = vmatpush.bf16.msra.mxu3 %v6172_v22 }
 0x495   : > { %v8062_v40 = vadd.f32 %v3538_v50, %v3375_v31  ;;  %3146 = vmatmul.bf16.gmra.mxu2 %v2808_v0  ;;  %3577 = vmatmul.bf16.gmra.mxu0 %v2808_v0  ;;  %v3195_v31 = vld [vmem:[#allocation2 + $0x152] sm:$0xff]  ;;  %v3196_v50 = vld [vmem:[#allocation2 + $0x15a] sm:$0xff] }
 0x496   : > { %3348 = vmatmul.bf16.gmra.mxu3 %v3211_v10  ;;  %3985 = vmatpush.bf16.msra.mxu2 %v6163_v17  ;;  %v6162_v10 = vld [vmem:[%s8923_s4 + $0x158] sm:$0xff] }
 0x498   : > { %v2967_v56 = vpop.f32.mrf.mxu1  ;;  %v3107_v62 = vpop.f32.mrf.mxu2 }
 0x499   : > { %v3105_v57 = vadd.f32 %v3104_v18, %v2967_v56  ;;  %v3309_v12 = vpop.f32.mrf.mxu3  ;;  %v6171_v18 = vld [vmem:[%s8923_s4 + $0x1a0] sm:$0xff]  ;;  %v6182_v56 = vld [vmem:[%s8923_s4 + $0x1f8] sm:$0xff] }
 0x49a   : > { %v3540_v24 = vpop.f32.mrf.mxu0  ;;  %4219 = vmatpush.bf16.msra.mxu3 %v6171_v18  ;;  %4450 = vmatpush.bf16.msra.mxu0 %v6182_v56  ;;  %v6178_v18 = vld [vmem:[%s8923_s4 + $0x1d8] sm:$0xff] }
 0x49b   : > { %v3376_v52 = vadd.f32 %v3306_v43, %v3105_v57  ;;  %3986 = vmatpush.bf16.msra.mxu2 %v6162_v10  ;;  %v6176_v10 = vld [vmem:[%s8923_s4 + $0x1c8] sm:$0xff] }
 0x49d   : > { %v8064_v30 = vadd.f32 %v3540_v24, %v3376_v52  ;;  %v6170_v52 = vld [vmem:[%s8923_s4 + $0x198] sm:$0xff] }
 0x49e   : > { %4220 = vmatpush.bf16.msra.mxu3 %v6170_v52 }
 0x4a0   : > { %v2970_v1 = vpop.f32.mrf.mxu1  ;;  %v3109_v29 = vpop.f32.mrf.mxu2 }
 0x4a1   : > { %v3108_v25 = vadd.f32 %v3107_v62, %v2970_v1  ;;  %v3311_v60 = vpop.f32.mrf.mxu3  ;;  %v2810_v62 = vpack.c.bf16 %v2793_v48, %v2792_v28  ;;  %v6161_v1 = vld [vmem:[%s8923_s4 + $0x150] sm:$0xff] }
 0x4a2   : > { %v3543_v27 = vpop.f32.mrf.mxu0  ;;  %3987 = vmatpush.bf16.msra.mxu2 %v6161_v1  ;;  %4221 = vmatpush.bf16.msra.mxu3 %v6169_v42  ;;  %v3431_v1 = vld [vmem:[#allocation2 + $0x180] sm:$0xff]  ;;  %v3432_v42 = vld [vmem:[#allocation2 + $0x188] sm:$0xff] }
 0x4a3   : > { %3009 = vmatmul.bf16.gmra.mxu1 %v7976_v46  ;;  %v3377_v54 = vadd.f32 %v3309_v12, %v3108_v25  ;;  %v3213_v12 = vpack.c.bf16 %v3196_v50, %v3195_v31  ;;  %v6181_v25 = vld [vmem:[%s8923_s4 + $0x1f0] sm:$0xff] }
 0x4a4   : > { %4451 = vmatpush.bf16.msra.mxu0 %v6181_v25 }
 0x4a5   : > { %v8076_v23 = vadd.f32 %v3543_v27, %v3377_v54  ;;  %3151 = vmatmul.bf16.gmra.mxu2 %v2809_v7  ;;  %3582 = vmatmul.bf16.gmra.mxu0 %v2809_v7  ;;  %v6160_v54 = vld [vmem:[%s8923_s4 + $0x148] sm:$0xff] }
 0x4a6   : > { %3353 = vmatmul.bf16.gmra.mxu3 %v3212_v39  ;;  %v2794_v27 = vld [vmem:[#allocation2 + $0x168] sm:$0xff]  ;;  %3988 = vmatpush.bf16.msra.mxu2 %v6160_v54  ;;  %v6159_v39 = vld [vmem:[%s8923_s4 + $0x140] sm:$0xff] }
 0x4a7   : > { %4222 = vmatpush.bf16.msra.mxu3 %v6168_v35 }
 0x4a8   : > { %v2972_v46 = vpop.f32.mrf.mxu1  ;;  %v3112_v15 = vpop.f32.mrf.mxu2  ;;  %4452 = vmatpush.bf16.msra.mxu0 %v6180_v33 }
 0x4a9   : > { %v3110_v26 = vadd.f32 %v3109_v29, %v2972_v46  ;;  %v3314_v3 = vpop.f32.mrf.mxu3  ;;  %v6167_v46 = vld [vmem:[%s8923_s4 + $0x180] sm:$0xff] }
 0x4aa   : > { %v3545_v6 = vpop.f32.mrf.mxu0  ;;  %3989 = vmatpush.bf16.msra.mxu2 %v6159_v39  ;;  %v3636_v39 = vld [vmem:[#allocation2 + $0x21] sm:$0xff] }
 0x4ab   : > { %v3378_v4 = vadd.f32 %v3311_v60, %v3110_v26  ;;  %4223 = vmatpush.bf16.msra.mxu3 %v6167_v46 }
 0x4ac   : > { %4453 = vmatpush.bf16.msra.mxu0 %v6179_v20 }
 0x4ad   : > { %v8090_v47 = vadd.f32 %v3545_v6, %v3378_v4  ;;  %v3198_v4 = vld [vmem:[#allocation2 + $0x172] sm:$0xff] }
 0x4ae   : > { %v6190_v6 = vld [vmem:[%s8923_s4 + $0x238] sm:$0xff]  ;;  %v3214_v17 = vpack.c.bf16 %v3198_v4, %v3197_v61  ;;  %v6189_v61 = vld [vmem:[%s8923_s4 + $0x230] sm:$0xff] }
 0x4af   : > { %4684 = vmatpush.bf16.msra.mxu1 %v6190_v6 }
 0x4b0   : > { %v2975_v58 = vpop.f32.mrf.mxu1  ;;  %v3114_v14 = vpop.f32.mrf.mxu2  ;;  %4454 = vmatpush.bf16.msra.mxu0 %v6178_v18 }
 0x4b1   : > { %v3113_v43 = vadd.f32 %v3112_v15, %v2975_v58  ;;  %v3316_v2 = vpop.f32.mrf.mxu3 }
 0x4b2   : > { %v3548_v57 = vpop.f32.mrf.mxu0 }
 0x4b3   : > { %3014 = vmatmul.bf16.gmra.mxu1 %v7978_v19  ;;  %v3379_v0 = vadd.f32 %v3314_v3, %v3113_v43  ;;  %v2795_v3 = vld [vmem:[#allocation2 + $0x170] sm:$0xff] }
 0x4b4   : > { %v2811_v28 = vpack.c.bf16 %v2795_v3, %v2794_v27  ;;  %v3638_v3 = vld [vmem:[#allocation2 + $0x39] sm:$0xff]  ;;  %4685 = vmatpush.bf16.msra.mxu1 %v6189_v61 }
 0x4b5   : > { %v8108_v24 = vadd.f32 %v3548_v57, %v3379_v0  ;;  %3156 = vmatmul.bf16.gmra.mxu2 %v2810_v62  ;;  %3587 = vmatmul.bf16.gmra.mxu0 %v2810_v62  ;;  %v6175_v62 = vld [vmem:[%s8923_s4 + $0x1c0] sm:$0xff] }
 0x4b6   : > { %3358 = vmatmul.bf16.gmra.mxu3 %v3213_v12 }
 0x4b8   : > { %v2977_v19 = vpop.f32.mrf.mxu1  ;;  %v3117_v60 = vpop.f32.mrf.mxu2 }
 0x4b9   : > { %v3115_v29 = vadd.f32 %v3114_v14, %v2977_v19  ;;  %v3319_v45 = vpop.f32.mrf.mxu3  ;;  %v6177_v14 = vld [vmem:[%s8923_s4 + $0x1d0] sm:$0xff] }
 0x4ba   : > { %v3550_v36 = vpop.f32.mrf.mxu0  ;;  %4455 = vmatpush.bf16.msra.mxu0 %v6177_v14 }
 0x4bb   : > { %v3380_v13 = vadd.f32 %v3316_v2, %v3115_v29 }
 0x4bd   : > { %v8128_v5 = vadd.f32 %v3550_v36, %v3380_v13 }
 0x4be   : > { %4456 = vmatpush.bf16.msra.mxu0 %v6176_v10  ;;  %v3639_v10 = vld [vmem:[#allocation2 + $0x49] sm:$0xff] }
 0x4c0   : > { %v2980_v7 = vpop.f32.mrf.mxu1  ;;  %v3119_v26 = vpop.f32.mrf.mxu2 }
 0x4c1   : > { %v3118_v53 = vadd.f32 %v3117_v60, %v2980_v7  ;;  %v3321_v15 = vpop.f32.mrf.mxu3  ;;  %v3635_v7 = vld [vmem:[#allocation2 + $0x19] sm:$0xff] }
 0x4c2   : > { %v3553_v58 = vpop.f32.mrf.mxu0  ;;  %4457 = vmatpush.bf16.msra.mxu0 %v6175_v62  ;;  %v3667_v20 = vpack.c.bf16 %v3636_v39, %v3635_v7  ;;  %v3876_v7 = vld [vmem:[#allocation2 + $0x6a] sm:$0xff]  ;;  %v3641_v39 = vld [vmem:[#allocation2 + $0x61] sm:$0xff] }
 0x4c3   : > { %3019 = vmatmul.bf16.gmra.mxu1 %v7980_v49  ;;  %v3381_v22 = vadd.f32 %v3319_v45, %v3118_v53  ;;  %v8162_v45 = vpack.c.bf16 %v3432_v42, %v3431_v1 }
 0x4c5   : > { %v8146_v43 = vadd.f32 %v3553_v58, %v3381_v22  ;;  %3161 = vmatmul.bf16.gmra.mxu2 %v2811_v28  ;;  %3592 = vmatmul.bf16.gmra.mxu0 %v2811_v28 }
 0x4c6   : > { %3363 = vmatmul.bf16.gmra.mxu3 %v3214_v17 }
 0x4c8   : > { %v2982_v49 = vpop.f32.mrf.mxu1  ;;  %v3122_v48 = vpop.f32.mrf.mxu2 }
 0x4c9   : > { %v3120_v2 = vadd.f32 %v3119_v26, %v2982_v49  ;;  %v3324_v31 = vpop.f32.mrf.mxu3 }
 0x4ca   : > { %v3555_v0 = vpop.f32.mrf.mxu0 }
 0x4cb   : > { %v3382_v50 = vadd.f32 %v3321_v15, %v3120_v2 }
 0x4cd   : > { %v8154_v56 = vadd.f32 %v3555_v0, %v3382_v50 }
 0x4d0   : > { %v2985_v57 = vpop.f32.mrf.mxu1  ;;  %v3124_v52 = vpop.f32.mrf.mxu2 }
 0x4d1   : > { %v3123_v12 = vadd.f32 %v3122_v48, %v2985_v57  ;;  %v3326_v19 = vpop.f32.mrf.mxu3  ;;  %v3640_v57 = vld [vmem:[#allocation2 + $0x51] sm:$0xff] }
 0x4d2   : > { %v3558_v29 = vpop.f32.mrf.mxu0 }
 0x4d3   : > { %3024 = vmatmul.bf16.gmra.mxu1 %v7984_v63  ;;  %v3383_v25 = vadd.f32 %v3324_v31, %v3123_v12 }
 0x4d5   : > { %v8160_v60 = vadd.f32 %v3558_v29, %v3383_v25  ;;  %3990 = vmatmul.bf16.vlgmr.msra.gmra.mxu2 %v7969_v34  ;;  %3597 = vmatmul.bf16.gmra.mxu0 %v8162_v45  ;;  %v3637_v34 = vld [vmem:[#allocation2 + $0x31] sm:$0xff] }
 0x4d6   : > { %4224 = vmatmul.bf16.vlgmr.msra.gmra.mxu3 %v7995_v55  ;;  %v3668_v6 = vpack.c.bf16 %v3638_v3, %v3637_v34 }
 0x4d8   : > { %v2987_v33 = vpop.f32.mrf.mxu1  ;;  %v3127_v54 = vpop.f32.mrf.mxu2 }
 0x4d9   : > { %v3125_v13 = vadd.f32 %v3124_v52, %v2987_v33  ;;  %v3329_v36 = vpop.f32.mrf.mxu3 }
 0x4da   : > { %v3560_v27 = vpop.f32.mrf.mxu0 }
 0x4db   : > { %v3384_v35 = vadd.f32 %v3326_v19, %v3125_v13 }
 0x4dd   : > { %v8167_v63 = vadd.f32 %v3560_v27, %v3384_v35  ;;  %v3875_v27 = vld [vmem:[#allocation2 + $0x62] sm:$0xff] }
 0x4e0   : > { %v2990_v46 = vpop.f32.mrf.mxu1  ;;  %v3129_v26 = vpop.f32.mrf.mxu2 }
 0x4e1   : > { %v3128_v53 = vadd.f32 %v3127_v54, %v2990_v46  ;;  %v3331_v15 = vpop.f32.mrf.mxu3  ;;  %v3642_v46 = vld [vmem:[#allocation2 + $0x69] sm:$0xff] }
 0x4e2   : > { %v3563_v4 = vpop.f32.mrf.mxu0 }
 0x4e3   : > { %3756 = vmatmul.bf16.vlgmr.msrb.gmra.mxu1 %v3667_v20  ;;  %v3385_v55 = vadd.f32 %v3329_v36, %v3128_v53  ;;  %v8187_v53 = vpack.c.bf16 %v3876_v7, %v3875_v27 }
 0x4e5   : > { %v8172_v22 = vadd.f32 %v3563_v4, %v3385_v55  ;;  %3995 = vmatmul.bf16.gmra.mxu2 %v7997_v37  ;;  %4458 = vmatmul.bf16.vlgmr.msra.gmra.mxu0 %v3668_v6 }
 0x4e6   : > { %4229 = vmatmul.bf16.gmra.mxu3 %v8011_v41  ;;  %v3669_v41 = vpack.c.bf16 %v3640_v57, %v3639_v10  ;;  %v3644_v10 = vld [vmem:[#allocation2 + $0x81] sm:$0xff] }
 0x4e8   : > { %v2992_v58 = vpop.f32.mrf.mxu1  ;;  %v3132_v17 = vpop.f32.mrf.mxu2 }
 0x4e9   : > { %v3130_v28 = vadd.f32 %v3129_v26, %v2992_v58  ;;  %v3334_v18 = vpop.f32.mrf.mxu3 }
 0x4ea   : > { %v3565_v14 = vpop.f32.mrf.mxu0 }
 0x4eb   : > { %v3386_v49 = vadd.f32 %v3331_v15, %v3130_v28  ;;  %v3670_v15 = vpack.c.bf16 %v3642_v46, %v3641_v39  ;;  %v3880_v46 = vld [vmem:[#allocation2 + $0x9a] sm:$0xff] }
 0x4ed   : > { %v8176_v2 = vadd.f32 %v3565_v14, %v3386_v49 }
 0x4f0   : > { %v2995_v48 = vpop.f32.mrf.mxu1  ;;  %v3134_v50 = vpop.f32.mrf.mxu2 }
 0x4f1   : > { %v3133_v31 = vadd.f32 %v3132_v17, %v2995_v48  ;;  %v3336_v0 = vpop.f32.mrf.mxu3  ;;  %v3877_v17 = vld [vmem:[#allocation2 + $0x7a] sm:$0xff]  ;;  %v3878_v48 = vld [vmem:[#allocation2 + $0x82] sm:$0xff] }
 0x4f2   : > { %v3568_v37 = vpop.f32.mrf.mxu0 }
 0x4f3   : > { %3761 = vmatmul.bf16.gmra.mxu1 %v3668_v6  ;;  %v3387_v62 = vadd.f32 %v3334_v18, %v3133_v31  ;;  %v4111_v31 = vld [vmem:[#allocation2 + $0x90] sm:$0xff] }
 0x4f5   : > { %v8178_v12 = vadd.f32 %v3568_v37, %v3387_v62  ;;  %4000 = vmatmul.bf16.gmra.mxu2 %v8013_v59  ;;  %4463 = vmatmul.bf16.gmra.mxu0 %v3669_v41  ;;  %v8195_v62 = vpack.c.bf16 %v3878_v48, %v3877_v17 }
 0x4f6   : > { %4234 = vmatmul.bf16.gmra.mxu3 %v8022_v51  ;;  %v6188_v51 = vld [vmem:[%s8923_s4 + $0x228] sm:$0xff] }
 0x4f7   : > { %4686 = vmatpush.bf16.msra.mxu1 %v6188_v51  ;;  %v4114_v51 = vld [vmem:[#allocation2 + $0xb0] sm:$0xff] }
 0x4f8   : > { %v2997_v52 = vpop.f32.mrf.mxu1  ;;  %v3137_v1 = vpop.f32.mrf.mxu2 }
 0x4f9   : > { %v3135_v19 = vadd.f32 %v3134_v50, %v2997_v52  ;;  %v3339_v42 = vpop.f32.mrf.mxu3  ;;  %v4112_v50 = vld [vmem:[#allocation2 + $0x98] sm:$0xff] }
 0x4fa   : > { %v3570_v29 = vpop.f32.mrf.mxu0  ;;  %v4139_v37 = vpack.c.bf16 %v4112_v50, %v4111_v31 }
 0x4fb   : > { %v3388_v25 = vadd.f32 %v3336_v0, %v3135_v19  ;;  %v3643_v0 = vld [vmem:[#allocation2 + $0x79] sm:$0xff] }
 0x4fc   : > { %v3671_v52 = vpack.c.bf16 %v3644_v10, %v3643_v0  ;;  %v3881_v10 = vld [vmem:[#allocation2 + $0xaa] sm:$0xff] }
 0x4fd   : > { %v8182_v33 = vadd.f32 %v3570_v29, %v3388_v25 }
 0x500   : > { %v3000_v13 = vpop.f32.mrf.mxu1  ;;  %v3139_v36 = vpop.f32.mrf.mxu2 }
 0x501   : > { %v3138_v54 = vadd.f32 %v3137_v1, %v3000_v13  ;;  %v3341_v35 = vpop.f32.mrf.mxu3 }
 0x502   : > { %v3573_v20 = vpop.f32.mrf.mxu0 }
 0x503   : > { %3766 = vmatmul.bf16.gmra.mxu1 %v3669_v41  ;;  %v3389_v59 = vadd.f32 %v3339_v42, %v3138_v54 }
 0x505   : > { %v8189_v26 = vadd.f32 %v3573_v20, %v3389_v59  ;;  %4005 = vmatmul.bf16.gmra.mxu2 %v8187_v53  ;;  %4468 = vmatmul.bf16.gmra.mxu0 %v3670_v15  ;;  %v4113_v59 = vld [vmem:[#allocation2 + $0xa8] sm:$0xff]  ;;  %v3645_v20 = vld [vmem:[#allocation2 + $0x91] sm:$0xff] }
 0x506   : > { %4239 = vmatmul.bf16.gmra.mxu3 %v8030_v16 }
 0x508   : > { %v3002_v34 = vpop.f32.mrf.mxu1  ;;  %v3142_v55 = vpop.f32.mrf.mxu2 }
 0x509   : > { %v3140_v3 = vadd.f32 %v3139_v36, %v3002_v34  ;;  %v3344_v61 = vpop.f32.mrf.mxu3 }
 0x50a   : > { %v3575_v6 = vpop.f32.mrf.mxu0 }
 0x50b   : > { %v3390_v4 = vadd.f32 %v3341_v35, %v3140_v3  ;;  %v3879_v35 = vld [vmem:[#allocation2 + $0x92] sm:$0xff]  ;;  %v6187_v3 = vld [vmem:[%s8923_s4 + $0x220] sm:$0xff] }
 0x50c   : > { %4687 = vmatpush.bf16.msra.mxu1 %v6187_v3 }
 0x50d   : > { %v8193_v58 = vadd.f32 %v3575_v6, %v3390_v4  ;;  %v4140_v4 = vpack.c.bf16 %v4114_v51, %v4113_v59 }
 0x510   : > { %v3005_v28 = vpop.f32.mrf.mxu1  ;;  %v3144_v49 = vpop.f32.mrf.mxu2 }
 0x511   : > { %v3143_v18 = vadd.f32 %v3142_v55, %v3005_v28  ;;  %v3346_v14 = vpop.f32.mrf.mxu3 }
 0x512   : > { %v3578_v57 = vpop.f32.mrf.mxu0 }
 0x513   : > { %3771 = vmatmul.bf16.gmra.mxu1 %v3670_v15  ;;  %v3391_v16 = vadd.f32 %v3344_v61, %v3143_v18  ;;  %v3646_v15 = vld [vmem:[#allocation2 + $0x99] sm:$0xff]  ;;  %v8205_v61 = vpack.c.bf16 %v3880_v46, %v3879_v35 }
 0x514   : > { %v3672_v28 = vpack.c.bf16 %v3646_v15, %v3645_v20 }
 0x515   : > { %v8197_v41 = vadd.f32 %v3578_v57, %v3391_v16  ;;  %4010 = vmatmul.bf16.gmra.mxu2 %v8195_v62  ;;  %4473 = vmatmul.bf16.gmra.mxu0 %v3671_v52 }
 0x516   : > { %4244 = vmatmul.bf16.gmra.mxu3 %v4139_v37 }
 0x518   : > { %v3007_v19 = vpop.f32.mrf.mxu1  ;;  %v3147_v42 = vpop.f32.mrf.mxu2 }
 0x519   : > { %v3145_v1 = vadd.f32 %v3144_v49, %v3007_v19  ;;  %v3349_v25 = vpop.f32.mrf.mxu3  ;;  %v4115_v19 = vld [vmem:[#allocation2 + $0xc0] sm:$0xff] }
 0x51a   : > { %v3580_v13 = vpop.f32.mrf.mxu0 }
 0x51b   : > { %v3392_v29 = vadd.f32 %v3346_v14, %v3145_v1  ;;  %v4116_v1 = vld [vmem:[#allocation2 + $0xc8] sm:$0xff] }
 0x51c   : > { %v4141_v35 = vpack.c.bf16 %v4116_v1, %v4115_v19 }
 0x51d   : > { %v8200_v54 = vadd.f32 %v3580_v13, %v3392_v29 }
 0x520   : > { %v3010_v36 = vpop.f32.mrf.mxu1  ;;  %v3149_v7 = vpop.f32.mrf.mxu2 }
 0x521   : > { %v3148_v27 = vadd.f32 %v3147_v42, %v3010_v36  ;;  %v3351_v39 = vpop.f32.mrf.mxu3  ;;  %v3647_v42 = vld [vmem:[#allocation2 + $0xa9] sm:$0xff] }
 0x522   : > { %v3583_v55 = vpop.f32.mrf.mxu0 }
 0x523   : > { %3776 = vmatmul.bf16.gmra.mxu1 %v3671_v52  ;;  %v3393_v34 = vadd.f32 %v3349_v25, %v3148_v27  ;;  %v3882_v52 = vld [vmem:[#allocation2 + $0xb2] sm:$0xff] }
 0x524   : > { %v3648_v25 = vld [vmem:[#allocation2 + $0xb1] sm:$0xff]  ;;  %v8212_v36 = vpack.c.bf16 %v3882_v52, %v3881_v10 }
 0x525   : > { %v8207_v6 = vadd.f32 %v3583_v55, %v3393_v34  ;;  %4015 = vmatmul.bf16.gmra.mxu2 %v8205_v61  ;;  %4478 = vmatmul.bf16.gmra.mxu0 %v3672_v28  ;;  %v3883_v55 = vld [vmem:[#allocation2 + $0xc2] sm:$0xff]  ;;  %v6186_v10 = vld [vmem:[%s8923_s4 + $0x218] sm:$0xff] }
 0x526   : > { %4249 = vmatmul.bf16.gmra.mxu3 %v4140_v4  ;;  %4688 = vmatpush.bf16.msra.mxu1 %v6186_v10 }
 0x528   : > { %v3012_v17 = vpop.f32.mrf.mxu1  ;;  %v3152_v49 = vpop.f32.mrf.mxu2 }
 0x529   : > { %v3150_v18 = vadd.f32 %v3149_v7, %v3012_v17  ;;  %v3354_v14 = vpop.f32.mrf.mxu3  ;;  %v3673_v7 = vpack.c.bf16 %v3648_v25, %v3647_v42 }
 0x52a   : > { %v3585_v31 = vpop.f32.mrf.mxu0 }
 0x52b   : > { %v3394_v48 = vadd.f32 %v3351_v39, %v3150_v18  ;;  %v3884_v18 = vld [vmem:[#allocation2 + $0xca] sm:$0xff] }
 0x52d   : > { %v8210_v50 = vadd.f32 %v3585_v31, %v3394_v48  ;;  %v3649_v48 = vld [vmem:[#allocation2 + $0xc1] sm:$0xff]  ;;  %v3650_v31 = vld [vmem:[#allocation2 + $0xc9] sm:$0xff] }
 0x52e   : > { %v3674_v19 = vpack.c.bf16 %v3650_v31, %v3649_v48 }
 0x530   : > { %v3015_v0 = vpop.f32.mrf.mxu1  ;;  %v3154_v57 = vpop.f32.mrf.mxu2 }
 0x531   : > { %v3153_v16 = vadd.f32 %v3152_v49, %v3015_v0  ;;  %v3356_v37 = vpop.f32.mrf.mxu3  ;;  %v4117_v49 = vld [vmem:[#allocation2 + $0xd8] sm:$0xff] }
 0x532   : > { %v3588_v13 = vpop.f32.mrf.mxu0 }
 0x533   : > { %3781 = vmatmul.bf16.gmra.mxu1 %v3672_v28  ;;  %v3395_v29 = vadd.f32 %v3354_v14, %v3153_v16  ;;  %v4118_v14 = vld [vmem:[#allocation2 + $0xe0] sm:$0xff] }
 0x535   : > { %v8214_v27 = vadd.f32 %v3588_v13, %v3395_v29  ;;  %4020 = vmatmul.bf16.gmra.mxu2 %v8212_v36  ;;  %4483 = vmatmul.bf16.gmra.mxu0 %v3673_v7 }
 0x536   : > { %4254 = vmatmul.bf16.gmra.mxu3 %v4141_v35 }
 0x538   : > { %v3017_v39 = vpop.f32.mrf.mxu1  ;;  %v3157_v59 = vpop.f32.mrf.mxu2 }
 0x539   : > { %v3155_v46 = vadd.f32 %v3154_v57, %v3017_v39  ;;  %v3359_v51 = vpop.f32.mrf.mxu3  ;;  %v8222_v57 = vpack.c.bf16 %v3884_v18, %v3883_v55  ;;  %v4120_v55 = vld [vmem:[#allocation2 + $0xf8] sm:$0xff]  ;;  %v3652_v18 = vld [vmem:[#allocation2 + $0xe1] sm:$0xff] }
 0x53a   : > { %v3590_v15 = vpop.f32.mrf.mxu0 }
 0x53b   : > { %v3396_v20 = vadd.f32 %v3356_v37, %v3155_v46  ;;  %v4142_v37 = vpack.c.bf16 %v4118_v14, %v4117_v49  ;;  %v3885_v46 = vld [vmem:[#allocation2 + $0xda] sm:$0xff] }
 0x53d   : > { %v8217_v34 = vadd.f32 %v3590_v15, %v3396_v20  ;;  %v3886_v15 = vld [vmem:[#allocation2 + $0xe2] sm:$0xff] }
 0x540   : > { %v3020_v3 = vpop.f32.mrf.mxu1  ;;  %v3159_v28 = vpop.f32.mrf.mxu2 }
 0x541   : > { %v3158_v4 = vadd.f32 %v3157_v59, %v3020_v3  ;;  %v3361_v17 = vpop.f32.mrf.mxu3  ;;  %v4119_v3 = vld [vmem:[#allocation2 + $0xf0] sm:$0xff] }
 0x542   : > { %v3593_v16 = vpop.f32.mrf.mxu0  ;;  %v4143_v48 = vpack.c.bf16 %v4120_v55, %v4119_v3  ;;  %v3653_v3 = vld [vmem:[#allocation2 + $0xf1] sm:$0xff]  ;;  %v3654_v55 = vld [vmem:[#allocation2 + $0xf9] sm:$0xff] }
 0x543   : > { %3786 = vmatmul.bf16.gmra.mxu1 %v3673_v7  ;;  %v3397_v0 = vadd.f32 %v3359_v51, %v3158_v4  ;;  %v3651_v4 = vld [vmem:[#allocation2 + $0xd9] sm:$0xff] }
 0x544   : > { %v3675_v31 = vpack.c.bf16 %v3652_v18, %v3651_v4 }
 0x545   : > { %v8224_v52 = vadd.f32 %v3593_v16, %v3397_v0  ;;  %4025 = vmatmul.bf16.gmra.mxu2 %v8222_v57  ;;  %4488 = vmatmul.bf16.gmra.mxu0 %v3674_v19 }
 0x546   : > { %4259 = vmatmul.bf16.gmra.mxu3 %v4142_v37 }
 0x548   : > { %v3022_v1 = vpop.f32.mrf.mxu1  ;;  %v3162_v25 = vpop.f32.mrf.mxu2 }
 0x549   : > { %v3160_v42 = vadd.f32 %v3159_v28, %v3022_v1  ;;  %v3364_v29 = vpop.f32.mrf.mxu3  ;;  %v8229_v28 = vpack.c.bf16 %v3886_v15, %v3885_v46  ;;  %v3888_v46 = vld [vmem:[#allocation2 + $0xfa] sm:$0xff]  ;;  %v4122_v15 = vld [vmem:[#allocation2 + $0x110] sm:$0xff] }
 0x54a   : > { %v3595_v35 = vpop.f32.mrf.mxu0 }
 0x54b   : > { %v3398_v13 = vadd.f32 %v3361_v17, %v3160_v42 }
 0x54d   : > { %v8227_v7 = vadd.f32 %v3595_v35, %v3398_v13 }
 0x550   : > { %v3025_v39 = vpop.f32.mrf.mxu1  ;;  %v3164_v51 = vpop.f32.mrf.mxu2 }
 0x551   : > { %v3163_v59 = vadd.f32 %v3162_v25, %v3025_v39  ;;  %v3366_v20 = vpop.f32.mrf.mxu3 }
 0x552   : > { %v3598_v14 = vpop.f32.mrf.mxu0 }
 0x553   : > { %3791 = vmatmul.bf16.gmra.mxu1 %v3674_v19  ;;  %v3399_v49 = vadd.f32 %v3364_v29, %v3163_v59  ;;  %v3887_v29 = vld [vmem:[#allocation2 + $0xf2] sm:$0xff]  ;;  %v4121_v59 = vld [vmem:[#allocation2 + $0x108] sm:$0xff] }
 0x554   : > { %v8240_v18 = vpack.c.bf16 %v3888_v46, %v3887_v29 }
 0x555   : > { %v8231_v17 = vadd.f32 %v3598_v14, %v3399_v49  ;;  %4030 = vmatmul.bf16.gmra.mxu2 %v8229_v28  ;;  %4493 = vmatmul.bf16.gmra.mxu0 %v3675_v31  ;;  %v4144_v49 = vpack.c.bf16 %v4122_v15, %v4121_v59 }
 0x556   : > { %4264 = vmatmul.bf16.gmra.mxu3 %v4143_v48  ;;  %v3676_v48 = vpack.c.bf16 %v3654_v55, %v3653_v3  ;;  %v3890_v3 = vld [vmem:[#allocation2 + $0x112] sm:$0xff]  ;;  %v4123_v55 = vld [vmem:[#allocation2 + $0x120] sm:$0xff] }
 0x558   : > { %v3027_v0 = vpop.f32.mrf.mxu1  ;;  %v3991_v16 = vpop.f32.mrf.mxu2 }
 0x559   : > { %v3165_v10 = vadd.f32 %v3164_v51, %v3027_v0  ;;  %v4225_v37 = vpop.f32.mrf.mxu3  ;;  %v6185_v51 = vld [vmem:[%s8923_s4 + $0x210] sm:$0xff] }
 0x55a   : > { %v3600_v42 = vpop.f32.mrf.mxu0  ;;  %4689 = vmatpush.bf16.msra.mxu1 %v6185_v51  ;;  %v3655_v51 = vld [vmem:[#allocation2 + $0x109] sm:$0xff] }
 0x55b   : > { %v3400_v1 = vadd.f32 %v3366_v20, %v3165_v10 }
 0x55d   : > { %v8234_v25 = vadd.f32 %v3600_v42, %v3400_v1 }
 0x560   : > { %v3757_v19 = vpop.f32.mrf.mxu1  ;;  %v3993_v35 = vpop.f32.mrf.mxu2 }
 0x561   : > { %v3837_v13 = vadd.f32 %v3757_v19, %v8044_v38  ;;  %v4227_v39 = vpop.f32.mrf.mxu3 }
 0x562   : > { %v4459_v20 = vpop.f32.mrf.mxu0 }
 0x563   : > { %3796 = vmatmul.bf16.gmra.mxu1 %v3675_v31  ;;  %v4071_v4 = vadd.f32 %v3991_v16, %v3837_v13 }
 0x565   : > { %v4305_v14 = vadd.f32 %v4225_v37, %v4071_v4  ;;  %4035 = vmatmul.bf16.gmra.mxu2 %v8240_v18  ;;  %4498 = vmatmul.bf16.gmra.mxu0 %v3676_v48  ;;  %v3889_v37 = vld [vmem:[#allocation2 + $0x10a] sm:$0xff] }
 0x566   : > { %4269 = vmatmul.bf16.gmra.mxu3 %v4144_v49  ;;  %v4124_v4 = vld [vmem:[#allocation2 + $0x128] sm:$0xff] }
 0x567   : > { %v8243_v38 = vadd.f32 %v4459_v20, %v4305_v14  ;;  %v3656_v20 = vld [vmem:[#allocation2 + $0x111] sm:$0xff]  ;;  %v8249_v14 = vpack.c.bf16 %v3890_v3, %v3889_v37  ;;  %v3891_v3 = vld [vmem:[#allocation2 + $0x122] sm:$0xff] }
 0x568   : > { %v3759_v0 = vpop.f32.mrf.mxu1  ;;  %v3996_v10 = vpop.f32.mrf.mxu2 }
 0x569   : > { %v3838_v31 = vadd.f32 %v3759_v0, %v8046_v8  ;;  %v4230_v16 = vpop.f32.mrf.mxu3  ;;  %v3677_v0 = vpack.c.bf16 %v3656_v20, %v3655_v51  ;;  %v3892_v51 = vld [vmem:[#allocation2 + $0x12a] sm:$0xff]  ;;  %v4125_v20 = vld [vmem:[#allocation2 + $0x138] sm:$0xff] }
 0x56a   : > { %v4461_v42 = vpop.f32.mrf.mxu0 }
 0x56b   : > { %v4072_v1 = vadd.f32 %v3993_v35, %v3838_v31  ;;  %v4145_v35 = vpack.c.bf16 %v4124_v4, %v4123_v55 }
 0x56d   : > { %v4306_v19 = vadd.f32 %v4227_v39, %v4072_v1 }
 0x56f   : > { %v8246_v29 = vadd.f32 %v4461_v42, %v4306_v19 }
 0x570   : > { %v3762_v13 = vpop.f32.mrf.mxu1  ;;  %v3998_v59 = vpop.f32.mrf.mxu2 }
 0x571   : > { %v3839_v46 = vadd.f32 %v3762_v13, %v8049_v9  ;;  %v4232_v15 = vpop.f32.mrf.mxu3 }
 0x572   : > { %v4464_v49 = vpop.f32.mrf.mxu0 }
 0x573   : > { %3801 = vmatmul.bf16.gmra.mxu1 %v3676_v48  ;;  %v4073_v8 = vadd.f32 %v3996_v10, %v3839_v46 }
 0x575   : > { %v4307_v39 = vadd.f32 %v4230_v16, %v4073_v8  ;;  %4040 = vmatmul.bf16.gmra.mxu2 %v8249_v14  ;;  %4503 = vmatmul.bf16.gmra.mxu0 %v3677_v0  ;;  %v4126_v8 = vld [vmem:[#allocation2 + $0x140] sm:$0xff] }
 0x576   : > { %4274 = vmatmul.bf16.gmra.mxu3 %v4145_v35  ;;  %v3658_v35 = vld [vmem:[#allocation2 + $0x129] sm:$0xff] }
 0x577   : > { %v8252_v31 = vadd.f32 %v4464_v49, %v4307_v39  ;;  %v3657_v49 = vld [vmem:[#allocation2 + $0x121] sm:$0xff]  ;;  %v8261_v39 = vpack.c.bf16 %v3892_v51, %v3891_v3 }
 0x578   : > { %v3764_v9 = vpop.f32.mrf.mxu1  ;;  %v4001_v42 = vpop.f32.mrf.mxu2 }
 0x579   : > { %v3840_v1 = vadd.f32 %v3764_v9, %v8051_v44  ;;  %v4235_v19 = vpop.f32.mrf.mxu3  ;;  %v4146_v9 = vpack.c.bf16 %v4126_v8, %v4125_v20 }
 0x57a   : > { %v4466_v48 = vpop.f32.mrf.mxu0 }
 0x57b   : > { %v4074_v13 = vadd.f32 %v3998_v59, %v3840_v1  ;;  %v6184_v59 = vld [vmem:[%s8923_s4 + $0x208] sm:$0xff] }
 0x57c   : > { %4690 = vmatpush.bf16.msra.mxu1 %v6184_v59  ;;  %v4128_v59 = vld [vmem:[#allocation2 + $0x158] sm:$0xff] }
 0x57d   : > { %v4308_v10 = vadd.f32 %v4232_v15, %v4074_v13  ;;  %v3678_v13 = vpack.c.bf16 %v3658_v35, %v3657_v49  ;;  %v3894_v35 = vld [vmem:[#allocation2 + $0x142] sm:$0xff] }
 0x57f   : > { %v8255_v46 = vadd.f32 %v4466_v48, %v4308_v10 }
 0x580   : > { %v3767_v37 = vpop.f32.mrf.mxu1  ;;  %v4003_v55 = vpop.f32.mrf.mxu2 }
 0x581   : > { %v3841_v16 = vadd.f32 %v3767_v37, %v8057_v11  ;;  %v4237_v4 = vpop.f32.mrf.mxu3 }
 0x582   : > { %v4469_v15 = vpop.f32.mrf.mxu0 }
 0x583   : > { %3806 = vmatmul.bf16.gmra.mxu1 %v3677_v0  ;;  %v4075_v44 = vadd.f32 %v4001_v42, %v3841_v16 }
 0x585   : > { %v4309_v1 = vadd.f32 %v4235_v19, %v4075_v44  ;;  %4045 = vmatmul.bf16.gmra.mxu2 %v8261_v39  ;;  %4508 = vmatmul.bf16.gmra.mxu0 %v3678_v13  ;;  %v3893_v19 = vld [vmem:[#allocation2 + $0x13a] sm:$0xff]  ;;  %v4127_v44 = vld [vmem:[#allocation2 + $0x150] sm:$0xff] }
 0x586   : > { %4279 = vmatmul.bf16.gmra.mxu3 %v4146_v9  ;;  %v3660_v9 = vld [vmem:[#allocation2 + $0x141] sm:$0xff] }
 0x587   : > { %v8264_v11 = vadd.f32 %v4469_v15, %v4309_v1  ;;  %v3659_v15 = vld [vmem:[#allocation2 + $0x139] sm:$0xff] }
 0x588   : > { %v3769_v48 = vpop.f32.mrf.mxu1  ;;  %v4006_v42 = vpop.f32.mrf.mxu2 }
 0x589   : > { %v3842_v0 = vadd.f32 %v3769_v48, %v8059_v32  ;;  %v4240_v10 = vpop.f32.mrf.mxu3  ;;  %v8270_v48 = vpack.c.bf16 %v3894_v35, %v3893_v19  ;;  %v3895_v35 = vld [vmem:[#allocation2 + $0x152] sm:$0xff] }
 0x58a   : > { %v4471_v16 = vpop.f32.mrf.mxu0 }
 0x58b   : > { %v4076_v37 = vadd.f32 %v4003_v55, %v3842_v0  ;;  %v4147_v55 = vpack.c.bf16 %v4128_v59, %v4127_v44 }
 0x58d   : > { %v4310_v21 = vadd.f32 %v4237_v4, %v4076_v37 }
 0x58f   : > { %v8267_v3 = vadd.f32 %v4471_v16, %v4310_v21  ;;  %v3679_v21 = vpack.c.bf16 %v3660_v9, %v3659_v15  ;;  %v3896_v15 = vld [vmem:[#allocation2 + $0x15a] sm:$0xff]  ;;  %v4129_v9 = vld [vmem:[#allocation2 + $0x168] sm:$0xff] }
 0x590   : > { %v3772_v51 = vpop.f32.mrf.mxu1  ;;  %v4008_v8 = vpop.f32.mrf.mxu2 }
 0x591   : > { %9098 = vst [vmem:[#allocation51_spill] sm:$0xff] %v8267_v3  ;;  %v3843_v20 = vadd.f32 %v3772_v51, %v8062_v40  ;;  %v4242_v49 = vpop.f32.mrf.mxu3 }
 0x592   : > { %v4474_v1 = vpop.f32.mrf.mxu0 }
 0x593   : > { %3811 = vmatmul.bf16.gmra.mxu1 %v3678_v13  ;;  %v4077_v32 = vadd.f32 %v4006_v42, %v3843_v20 }
 0x595   : > { %v4311_v4 = vadd.f32 %v4240_v10, %v4077_v32  ;;  %4050 = vmatmul.bf16.gmra.mxu2 %v8270_v48  ;;  %4513 = vmatmul.bf16.gmra.mxu0 %v3679_v21  ;;  %v4130_v32 = vld [vmem:[#allocation2 + $0x170] sm:$0xff] }
 0x596   : > { %4284 = vmatmul.bf16.gmra.mxu3 %v4147_v55  ;;  %v3662_v55 = vld [vmem:[#allocation2 + $0x159] sm:$0xff] }
 0x597   : > { %v8273_v0 = vadd.f32 %v4474_v1, %v4311_v4  ;;  %v3661_v1 = vld [vmem:[#allocation2 + $0x151] sm:$0xff]  ;;  %v4148_v4 = vpack.c.bf16 %v4130_v32, %v4129_v9 }
 0x598   : > { %v3774_v40 = vpop.f32.mrf.mxu1  ;;  %v4011_v16 = vpop.f32.mrf.mxu2 }
 0x599   : > { %v3844_v37 = vadd.f32 %v3774_v40, %v8064_v30  ;;  %v4245_v51 = vpop.f32.mrf.mxu3 }
 0x59a   : > { %v4476_v13 = vpop.f32.mrf.mxu0 }
 0x59b   : > { %v4078_v3 = vadd.f32 %v4008_v8, %v3844_v37  ;;  %v6183_v8 = vld [vmem:[%s8923_s4 + $0x200] sm:$0xff]  ;;  %v3680_v37 = vpack.c.bf16 %v3662_v55, %v3661_v1  ;;  %v3897_v1 = vld [vmem:[#allocation2 + $0x16a] sm:$0xff]  ;;  %v3898_v55 = vld [vmem:[#allocation2 + $0x172] sm:$0xff] }
 0x59c   : > { %4691 = vmatpush.bf16.msra.mxu1 %v6183_v8  ;;  %v3664_v8 = vld [vmem:[#allocation2 + $0x171] sm:$0xff] }
 0x59d   : > { %v4312_v42 = vadd.f32 %v4242_v49, %v4078_v3  ;;  %v8282_v49 = vpack.c.bf16 %v3896_v15, %v3895_v35 }
 0x59f   : > { %v8276_v20 = vadd.f32 %v4476_v13, %v4312_v42 }
 0x5a0   : > { %v3777_v19 = vpop.f32.mrf.mxu1  ;;  %v4013_v44 = vpop.f32.mrf.mxu2 }
 0x5a1   : > { %9099 = vst [vmem:[#allocation58_spill] sm:$0xff] %v8276_v20  ;;  %v3845_v10 = vadd.f32 %v3777_v19, %v8076_v23  ;;  %v4247_v59 = vpop.f32.mrf.mxu3 }
 0x5a2   : > { %v4479_v3 = vpop.f32.mrf.mxu0 }
 0x5a3   : > { %3816 = vmatmul.bf16.gmra.mxu1 %v3679_v21  ;;  %v4079_v30 = vadd.f32 %v4011_v16, %v3845_v10 }
 0x5a5   : > { %v4313_v40 = vadd.f32 %v4245_v51, %v4079_v30  ;;  %4055 = vmatmul.bf16.gmra.mxu2 %v8282_v49  ;;  %4518 = vmatmul.bf16.gmra.mxu0 %v3680_v37  ;;  %v3663_v30 = vld [vmem:[#allocation2 + $0x169] sm:$0xff] }
 0x5a6   : > { %4289 = vmatmul.bf16.gmra.mxu3 %v4148_v4 }
 0x5a7   : > { %v8285_v23 = vadd.f32 %v4479_v3, %v4313_v40 }
 0x5a8   : > { %v3779_v13 = vpop.f32.mrf.mxu1  ;;  %v4016_v16 = vpop.f32.mrf.mxu2 }
 0x5a9   : > { %v3846_v21 = vadd.f32 %v3779_v13, %v8090_v47  ;;  %v4250_v42 = vpop.f32.mrf.mxu3  ;;  %v8291_v47 = vpack.c.bf16 %v3898_v55, %v3897_v1  ;;  %v3899_v55 = vld [vmem:[#allocation2 + $0x182] sm:$0xff] }
 0x5aa   : > { %v4481_v10 = vpop.f32.mrf.mxu0 }
 0x5ab   : > { %v4080_v19 = vadd.f32 %v4013_v44, %v3846_v21  ;;  %v3681_v44 = vpack.c.bf16 %v3664_v8, %v3663_v30  ;;  %v3665_v30 = vld [vmem:[#allocation2 + $0x181] sm:$0xff]  ;;  %v3666_v8 = vld [vmem:[#allocation2 + $0x189] sm:$0xff] }
 0x5ad   : > { %v4314_v20 = vadd.f32 %v4247_v59, %v4080_v19 }
 0x5af   : > { %v8288_v35 = vadd.f32 %v4481_v10, %v4314_v20 }
 0x5b0   : > { %v3782_v15 = vpop.f32.mrf.mxu1  ;;  %v4018_v9 = vpop.f32.mrf.mxu2 }
 0x5b1   : > { %v3847_v51 = vadd.f32 %v3782_v15, %v8108_v24  ;;  %v4252_v32 = vpop.f32.mrf.mxu3 }
 0x5b2   : > { %v4484_v4 = vpop.f32.mrf.mxu0 }
 0x5b3   : > { %3821 = vmatmul.bf16.gmra.mxu1 %v3680_v37  ;;  %v4081_v3 = vadd.f32 %v4016_v16, %v3847_v51 }
 0x5b5   : > { %v4315_v40 = vadd.f32 %v4250_v42, %v4081_v3  ;;  %4060 = vmatmul.bf16.gmra.mxu2 %v8291_v47  ;;  %4523 = vmatmul.bf16.gmra.mxu0 %v3681_v44  ;;  %v6262_v3 = vld [vmem:[#allocation2] sm:$0xff] }
 0x5b6   : > { %4294 = vmatmul.bf16.gmra.mxu3 %v8162_v45  ;;  %v3900_v45 = vld [vmem:[#allocation2 + $0x18a] sm:$0xff] }
 0x5b7   : > { %v8295_v20 = vadd.f32 %v4484_v4, %v4315_v40  ;;  %v4150_v4 = vpack.c.bf16 %v6262_v3, %v6262_v3 }
 0x5b8   : > { %v3784_v24 = vpop.f32.mrf.mxu1  ;;  %v4021_v13 = vpop.f32.mrf.mxu2 }
 0x5b9   : > { %v3848_v59 = vadd.f32 %v3784_v24, %v8128_v5  ;;  %v4255_v21 = vpop.f32.mrf.mxu3  ;;  %v8301_v24 = vpack.c.bf16 %v3900_v45, %v3899_v55  ;;  %v4367_v55 = vld [vmem:[#allocation2 + $0x199] sm:$0xff] }
 0x5ba   : > { %v4486_v37 = vpop.f32.mrf.mxu0 }
 0x5bb   : > { %v4082_v19 = vadd.f32 %v4018_v9, %v3848_v59 }
 0x5bd   : > { %v4316_v16 = vadd.f32 %v4252_v32, %v4082_v19  ;;  %v3682_v32 = vpack.c.bf16 %v3666_v8, %v3665_v30 }
 0x5bf   : > { %v8298_v10 = vadd.f32 %v4486_v37, %v4316_v16 }
 0x5c0   : > { %v3787_v15 = vpop.f32.mrf.mxu1  ;;  %v4023_v51 = vpop.f32.mrf.mxu2 }
 0x5c1   : > { %v3849_v42 = vadd.f32 %v3787_v15, %v8146_v43  ;;  %v4257_v1 = vpop.f32.mrf.mxu3 }
 0x5c2   : > { %v4489_v40 = vpop.f32.mrf.mxu0 }
 0x5c3   : > { %3826 = vmatmul.bf16.gmra.mxu1 %v3681_v44  ;;  %v4083_v5 = vadd.f32 %v4021_v13, %v3849_v42 }
 0x5c5   : > { %v4317_v9 = vadd.f32 %v4255_v21, %v4083_v5  ;;  %4065 = vmatmul.bf16.gmra.mxu2 %v8301_v24  ;;  %4528 = vmatmul.bf16.gmra.mxu0 %v3682_v32  ;;  %v4368_v21 = vld [vmem:[#allocation2 + $0x1a1] sm:$0xff] }
 0x5c6   : > { %4299 = vmatmul.bf16.gmra.mxu3 %v4150_v4  ;;  %v4384_v5 = vpack.c.bf16 %v4368_v21, %v4367_v55 }
 0x5c7   : > { %v8304_v59 = vadd.f32 %v4489_v40, %v4317_v9 }
 0x5c8   : > { %v3789_v43 = vpop.f32.mrf.mxu1  ;;  %v4026_v37 = vpop.f32.mrf.mxu2 }
 0x5c9   : > { %v3850_v19 = vadd.f32 %v3789_v43, %v8154_v56  ;;  %v4260_v16 = vpop.f32.mrf.mxu3 }
 0x5ca   : > { %v4491_v3 = vpop.f32.mrf.mxu0 }
 0x5cb   : > { %v4084_v15 = vadd.f32 %v4023_v51, %v3850_v19 }
 0x5cd   : > { %v4318_v44 = vadd.f32 %v4257_v1, %v4084_v15 }
 0x5cf   : > { %v8307_v13 = vadd.f32 %v4491_v3, %v4318_v44 }
 0x5d0   : > { %v3792_v42 = vpop.f32.mrf.mxu1  ;;  %v4028_v30 = vpop.f32.mrf.mxu2 }
 0x5d1   : > { %9100 = vst [vmem:[#allocation57_spill] sm:$0xff] %v8307_v13  ;;  %v3851_v45 = vadd.f32 %v3792_v42, %v8160_v60  ;;  %v4262_v8 = vpop.f32.mrf.mxu3  ;;  %v4571_v13 = vld [vmem:[#allocation2 + $0x32] sm:$0xff]  ;;  %v4572_v60 = vld [vmem:[#allocation2 + $0x3a] sm:$0xff] }
 0x5d2   : > { %v4494_v40 = vpop.f32.mrf.mxu0  ;;  %v4603_v55 = vpack.c.bf16 %v4572_v60, %v4571_v13 }
 0x5d3   : > { %3831 = vmatmul.bf16.gmra.mxu1 %v3682_v32  ;;  %v4085_v4 = vadd.f32 %v4026_v37, %v3851_v45 }
 0x5d5   : > { %v4319_v9 = vadd.f32 %v4260_v16, %v4085_v4  ;;  %4533 = vmatmul.bf16.gmra.mxu0 %v4384_v5 }
 0x5d7   : > { %v8310_v56 = vadd.f32 %v4494_v40, %v4319_v9 }
 0x5d8   : > { %v3794_v51 = vpop.f32.mrf.mxu1  ;;  %v4031_v43 = vpop.f32.mrf.mxu2 }
 0x5d9   : > { %v3852_v1 = vadd.f32 %v3794_v51, %v8167_v63  ;;  %v4265_v15 = vpop.f32.mrf.mxu3 }
 0x5da   : > { %v4496_v3 = vpop.f32.mrf.mxu0 }
 0x5db   : > { %v4086_v19 = vadd.f32 %v4028_v30, %v3852_v1 }
 0x5dd   : > { %v4320_v44 = vadd.f32 %v4262_v8, %v4086_v19  ;;  %v4573_v19 = vld [vmem:[#allocation2 + $0x4a] sm:$0xff] }
 0x5df   : > { %v8313_v42 = vadd.f32 %v4496_v3, %v4320_v44  ;;  %v4574_v3 = vld [vmem:[#allocation2 + $0x52] sm:$0xff] }
 0x5e0   : > { %v3797_v32 = vpop.f32.mrf.mxu1  ;;  %v4033_v16 = vpop.f32.mrf.mxu2  ;;  %v4604_v60 = vpack.c.bf16 %v4574_v3, %v4573_v19 }
 0x5e1   : > { %v3853_v37 = vadd.f32 %v3797_v32, %v8172_v22  ;;  %v4267_v5 = vpop.f32.mrf.mxu3 }
 0x5e2   : > { %v4499_v45 = vpop.f32.mrf.mxu0 }
 0x5e3   : > { %4692 = vmatmul.bf16.vlgmr.msra.gmra.mxu1 %v4603_v55  ;;  %v4087_v21 = vadd.f32 %v4031_v43, %v3853_v37 }
 0x5e5   : > { %v4321_v4 = vadd.f32 %v4265_v15, %v4087_v21 }
 0x5e7   : > { %v8316_v63 = vadd.f32 %v4499_v45, %v4321_v4 }
 0x5e8   : > { %v3799_v30 = vpop.f32.mrf.mxu1  ;;  %v4036_v9 = vpop.f32.mrf.mxu2 }
 0x5e9   : > { %v3854_v40 = vadd.f32 %v3799_v30, %v8176_v2  ;;  %v4270_v13 = vpop.f32.mrf.mxu3 }
 0x5ea   : > { %v4501_v51 = vpop.f32.mrf.mxu0 }
 0x5eb   : > { %v4088_v8 = vadd.f32 %v4033_v16, %v3854_v40 }
 0x5ed   : > { %v4322_v1 = vadd.f32 %v4267_v5, %v4088_v8 }
 0x5ef   : > { %v8319_v44 = vadd.f32 %v4501_v51, %v4322_v1 }
 0x5f0   : > { %v3802_v22 = vpop.f32.mrf.mxu1  ;;  %v4038_v55 = vpop.f32.mrf.mxu2 }
 0x5f1   : > { %v3855_v43 = vadd.f32 %v3802_v22, %v8178_v12  ;;  %v4272_v45 = vpop.f32.mrf.mxu3 }
 0x5f2   : > { %v4504_v32 = vpop.f32.mrf.mxu0 }
 0x5f3   : > { %4697 = vmatmul.bf16.gmra.mxu1 %v4604_v60  ;;  %v4089_v15 = vadd.f32 %v4036_v9, %v3855_v43 }
 0x5f5   : > { %v4323_v37 = vadd.f32 %v4270_v13, %v4089_v15 }
 0x5f7   : > { %v8322_v21 = vadd.f32 %v4504_v32, %v4323_v37 }
 0x5f8   : > { %v3804_v2 = vpop.f32.mrf.mxu1  ;;  %v4041_v51 = vpop.f32.mrf.mxu2 }
 0x5f9   : > { %v3856_v16 = vadd.f32 %v3804_v2, %v8182_v33  ;;  %v4275_v1 = vpop.f32.mrf.mxu3 }
 0x5fa   : > { %v4506_v5 = vpop.f32.mrf.mxu0 }
 0x5fb   : > { %v4090_v4 = vadd.f32 %v4038_v55, %v3856_v16 }
 0x5fd   : > { %v4324_v30 = vadd.f32 %v4272_v45, %v4090_v4 }
 0x5ff   : > { %v8325_v40 = vadd.f32 %v4506_v5, %v4324_v30  ;;  %v9101_v30 = vld [vmem:[#allocation51_spill] sm:$0xff] }
 0x600   : > { %v3807_v8 = vpop.f32.mrf.mxu1 }
 0x601   : > { %v3857_v12 = vadd.f32 %v3807_v8, %v8189_v26 }
 0x602   : > { %v4509_v19 = vpop.f32.mrf.mxu0 }
 0x603   : > { %4702 = vmatmul.bf16.gmra.mxu1 %v8187_v53  ;;  %v4091_v9 = vadd.f32 %v4041_v51, %v3857_v12  ;;  %v9102_v51 = vld [vmem:[#allocation58_spill] sm:$0xff] }
 0x605   : > { %v4325_v3 = vadd.f32 %v4275_v1, %v4091_v9 }
 0x607   : > { %v8329_v22 = vadd.f32 %v4509_v19, %v4325_v3 }
 0x608   : > { %v3809_v13 = vpop.f32.mrf.mxu1 }
 0x609   : > { %v8332_v33 = vadd.f32 %v3809_v13, %v8193_v58  ;;  %v9105_v13 = vld [vmem:[#allocation57_spill] sm:$0xff] }
 0x610   : > { %v3812_v43 = vpop.f32.mrf.mxu1 }
 0x611   : > { %v8335_v60 = vadd.f32 %v3812_v43, %v8197_v41  ;;  %v4601_v43 = vld [vmem:[#allocation2 + $0x19a] sm:$0xff] }
 0x613   : > { %4707 = vmatmul.bf16.gmra.mxu1 %v8195_v62 }
 0x618   : > { %v3814_v15 = vpop.f32.mrf.mxu1 }
 0x619   : > { %v8339_v26 = vadd.f32 %v3814_v15, %v8200_v54  ;;  %v4602_v15 = vld [vmem:[#allocation2 + $0x1a2] sm:$0xff] }
 0x620   : > { %v3817_v53 = vpop.f32.mrf.mxu1 }
 0x621   : > { %v8342_v32 = vadd.f32 %v3817_v53, %v8207_v6 }
 0x623   : > { %4712 = vmatmul.bf16.gmra.mxu1 %v8205_v61 }
 0x628   : > { %v3819_v37 = vpop.f32.mrf.mxu1 }
 0x629   : > { %v8346_v58 = vadd.f32 %v3819_v37, %v8210_v50 }
 0x630   : > { %v3822_v55 = vpop.f32.mrf.mxu1 }
 0x631   : > { %v8349_v41 = vadd.f32 %v3822_v55, %v8214_v27 }
 0x633   : > { %4717 = vmatmul.bf16.gmra.mxu1 %v8212_v36 }
 0x638   : > { %v3824_v62 = vpop.f32.mrf.mxu1 }
 0x639   : > { %v8353_v54 = vadd.f32 %v3824_v62, %v8217_v34 }
 0x640   : > { %v3827_v2 = vpop.f32.mrf.mxu1 }
 0x641   : > { %v8356_v6 = vadd.f32 %v3827_v2, %v8224_v52  ;;  %v4043_v2 = vpop.f32.mrf.mxu2 }
 0x643   : > { %4722 = vmatmul.bf16.gmra.mxu1 %v8222_v57 }
 0x648   : > { %v3829_v61 = vpop.f32.mrf.mxu1 }
 0x649   : > { %v8360_v50 = vadd.f32 %v3829_v61, %v8227_v7  ;;  %v4277_v61 = vpop.f32.mrf.mxu3 }
 0x650   : > { %v3832_v16 = vpop.f32.mrf.mxu1 }
 0x651   : > { %v8363_v27 = vadd.f32 %v3832_v16, %v8231_v17  ;;  %v4511_v16 = vpop.f32.mrf.mxu0 }
 0x653   : > { %4727 = vmatmul.bf16.gmra.mxu1 %v8229_v28 }
 0x658   : > { %v3834_v36 = vpop.f32.mrf.mxu1 }
 0x659   : > { %v8367_v34 = vadd.f32 %v3834_v36, %v8234_v25 }
 0x660   : > { %v4693_v45 = vpop.f32.mrf.mxu1 }
 0x661   : > { %v8370_v52 = vadd.f32 %v4693_v45, %v8243_v38  ;;  %v4046_v45 = vpop.f32.mrf.mxu2 }
 0x663   : > { %4732 = vmatmul.bf16.gmra.mxu1 %v8240_v18 }
 0x668   : > { %v4695_v57 = vpop.f32.mrf.mxu1 }
 0x669   : > { %v8374_v7 = vadd.f32 %v4695_v57, %v8246_v29 }
 0x670   : > { %v4698_v4 = vpop.f32.mrf.mxu1 }
 0x671   : > { %v8377_v17 = vadd.f32 %v4698_v4, %v8252_v31  ;;  %v4280_v4 = vpop.f32.mrf.mxu3 }
 0x673   : > { %4737 = vmatmul.bf16.gmra.mxu1 %v8249_v14 }
 0x678   : > { %v4700_v28 = vpop.f32.mrf.mxu1 }
 0x679   : > { %v8381_v25 = vadd.f32 %v4700_v28, %v8255_v46  ;;  %v4514_v28 = vpop.f32.mrf.mxu0 }
 0x680   : > { %v4703_v5 = vpop.f32.mrf.mxu1 }
 0x681   : > { %v8384_v38 = vadd.f32 %v4703_v5, %v8264_v11 }
 0x683   : > { %4742 = vmatmul.bf16.gmra.mxu1 %v8261_v39 }
 0x688   : > { %v4705_v18 = vpop.f32.mrf.mxu1 }
 0x689   : > { %v8388_v29 = vadd.f32 %v4705_v18, %v9101_v30  ;;  %v4516_v30 = vpop.f32.mrf.mxu0 }
 0x690   : > { %v4708_v8 = vpop.f32.mrf.mxu1 }
 0x691   : > { %v8391_v31 = vadd.f32 %v4708_v8, %v8273_v0  ;;  %v4805_v8 = vadd.f32 %v8374_v7, %v8370_v52 }
 0x693   : > { %4747 = vmatmul.bf16.gmra.mxu1 %v8270_v48 }
 0x698   : > { %v4710_v14 = vpop.f32.mrf.mxu1 }
 0x699   : > { %v8395_v46 = vadd.f32 %v4710_v14, %v9102_v51  ;;  %v4806_v51 = vadd.f32 %v4805_v8, %v8377_v17 }
 0x6a0   : > { %v4713_v12 = vpop.f32.mrf.mxu1 }
 0x6a1   : > { %v8398_v11 = vadd.f32 %v4713_v12, %v8285_v23  ;;  %v4807_v12 = vadd.f32 %v4806_v51, %v8381_v25 }
 0x6a3   : > { %4752 = vmatmul.bf16.gmra.mxu1 %v8282_v49 }
 0x6a8   : > { %v4715_v39 = vpop.f32.mrf.mxu1 }
 0x6a9   : > { %v8402_v9 = vadd.f32 %v4715_v39, %v8288_v35 }
 0x6b0   : > { %v4718_v1 = vpop.f32.mrf.mxu1 }
 0x6b1   : > { %v8405_v0 = vadd.f32 %v4718_v1, %v8295_v20  ;;  %v4618_v20 = vpack.c.bf16 %v4602_v15, %v4601_v43  ;;  %v4519_v1 = vpop.f32.mrf.mxu0 }
 0x6b3   : > { %4757 = vmatmul.bf16.gmra.mxu1 %v8291_v47 }
 0x6b8   : > { %v4720_v48 = vpop.f32.mrf.mxu1 }
 0x6b9   : > { %v8409_v19 = vadd.f32 %v4720_v48, %v8298_v10 }
 0x6bb   : > { %9103 = vst [vmem:[#allocation46_spill] sm:$0xff] %v8409_v19 }
 0x6c0   : > { %v4723_v3 = vpop.f32.mrf.mxu1 }
 0x6c1   : > { %v8412_v23 = vadd.f32 %v4723_v3, %v8304_v59 }
 0x6c3   : > { %9104 = vst [vmem:[#allocation55_spill] sm:$0xff] %v8412_v23  ;;  %4762 = vmatmul.bf16.gmra.mxu1 %v8301_v24 }
 0x6c8   : > { %v4725_v49 = vpop.f32.mrf.mxu1 }
 0x6c9   : > { %v8416_v35 = vadd.f32 %v4725_v49, %v9105_v13 }
 0x6cb   : > { %9106 = vst [vmem:[#allocation52_spill] sm:$0xff] %v8416_v35 }
 0x6d0   : > { %v4728_v53 = vpop.f32.mrf.mxu1 }
 0x6d1   : > { %v8419_v47 = vadd.f32 %v4728_v53, %v8310_v56  ;;  %v4521_v53 = vpop.f32.mrf.mxu0 }
 0x6d3   : > { %9107 = vst [vmem:[#allocation61_spill] sm:$0xff] %v8419_v47  ;;  %4767 = vmatmul.bf16.gmra.mxu1 %v4618_v20 }
 0x6d8   : > { %v4730_v10 = vpop.f32.mrf.mxu1 }
 0x6d9   : > { %v8422_v37 = vadd.f32 %v4730_v10, %v8313_v42 }
 0x6e0   : > { %v4733_v59 = vpop.f32.mrf.mxu1 }
 0x6e1   : > { %v8425_v55 = vadd.f32 %v4733_v59, %v8316_v63  ;;  %v4048_v63 = vpop.f32.mrf.mxu2 }
 0x6e8   : > { %v4735_v24 = vpop.f32.mrf.mxu1 }
 0x6e9   : > { %v8428_v62 = vadd.f32 %v4735_v24, %v8319_v44  ;;  %v4282_v44 = vpop.f32.mrf.mxu3  ;;  %v4051_v14 = vpop.f32.mrf.mxu2 }
 0x6f0   : > { %v4738_v36 = vpop.f32.mrf.mxu1 }
 0x6f1   : > { %v8431_v56 = vadd.f32 %v4738_v36, %v8322_v21  ;;  %v4285_v39 = vpop.f32.mrf.mxu3  ;;  %v4053_v49 = vpop.f32.mrf.mxu2 }
 0x6f8   : > { %v4740_v57 = vpop.f32.mrf.mxu1 }
 0x6f9   : > { %v8434_v42 = vadd.f32 %v4740_v57, %v8325_v40  ;;  %v4808_v40 = vadd.f32 %v4807_v12, %v8384_v38  ;;  %v4287_v15 = vpop.f32.mrf.mxu3  ;;  %v4056_v36 = vpop.f32.mrf.mxu2 }
 0x6fb   : > { %v4809_v48 = vadd.f32 %v4808_v40, %v8388_v29  ;;  %v4524_v40 = vpop.f32.mrf.mxu0 }
 0x700   : > { %v4743_v5 = vpop.f32.mrf.mxu1 }
 0x701   : > { %v8437_v18 = vadd.f32 %v4743_v5, %v8329_v22  ;;  %v4810_v22 = vadd.f32 %v4809_v48, %v8391_v31  ;;  %v4290_v51 = vpop.f32.mrf.mxu3  ;;  %v4092_v48 = vadd.f32 %v4043_v2, %v8332_v33  ;;  %v4096_v2 = vadd.f32 %v4053_v49, %v8346_v58 }
 0x703   : > { %v4811_v13 = vadd.f32 %v4810_v22, %v8395_v46 }
 0x705   : > { %v4812_v43 = vadd.f32 %v4811_v13, %v8398_v11  ;;  %v4093_v13 = vadd.f32 %v4046_v45, %v8335_v60 }
 0x707   : > { %v4813_v20 = vadd.f32 %v4812_v43, %v8402_v9 }
 0x708   : > { %v4745_v21 = vpop.f32.mrf.mxu1 }
 0x709   : > { %v4814_v59 = vadd.f32 %v4813_v20, %v8405_v0  ;;  %v4094_v20 = vadd.f32 %v4048_v63, %v8339_v26  ;;  %v4292_v60 = vpop.f32.mrf.mxu3 }
 0x70b   : > { %v4815_v24 = vadd.f32 %v4814_v59, %v8409_v19  ;;  %v4058_v59 = vpop.f32.mrf.mxu2  ;;  %v4326_v19 = vadd.f32 %v4277_v61, %v4092_v48  ;;  %v4328_v33 = vadd.f32 %v4282_v44, %v4094_v20  ;;  %v4526_v61 = vpop.f32.mrf.mxu0  ;;  %v4097_v48 = vadd.f32 %v4056_v36, %v8349_v41 }
 0x70d   : > { %v4816_v57 = vadd.f32 %v4815_v24, %v8412_v23  ;;  %v4560_v23 = vadd.f32 %v4511_v16, %v4326_v19  ;;  %v4562_v26 = vadd.f32 %v4516_v30, %v4328_v33  ;;  %v4098_v30 = vadd.f32 %v4058_v59, %v8353_v54 }
 0x70f   : > { %v4817_v5 = vadd.f32 %v4816_v57, %v8416_v35  ;;  %v4327_v35 = vadd.f32 %v4280_v4, %v4093_v13 }
 0x710   : > { %v4748_v3 = vpop.f32.mrf.mxu1 }
 0x711   : > { %v4818_v12 = vadd.f32 %v4817_v5, %v8419_v47  ;;  %v4095_v5 = vadd.f32 %v4051_v14, %v8342_v32  ;;  %v4330_v32 = vadd.f32 %v4287_v15, %v4096_v2  ;;  %v4295_v49 = vpop.f32.mrf.mxu3 }
 0x713   : > { %v4819_v22 = vadd.f32 %v4818_v12, %v8422_v37  ;;  %v4561_v12 = vadd.f32 %v4514_v28, %v4327_v35  ;;  %v4329_v63 = vadd.f32 %v4285_v39, %v4095_v5  ;;  %v4564_v35 = vadd.f32 %v4521_v53, %v4330_v32  ;;  %v4061_v28 = vpop.f32.mrf.mxu2  ;;  %v4529_v53 = vpop.f32.mrf.mxu0 }
 0x714   : > { %v4099_v54 = vadd.f32 %v4061_v28, %v8356_v6 }
 0x715   : > { %v4820_v43 = vadd.f32 %v4819_v22, %v8425_v55  ;;  %v8464_v22 = vadd.f32 %v4745_v21, %v4560_v23  ;;  %v8468_v16 = vadd.f32 %v4748_v3, %v4561_v12  ;;  %v4563_v4 = vadd.f32 %v4519_v1, %v4329_v63 }
 0x716   : > { %v4331_v23 = vadd.f32 %v4290_v51, %v4097_v48  ;;  %v4332_v1 = vadd.f32 %v4292_v60, %v4098_v30  ;;  %v4333_v59 = vadd.f32 %v4295_v49, %v4099_v54 }
 0x717   : > { %v4821_v24 = vadd.f32 %v4820_v43, %v8428_v62 }
 0x718   : > { %v4750_v10 = vpop.f32.mrf.mxu1  ;;  %v4565_v41 = vadd.f32 %v4524_v40, %v4331_v23  ;;  %v4566_v36 = vadd.f32 %v4526_v61, %v4332_v1 }
 0x719   : > { %v4822_v47 = vadd.f32 %v4821_v24, %v8431_v56  ;;  %v8471_v58 = vadd.f32 %v4750_v10, %v4562_v26  ;;  %v4297_v24 = vpop.f32.mrf.mxu3 }
 0x71b   : > { %v4823_v45 = vadd.f32 %v4822_v47, %v8434_v42  ;;  %v4063_v20 = vpop.f32.mrf.mxu2  ;;  %v4531_v5 = vpop.f32.mrf.mxu0 }
 0x71c   : > { %v4100_v2 = vadd.f32 %v4063_v20, %v8360_v50  ;;  %v9108_v20 = vld [vmem:[#allocation43_spill] sm:$0xff] }
 0x71d   : > { %v4824_v19 = vadd.f32 %v4823_v45, %v8437_v18 }
 0x71e   : > { %v4334_v26 = vadd.f32 %v4297_v24, %v4100_v2 }
 0x71f   : > { %v4825_v44 = vadd.f32 %v4824_v19, %v8464_v22 }
 0x720   : > { %v4753_v8 = vpop.f32.mrf.mxu1  ;;  %v4568_v61 = vadd.f32 %v4531_v5, %v4334_v26 }
 0x721   : > { %v4826_v14 = vadd.f32 %v4825_v44, %v8468_v16  ;;  %v8475_v21 = vadd.f32 %v4753_v8, %v4563_v4  ;;  %v4300_v63 = vpop.f32.mrf.mxu3 }
 0x723   : > { %v4827_v39 = vadd.f32 %v4826_v14, %v8471_v58  ;;  %v4066_v45 = vpop.f32.mrf.mxu2  ;;  %v4534_v32 = vpop.f32.mrf.mxu0 }
 0x724   : > { %v4101_v6 = vadd.f32 %v4066_v45, %v8363_v27 }
 0x725   : > { %v4828_v15 = vadd.f32 %v4827_v39, %v8475_v21 }
 0x726   : > { %v4335_v44 = vadd.f32 %v4300_v63, %v4101_v6 }
 0x728   : > { %v4755_v57 = vpop.f32.mrf.mxu1  ;;  %v4569_v28 = vadd.f32 %v4534_v32, %v4335_v44 }
 0x729   : > { %v8478_v3 = vadd.f32 %v4755_v57, %v4564_v35  ;;  %v4567_v57 = vadd.f32 %v4529_v53, %v4333_v59  ;;  %v4302_v50 = vpop.f32.mrf.mxu3 }
 0x72b   : > { %v4829_v51 = vadd.f32 %v4828_v15, %v8478_v3  ;;  %v4068_v35 = vpop.f32.mrf.mxu2 }
 0x72c   : > { %v4102_v23 = vadd.f32 %v4068_v35, %v8367_v34 }
 0x72e   : > { %v4336_v39 = vadd.f32 %v4302_v50, %v4102_v23  ;;  %v9109_v23 = vld [vmem:[#allocation46_spill] sm:$0xff] }
 0x730   : > { %v4758_v47 = vpop.f32.mrf.mxu1 }
 0x731   : > { %v4799_v10 = vadd.f32 %v4758_v47, %v4565_v41  ;;  %v4536_v41 = vpop.f32.mrf.mxu0 }
 0x732   : > { %v4570_v1 = vadd.f32 %v4536_v41, %v4336_v39 }
 0x733   : > { %v4830_v43 = vadd.f32 %v4829_v51, %v4799_v10 }
 0x738   : > { %v4760_v13 = vpop.f32.mrf.mxu1 }
 0x739   : > { %v4800_v8 = vadd.f32 %v4760_v13, %v4566_v36 }
 0x73b   : > { %v4831_v40 = vadd.f32 %v4830_v43, %v4800_v8 }
 0x740   : > { %v4763_v33 = vpop.f32.mrf.mxu1 }
 0x741   : > { %v4801_v12 = vadd.f32 %v4763_v33, %v4567_v57 }
 0x743   : > { %v4832_v60 = vadd.f32 %v4831_v40, %v4801_v12 }
 0x748   : > { %v4765_v48 = vpop.f32.mrf.mxu1 }
 0x749   : > { %v4802_v19 = vadd.f32 %v4765_v48, %v4568_v61 }
 0x74b   : > { %v4833_v4 = vadd.f32 %v4832_v60, %v4802_v19 }
 0x750   : > { %v4768_v47 = vpop.f32.mrf.mxu1 }
 0x751   : > { %v4803_v30 = vadd.f32 %v4768_v47, %v4569_v28 }
 0x753   : > { %v4834_v14 = vadd.f32 %v4833_v4, %v4803_v30 }
 0x758   : > { %v4770_v49 = vpop.f32.mrf.mxu1 }
 0x759   : > { %v4804_v15 = vadd.f32 %v4770_v49, %v4570_v1  ;;  %v9111_v1 = vld [vmem:[#allocation52_spill] sm:$0xff] }
 0x75b   : > { %v4835_v53 = vadd.f32 %v4834_v14, %v4804_v15  ;;  %v9110_v14 = vld [vmem:[#allocation55_spill] sm:$0xff] }
 0x75d   : > { %v4836_v36 = vrot.slane %v4835_v53, 4 }
 0x75f   : > { %v4837_v27 = vadd.f32 %v4836_v36, %v4835_v53  ;;  %v9112_v36 = vld [vmem:[#allocation61_spill] sm:$0xff] }
 0x761   : > { %v4838_v51 = vrot.slane %v4837_v27, 2 }
 0x763   : > { %v4839_v13 = vadd.f32 %v4838_v51, %v4837_v27 }
 0x765   : > { %v4840_v54 = vrot.slane %v4839_v13, 1 }
 0x767   : > { %v4841_v43 = vadd.f32 %v4840_v54, %v4839_v13 }
 0x769   : > { %v8487_v40 = vmul.f32 %v4841_v43, %v9108_v20 }
 0x76b   : > { %v8490_v34 = vsub.f32 %v4799_v10, %v8487_v40  ;;  %v8493_v59 = vsub.f32 %v4800_v8, %v8487_v40  ;;  %v8496_v24 = vsub.f32 %v4801_v12, %v8487_v40  ;;  %v8499_v57 = vsub.f32 %v4802_v19, %v8487_v40 }
 0x76c   : > { %v8502_v5 = vsub.f32 %v4803_v30, %v8487_v40  ;;  %v8505_v33 = vsub.f32 %v4804_v15, %v8487_v40  ;;  %v8509_v2 = vsub.f32 %v8370_v52, %v8487_v40  ;;  %v8513_v10 = vsub.f32 %v8374_v7, %v8487_v40 }
 0x76d   : > { %v8517_v8 = vsub.f32 %v8377_v17, %v8487_v40  ;;  %v8525_v45 = vsub.f32 %v8381_v25, %v8487_v40  ;;  %v8529_v52 = vsub.f32 %v8384_v38, %v8487_v40  ;;  %v8535_v17 = vsub.f32 %v8388_v29, %v8487_v40 }
 0x76e   : > { %v4875_v12 = vmul.f32 %v8509_v2, %v8509_v2  ;;  %v4876_v60 = vmul.f32 %v8513_v10, %v8513_v10  ;;  %v8541_v25 = vsub.f32 %v8391_v31, %v8487_v40  ;;  %v8547_v6 = vsub.f32 %v8395_v46, %v8487_v40 }
 0x76f   : > { %v4877_v7 = vmul.f32 %v8517_v8, %v8517_v8  ;;  %v4878_v61 = vmul.f32 %v8525_v45, %v8525_v45  ;;  %v4879_v38 = vmul.f32 %v8529_v52, %v8529_v52  ;;  %v4880_v29 = vmul.f32 %v8535_v17, %v8535_v17 }
 0x770   : > { %v4907_v26 = vadd.f32 %v4876_v60, %v4875_v12  ;;  %v8553_v32 = vsub.f32 %v8398_v11, %v8487_v40  ;;  %v4881_v31 = vmul.f32 %v8541_v25, %v8541_v25  ;;  %v8559_v44 = vsub.f32 %v8402_v9, %v8487_v40 }
 0x771   : > { %v4882_v46 = vmul.f32 %v8547_v6, %v8547_v6  ;;  %v8565_v28 = vsub.f32 %v8405_v0, %v8487_v40  ;;  %v8571_v30 = vsub.f32 %v9109_v23, %v8487_v40  ;;  %v8577_v41 = vsub.f32 %v9110_v14, %v8487_v40 }
 0x772   : > { %v4908_v63 = vadd.f32 %v4907_v26, %v4877_v7  ;;  %v4883_v11 = vmul.f32 %v8553_v32, %v8553_v32  ;;  %v4884_v9 = vmul.f32 %v8559_v44, %v8559_v44  ;;  %v8583_v49 = vsub.f32 %v9111_v1, %v8487_v40 }
 0x773   : > { %v4885_v0 = vmul.f32 %v8565_v28, %v8565_v28  ;;  %v4886_v15 = vmul.f32 %v8571_v30, %v8571_v30  ;;  %v8589_v27 = vsub.f32 %v9112_v36, %v8487_v40  ;;  %v4887_v51 = vmul.f32 %v8577_v41, %v8577_v41 }
 0x774   : > { %v4909_v48 = vadd.f32 %v4908_v63, %v4878_v61  ;;  %v8595_v54 = vsub.f32 %v8422_v37, %v8487_v40  ;;  %v4888_v43 = vmul.f32 %v8583_v49, %v8583_v49  ;;  %v8601_v60 = vsub.f32 %v8425_v55, %v8487_v40 }
 0x775   : > { %v4889_v7 = vmul.f32 %v8589_v27, %v8589_v27  ;;  %v8607_v61 = vsub.f32 %v8428_v62, %v8487_v40  ;;  %v8643_v23 = vsub.f32 %v8471_v58, %v8487_v40  ;;  %v4901_v36 = vmul.f32 %v8490_v34, %v8490_v34 }
 0x776   : > { %v4910_v19 = vadd.f32 %v4909_v48, %v4879_v38  ;;  %v4890_v37 = vmul.f32 %v8595_v54, %v8595_v54  ;;  %v8613_v38 = vsub.f32 %v8431_v56, %v8487_v40  ;;  %v4891_v55 = vmul.f32 %v8601_v60, %v8601_v60 }
 0x777   : > { %v4892_v62 = vmul.f32 %v8607_v61, %v8607_v61  ;;  %v4898_v58 = vmul.f32 %v8643_v23, %v8643_v23 }
 0x778   : > { %v4911_v4 = vadd.f32 %v4910_v19, %v4880_v29  ;;  %v8619_v29 = vsub.f32 %v8434_v42, %v8487_v40  ;;  %v4893_v56 = vmul.f32 %v8613_v38, %v8613_v38 }
 0x77a   : > { %v4912_v35 = vadd.f32 %v4911_v4, %v4881_v31  ;;  %v8625_v31 = vsub.f32 %v8437_v18, %v8487_v40  ;;  %v4894_v42 = vmul.f32 %v8619_v29, %v8619_v29 }
 0x77c   : > { %v4913_v47 = vadd.f32 %v4912_v35, %v4882_v46  ;;  %v8631_v46 = vsub.f32 %v8464_v22, %v8487_v40  ;;  %v4895_v18 = vmul.f32 %v8625_v31, %v8625_v31 }
 0x77e   : > { %v4914_v50 = vadd.f32 %v4913_v47, %v4883_v11  ;;  %v8637_v11 = vsub.f32 %v8468_v16, %v8487_v40  ;;  %v4896_v22 = vmul.f32 %v8631_v46, %v8631_v46 }
 0x780   : > { %v4915_v39 = vadd.f32 %v4914_v50, %v4884_v9  ;;  %v8649_v50 = vsub.f32 %v8475_v21, %v8487_v40  ;;  %v4897_v16 = vmul.f32 %v8637_v11, %v8637_v11 }
 0x782   : > { %v4916_v53 = vadd.f32 %v4915_v39, %v4885_v0  ;;  %v8655_v0 = vsub.f32 %v8478_v3, %v8487_v40  ;;  %v4899_v1 = vmul.f32 %v8649_v50, %v8649_v50  ;;  %v4902_v3 = vmul.f32 %v8493_v59, %v8493_v59 }
 0x784   : > { %v4917_v13 = vadd.f32 %v4916_v53, %v4886_v15  ;;  %v4900_v21 = vmul.f32 %v8655_v0, %v8655_v0 }
 0x786   : > { %v4918_v12 = vadd.f32 %v4917_v13, %v4887_v51  ;;  %v4903_v13 = vmul.f32 %v8496_v24, %v8496_v24 }
 0x788   : > { %v4919_v26 = vadd.f32 %v4918_v12, %v4888_v43  ;;  %v4904_v12 = vmul.f32 %v8499_v57, %v8499_v57 }
 0x78a   : > { %v4920_v63 = vadd.f32 %v4919_v26, %v4889_v7  ;;  %v4905_v26 = vmul.f32 %v8502_v5, %v8502_v5 }
 0x78c   : > { %v4921_v48 = vadd.f32 %v4920_v63, %v4890_v37  ;;  %v4906_v63 = vmul.f32 %v8505_v33, %v8505_v33 }
 0x78e   : > { %v4922_v19 = vadd.f32 %v4921_v48, %v4891_v55 }
 0x790   : > { %v4923_v4 = vadd.f32 %v4922_v19, %v4892_v62 }
 0x792   : > { %v4924_v35 = vadd.f32 %v4923_v4, %v4893_v56 }
 0x794   : > { %v4925_v47 = vadd.f32 %v4924_v35, %v4894_v42 }
 0x796   : > { %v4926_v9 = vadd.f32 %v4925_v47, %v4895_v18 }
 0x798   : > { %v4927_v14 = vadd.f32 %v4926_v9, %v4896_v22 }
 0x79a   : > { %v4928_v39 = vadd.f32 %v4927_v14, %v4897_v16 }
 0x79c   : > { %v4929_v15 = vadd.f32 %v4928_v39, %v4898_v58 }
 0x79e   : > { %v4930_v53 = vadd.f32 %v4929_v15, %v4899_v1  ;;  %v8679_v1 = vld [vmem:[%s8924_s5] ss:$0 sm:$0xff] }
 0x7a0   : > { %v4931_v51 = vadd.f32 %v4930_v53, %v4900_v21 }
 0x7a2   : > { %v4932_v40 = vadd.f32 %v4931_v51, %v4901_v36  ;;  %v9113_v51 = vld [vmem:[#allocation49_spill] sm:$0xff] }
 0x7a4   : > { %v4933_v43 = vadd.f32 %v4932_v40, %v4902_v3 }
 0x7a6   : > { %v4934_v7 = vadd.f32 %v4933_v43, %v4903_v13 }
 0x7a8   : > { %v4935_v37 = vadd.f32 %v4934_v7, %v4904_v12 }
 0x7aa   : > { %v4936_v55 = vadd.f32 %v4935_v37, %v4905_v26 }
 0x7ac   : > { %v4937_v48 = vadd.f32 %v4936_v55, %v4906_v63 }
 0x7ae   : > { %v4938_v62 = vrot.slane %v4937_v48, 4 }
 0x7b0   : > { %v4939_v19 = vadd.f32 %v4938_v62, %v4937_v48 }
 0x7b2   : > { %v4940_v56 = vrot.slane %v4939_v19, 2 }
 0x7b4   : > { %v4941_v4 = vadd.f32 %v4940_v56, %v4939_v19 }
 0x7b6   : > { %v4942_v42 = vrot.slane %v4941_v4, 1 }
 0x7b8   : > { %v4943_v35 = vadd.f32 %v4942_v42, %v4941_v4 }
 0x7ba   : > { %v4944_v18 = vmul.f32 %v4943_v35, %v9108_v20  ;;  %v8687_v20 = vld [vmem:[%s8925_s6] ss:$0 sm:$0xff] }
 0x7bc   : > { %v4945_v47 = vadd.f32 1e-05, %v4944_v18 }
 0x7be   : > { %6259 = vrsqrt.f32 %v4945_v47  ;;  %vm4952_vm5 = vweird.f32 %v4945_v47 }
 0x7c4   : > { %v6260_v22 = vpop.eup %6259 }
 0x7c5   : > { %v4947_v9 = vmul.f32 %v6260_v22, %v4945_v47  ;;  %vm4953_vm4 = vweird.f32 %v6260_v22 }
 0x7c6   : > { %vm4954_vm6 = vmor %vm4952_vm5, %vm4953_vm4 }
 0x7c7   : > { %v4948_v16 = vmul.f32 %v6260_v22, %v4947_v9 }
 0x7c9   : > { %v4949_v14 = vmul.f32 0.5, %v4948_v16 }
 0x7cb   : > { %v4950_v58 = vsub.f32 1.5, %v4949_v14  ;;  %v9115_v14 = vld [vmem:[#allocation11_spill] sm:$0xff] }
 0x7cd   : > { %v4951_v39 = vmul.f32 %v6260_v22, %v4950_v58  ;;  %v9116_v58 = vld [vmem:[#allocation14_spill] sm:$0xff] }
 0x7cf   : > { %v8682_v15 = vsel %vm4954_vm6, %v6260_v22, %v4951_v39 }
 0x7d0   : > { %v4987_v21 = vmul.f32 %v8682_v15, %v8505_v33  ;;  %v4956_v40 = vmul.f32 %v8682_v15, %v8509_v2  ;;  %v4957_v13 = vmul.f32 %v8682_v15, %v8513_v10  ;;  %v4958_v33 = vmul.f32 %v8682_v15, %v8517_v8 }
 0x7d1   : > { %v4959_v43 = vmul.f32 %v8682_v15, %v8525_v45  ;;  %v4960_v12 = vmul.f32 %v8682_v15, %v8529_v52  ;;  %v4961_v7 = vmul.f32 %v8682_v15, %v8535_v17  ;;  %v4962_v26 = vmul.f32 %v8682_v15, %v8541_v25 }
 0x7d2   : > { %v5023_v53 = vmul.f32 %v8679_v1, %v4987_v21  ;;  %v4992_v2 = vmul.f32 %v8679_v1, %v4956_v40  ;;  %v4993_v37 = vmul.f32 %v8679_v1, %v4957_v13  ;;  %v4994_v10 = vmul.f32 %v8679_v1, %v4958_v33  ;;  %v9118_v33 = vld [vmem:[#allocation18_spill] sm:$0xff] }
 0x7d3   : > { %v4963_v8 = vmul.f32 %v8682_v15, %v8547_v6  ;;  %v4995_v45 = vmul.f32 %v8679_v1, %v4959_v43  ;;  %v4964_v52 = vmul.f32 %v8682_v15, %v8553_v32  ;;  %v4996_v63 = vmul.f32 %v8679_v1, %v4960_v12 }
 0x7d4   : > { %v5059_v36 = vadd.f32 %v8687_v20, %v5023_v53  ;;  %v4965_v17 = vmul.f32 %v8682_v15, %v8559_v44  ;;  %v4966_v25 = vmul.f32 %v8682_v15, %v8565_v28  ;;  %v4997_v55 = vmul.f32 %v8679_v1, %v4961_v7 }
 0x7d5   : > { %v4998_v48 = vmul.f32 %v8679_v1, %v4962_v26  ;;  %v5028_v62 = vadd.f32 %v8687_v20, %v4992_v2  ;;  %v5029_v6 = vadd.f32 %v8687_v20, %v4993_v37  ;;  %v5030_v19 = vadd.f32 %v8687_v20, %v4994_v10  ;;  %v9119_v26 = vld [vmem:[#allocation19_spill] sm:$0xff] }
 0x7d6   : > { %v5091_v3 = vadd.f32 %v5059_v36, %v9113_v51  ;;  %v4967_v32 = vmul.f32 %v8682_v15, %v8571_v30  ;;  %v4999_v56 = vmul.f32 %v8679_v1, %v4963_v8  ;;  %v5031_v44 = vadd.f32 %v8687_v20, %v4995_v45  ;;  %v9117_v36 = vld [vmem:[#allocation15_spill] sm:$0xff]  ;;  %v9120_v8 = vld [vmem:[#allocation22_spill] sm:$0xff] }
 0x7d7   : > { %v4968_v28 = vmul.f32 %v8682_v15, %v8577_v41  ;;  %v4969_v4 = vmul.f32 %v8682_v15, %v8583_v49  ;;  %v5000_v42 = vmul.f32 %v8679_v1, %v4964_v52  ;;  %v5032_v35 = vadd.f32 %v8687_v20, %v4996_v63  ;;  %v9114_v41 = vld [vmem:[#allocation10_spill] sm:$0xff] }
 0x7d8   : > { %5123 = vst [vmem:[%s8696_s13 + $0xf8] sm:$0xff] %v5091_v3  ;;  %v4970_v18 = vmul.f32 %v8682_v15, %v8589_v27  ;;  %v5001_v30 = vmul.f32 %v8679_v1, %v4965_v17  ;;  %v5002_v47 = vmul.f32 %v8679_v1, %v4966_v25  ;;  %v5033_v22 = vadd.f32 %v8687_v20, %v4997_v55  ;;  %v9121_v17 = vld [vmem:[#allocation23_spill] sm:$0xff] }
 0x7d9   : > { %v5034_v9 = vadd.f32 %v8687_v20, %v4998_v48  ;;  %v5060_v16 = vadd.f32 %v5028_v62, %v9114_v41  ;;  %v5061_v49 = vadd.f32 %v5029_v6, %v9115_v14  ;;  %v5062_v39 = vadd.f32 %v5030_v19, %v9116_v58  ;;  %v9122_v62 = vld [vmem:[#allocation26_spill] sm:$0xff] }
 0x7da   : > { %v4971_v21 = vmul.f32 %v8682_v15, %v8595_v54  ;;  %v5003_v27 = vmul.f32 %v8679_v1, %v4967_v32  ;;  %v5035_v53 = vadd.f32 %v8687_v20, %v4999_v56  ;;  %v5063_v51 = vadd.f32 %v5031_v44, %v9117_v36  ;;  %v9123_v56 = vld [vmem:[#allocation27_spill] sm:$0xff]  ;;  %v9128_v36 = vld [vmem:[#allocation6_spill] sm:$0xff] }
 0x7db   : > { %v4972_v3 = vmul.f32 %v8682_v15, %v8601_v60  ;;  %v5004_v40 = vmul.f32 %v8679_v1, %v4968_v28  ;;  %v5036_v13 = vadd.f32 %v8687_v20, %v5000_v42  ;;  %v5064_v43 = vadd.f32 %v5032_v35, %v9118_v33  ;;  %5092 = vst [vmem:[%s8696_s13] sm:$0xff] %v5060_v16  ;;  %v9124_v42 = vld [vmem:[#allocation30_spill] sm:$0xff] }
 0x7dc   : > { %v4973_v54 = vmul.f32 %v8682_v15, %v8607_v61  ;;  %v5005_v12 = vmul.f32 %v8679_v1, %v4969_v4  ;;  %v5037_v7 = vadd.f32 %v8687_v20, %v5001_v30  ;;  %v5065_v2 = vadd.f32 %v5033_v22, %v9119_v26  ;;  %5093 = vst [vmem:[%s8696_s13 + $0x8] sm:$0xff] %v5061_v49  ;;  %v9126_v16 = vld [vmem:[#allocation34_spill] sm:$0xff] }
 0x7dd   : > { %v4974_v60 = vmul.f32 %v8682_v15, %v8613_v38  ;;  %v5006_v37 = vmul.f32 %v8679_v1, %v4970_v18  ;;  %v5038_v10 = vadd.f32 %v8687_v20, %v5002_v47  ;;  %v5066_v45 = vadd.f32 %v5034_v9, %v9120_v8  ;;  %5094 = vst [vmem:[%s8696_s13 + $0x10] sm:$0xff] %v5062_v39  ;;  %v9125_v47 = vld [vmem:[#allocation31_spill] sm:$0xff] }
 0x7de   : > { %v4975_v61 = vmul.f32 %v8682_v15, %v8619_v29  ;;  %v5007_v52 = vmul.f32 %v8679_v1, %v4971_v21  ;;  %v5039_v63 = vadd.f32 %v8687_v20, %v5003_v27  ;;  %v5067_v25 = vadd.f32 %v5035_v53, %v9121_v17  ;;  %5095 = vst [vmem:[%s8696_s13 + $0x18] sm:$0xff] %v5063_v51  ;;  %v9127_v39 = vld [vmem:[#allocation35_spill] sm:$0xff] }
 0x7df   : > { %v4976_v38 = vmul.f32 %v8682_v15, %v8625_v31  ;;  %v5008_v55 = vmul.f32 %v8679_v1, %v4972_v3  ;;  %v5040_v48 = vadd.f32 %v8687_v20, %v5004_v40  ;;  %v5068_v6 = vadd.f32 %v5036_v13, %v9122_v62  ;;  %5096 = vst [vmem:[%s8696_s13 + $0x20] sm:$0xff] %v5064_v43  ;;  %v9129_v13 = vld [vmem:[#allocation7_spill] sm:$0xff]  ;;  %v9135_v62 = vld [vmem:[#allocation17_spill] sm:$0xff] }
 0x7e0   : > { %v4977_v29 = vmul.f32 %v8682_v15, %v8631_v46  ;;  %v5009_v19 = vmul.f32 %v8679_v1, %v4973_v54  ;;  %v5041_v32 = vadd.f32 %v8687_v20, %v5005_v12  ;;  %v5069_v44 = vadd.f32 %v5037_v7, %v9123_v56  ;;  %5097 = vst [vmem:[%s8696_s13 + $0x28] sm:$0xff] %v5065_v2  ;;  %v9130_v12 = vld [vmem:[#allocation8_spill] sm:$0xff] }
 0x7e1   : > { %v4978_v31 = vmul.f32 %v8682_v15, %v8637_v11  ;;  %v5010_v28 = vmul.f32 %v8679_v1, %v4974_v60  ;;  %v5042_v4 = vadd.f32 %v8687_v20, %v5006_v37  ;;  %v5070_v35 = vadd.f32 %v5038_v10, %v9124_v42  ;;  %5098 = vst [vmem:[%s8696_s13 + $0x30] sm:$0xff] %v5066_v45  ;;  %v9131_v60 = vld [vmem:[#allocation9_spill] sm:$0xff]  ;;  %v9132_v45 = vld [vmem:[#allocation12_spill] sm:$0xff] }
 0x7e2   : > { %v4979_v46 = vmul.f32 %v8682_v15, %v8643_v23  ;;  %v5011_v18 = vmul.f32 %v8679_v1, %v4975_v61  ;;  %v5043_v30 = vadd.f32 %v8687_v20, %v5007_v52  ;;  %v5071_v22 = vadd.f32 %v5039_v63, %v9125_v47  ;;  %5099 = vst [vmem:[%s8696_s13 + $0x38] sm:$0xff] %v5067_v25  ;;  %v9133_v63 = vld [vmem:[#allocation13_spill] sm:$0xff]  ;;  %v9134_v25 = vld [vmem:[#allocation16_spill] sm:$0xff] }
 0x7e3   : > { %v4980_v11 = vmul.f32 %v8682_v15, %v8649_v50  ;;  %v5012_v9 = vmul.f32 %v8679_v1, %v4976_v38  ;;  %v5044_v41 = vadd.f32 %v8687_v20, %v5008_v55  ;;  %v5072_v14 = vadd.f32 %v5040_v48, %v9126_v16  ;;  %5100 = vst [vmem:[%s8696_s13 + $0x40] sm:$0xff] %v5068_v6  ;;  %v9138_v42 = vld [vmem:[#allocation24_spill] sm:$0xff] }
 0x7e4   : > { %v4981_v23 = vmul.f32 %v8682_v15, %v8655_v0  ;;  %v5013_v49 = vmul.f32 %v8679_v1, %v4977_v29  ;;  %v5045_v58 = vadd.f32 %v8687_v20, %v5009_v19  ;;  %v5073_v21 = vadd.f32 %v5041_v32, %v9127_v39  ;;  %5101 = vst [vmem:[%s8696_s13 + $0x48] sm:$0xff] %v5069_v44  ;;  %v9136_v32 = vld [vmem:[#allocation20_spill] sm:$0xff] }
 0x7e5   : > { %v4982_v50 = vmul.f32 %v8682_v15, %v8490_v34  ;;  %v5014_v27 = vmul.f32 %v8679_v1, %v4978_v31  ;;  %v5046_v53 = vadd.f32 %v8687_v20, %v5010_v28  ;;  %v5074_v51 = vadd.f32 %v5042_v4, %v9128_v36  ;;  %5102 = vst [vmem:[%s8696_s13 + $0x50] sm:$0xff] %v5070_v35  ;;  %v9137_v31 = vld [vmem:[#allocation21_spill] sm:$0xff]  ;;  %v9140_v47 = vld [vmem:[#allocation28_spill] sm:$0xff] }
 0x7e6   : > { %v4983_v0 = vmul.f32 %v8682_v15, %v8493_v59  ;;  %v5015_v3 = vmul.f32 %v8679_v1, %v4979_v46  ;;  %v5047_v40 = vadd.f32 %v8687_v20, %v5011_v18  ;;  %v5075_v33 = vadd.f32 %v5043_v30, %v9129_v13  ;;  %5103 = vst [vmem:[%s8696_s13 + $0x58] sm:$0xff] %v5071_v22  ;;  %v9139_v46 = vld [vmem:[#allocation25_spill] sm:$0xff] }
 0x7e7   : > { %v4984_v34 = vmul.f32 %v8682_v15, %v8496_v24  ;;  %v5016_v43 = vmul.f32 %v8679_v1, %v4980_v11  ;;  %v5048_v54 = vadd.f32 %v8687_v20, %v5012_v9  ;;  %v5076_v7 = vadd.f32 %v5044_v41, %v9130_v12  ;;  %5104 = vst [vmem:[%s8696_s13 + $0x60] sm:$0xff] %v5072_v14  ;;  %v9141_v11 = vld [vmem:[#allocation29_spill] sm:$0xff]  ;;  %v9142_v41 = vld [vmem:[#allocation32_spill] sm:$0xff] }
 0x7e8   : > { %v4985_v59 = vmul.f32 %v8682_v15, %v8499_v57  ;;  %v5017_v26 = vmul.f32 %v8679_v1, %v4981_v23  ;;  %v5049_v2 = vadd.f32 %v8687_v20, %v5013_v49  ;;  %v5077_v37 = vadd.f32 %v5045_v58, %v9131_v60  ;;  %5105 = vst [vmem:[%s8696_s13 + $0x68] sm:$0xff] %v5073_v21  ;;  %v9143_v14 = vld [vmem:[#allocation33_spill] sm:$0xff] }
 0x7e9   : > { %v4986_v24 = vmul.f32 %v8682_v15, %v8502_v5  ;;  %v5018_v10 = vmul.f32 %v8679_v1, %v4982_v50  ;;  %v5050_v8 = vadd.f32 %v8687_v20, %v5014_v27  ;;  %v5078_v61 = vadd.f32 %v5046_v53, %v9132_v45  ;;  %5106 = vst [vmem:[%s8696_s13 + $0x70] sm:$0xff] %v5074_v51 }
 0x7ea   : > { %v5019_v57 = vmul.f32 %v8679_v1, %v4983_v0  ;;  %v5051_v52 = vadd.f32 %v8687_v20, %v5015_v3  ;;  %v5079_v17 = vadd.f32 %v5047_v40, %v9133_v63  ;;  %5107 = vst [vmem:[%s8696_s13 + $0x78] sm:$0xff] %v5075_v33  ;;  %v5020_v5 = vmul.f32 %v8679_v1, %v4984_v34 }
 0x7eb   : > { %v5052_v15 = vadd.f32 %v8687_v20, %v5016_v43  ;;  %v5080_v38 = vadd.f32 %v5048_v54, %v9134_v25  ;;  %5108 = vst [vmem:[%s8696_s13 + $0x80] sm:$0xff] %v5076_v7  ;;  %v5021_v55 = vmul.f32 %v8679_v1, %v4985_v59  ;;  %v5053_v48 = vadd.f32 %v8687_v20, %v5017_v26 }
 0x7ec   : > { %v5081_v6 = vadd.f32 %v5049_v2, %v9135_v62  ;;  %5109 = vst [vmem:[%s8696_s13 + $0x88] sm:$0xff] %v5077_v37  ;;  %v5022_v29 = vmul.f32 %v8679_v1, %v4986_v24  ;;  %v5054_v19 = vadd.f32 %v8687_v20, %v5018_v10  ;;  %v5082_v56 = vadd.f32 %v5050_v8, %v9136_v32 }
 0x7ed   : > { %5110 = vst [vmem:[%s8696_s13 + $0x90] sm:$0xff] %v5078_v61  ;;  %v5055_v44 = vadd.f32 %v8687_v20, %v5019_v57  ;;  %v5083_v28 = vadd.f32 %v5051_v52, %v9137_v31  ;;  %v5056_v4 = vadd.f32 %v8687_v20, %v5020_v5  ;;  %v5084_v35 = vadd.f32 %v5052_v15, %v9138_v42 }
 0x7ee   : > { %5111 = vst [vmem:[%s8696_s13 + $0x98] sm:$0xff] %v5079_v17  ;;  %v5057_v1 = vadd.f32 %v8687_v20, %v5021_v55  ;;  %v5085_v18 = vadd.f32 %v5053_v48, %v9139_v46  ;;  %v5058_v30 = vadd.f32 %v8687_v20, %v5022_v29  ;;  %v5086_v22 = vadd.f32 %v5054_v19, %v9140_v47  ;;  %v9144_v20 = vld [vmem:[#allocation48_spill] sm:$0xff] }
 0x7ef   : > { %5112 = vst [vmem:[%s8696_s13 + $0xa0] sm:$0xff] %v5080_v38  ;;  %v5087_v9 = vadd.f32 %v5055_v44, %v9141_v11  ;;  %v5088_v16 = vadd.f32 %v5056_v4, %v9142_v41 }
 0x7f0   : > { %5113 = vst [vmem:[%s8696_s13 + $0xa8] sm:$0xff] %v5081_v6  ;;  %v5089_v23 = vadd.f32 %v5057_v1, %v9143_v14  ;;  %v5090_v49 = vadd.f32 %v5058_v30, %v9144_v20 }
 0x7f1   : > { %5114 = vst [vmem:[%s8696_s13 + $0xb0] sm:$0xff] %v5082_v56 }
 0x7f2   : > { %5115 = vst [vmem:[%s8696_s13 + $0xb8] sm:$0xff] %v5083_v28 }
 0x7f3   : > { %5116 = vst [vmem:[%s8696_s13 + $0xc0] sm:$0xff] %v5084_v35 }
 0x7f4   : > { %5117 = vst [vmem:[%s8696_s13 + $0xc8] sm:$0xff] %v5085_v18 }
 0x7f5   : > { %5118 = vst [vmem:[%s8696_s13 + $0xd0] sm:$0xff] %v5086_v22 }
 0x7f6   : > { %5119 = vst [vmem:[%s8696_s13 + $0xd8] sm:$0xff] %v5087_v9 }
 0x7f7   : > { %5120 = vst [vmem:[%s8696_s13 + $0xe0] sm:$0xff] %v5088_v16 }
 0x7f8   : > { %5121 = vst [vmem:[%s8696_s13 + $0xe8] sm:$0xff] %v5089_v23 }
 0x7f9   : > { %5122 = vst [vmem:[%s8696_s13 + $0xf0] sm:$0xff] %v5090_v49 }
 0x7fa   : > { %6290 = shalt.err (!%p6287_p3)
}
 0x7fb   : > { %s6330_s14 = smov 128   ;;  %s6331_s13 = smov 8  }
 0x7fc   : > { %6208 = dma.vmem_to_hbm [thread:$0]  (%p6410_p5), %s5138_s21, 4096, %s5140_s22, %s5125_s23, %s6330_s14, %s6330_s14, %s6331_s13  }
 0x7fd PF: > { %p6214_p4 = scmp.ge.s32.totalorder %s6325_s27, 2  ;;  %s5154_s28 = sand.u32 1, %s6313_s24  }
 0x7fe   : > { %s5155_s19 = scalar_lea.sflag [#allocation4], %s5154_s28 }
 0x7ff   : > { %p6211_p7 = pnand %p6214_p4, %p6414_p6 }
 0x801   : > { %p6212_p8 = pneg %p6211_p7 }
 0x803   : > { %6308 = dma.done.wait (%p6212_p8), %s5155_s19, 4096  }
 0x804   : > { %6310 = vsyncadd (%p6212_p8), %s5155_s19, 4294963200  ;;  %p17_p9 = scmp.ge.s32.totalorder %s6397_s30, 4   ;;  %s9145_s24 = smov %s6317_s25 }
 0x805   : > { %s9146_s25 = smov %s6321_s26  ;;  %s9147_s26 = smov %s6408_s10 }
 0x806   : > { %s9148_s27 = smov %s6397_s30  ;;  %19 = sbr.rel (!%p17_p9) target bundleno = 3 (0x3), region = 101 }
 0x80b   :  { %5161 = vsyncpa [#allocation4], 1 }
 0x80c   :  { %5163 = vsyncpa [#allocation4 + $0x1], 1 }

</bundles_post_ra>
